<compile_context>
chip_gen: v7x
topology: tpu7x:2x2x1
jax: 0.10.0
libtpu: 0.0.40
codegen_flags: <defaults>
</compile_context>

<pallas_src>
import jax
import jax.numpy as jnp
from jax.experimental import pallas as pl
from jax.experimental.pallas import tpu as pltpu


def mlp_kernel(x_ref, w1_ref, b1_ref, w2_ref, b2_ref, w3_ref, b3_ref,
               w4_ref, b4_ref, o_ref):
    # fc1..fc3: bf16 operands on the MXU, f32 accumulation. Bias add + ReLU in
    # f32 (VPU path, works on v5e's non-bf16 VPU). Dropout = identity (eval).
    x = x_ref[...].astype(jnp.bfloat16)                       # (BT, in) bf16

    h = jnp.dot(x, w1_ref[...], preferred_element_type=jnp.float32) + b1_ref[...]
    h = jnp.maximum(h, 0.0)

    h = jnp.dot(h.astype(jnp.bfloat16), w2_ref[...],
                preferred_element_type=jnp.float32) + b2_ref[...]
    h = jnp.maximum(h, 0.0)

    h = jnp.dot(h.astype(jnp.bfloat16), w3_ref[...],
                preferred_element_type=jnp.float32) + b3_ref[...]
    h = jnp.maximum(h, 0.0)

    # fc4 (output_size == 1): VPU multiply + XLU lane-reduce in f32 instead of
    # a zero-padded 128-wide MXU matmul -> output store is (BT, 1) f32 only.
    out = jnp.sum(h * w4_ref[...], axis=-1, keepdims=True) + b4_ref[...]
    o_ref[...] = out                                          # (BT, 1) f32


def prepare_params(params):
    """One-time repack of the Linear params for the kernel.

    Hoisted out of mlp_forward so the bf16 casts / fc4 repack don't re-run
    (with their own HBM round-trips) on every forward call.
    """
    w1, b1, w2, b2, w3, b3, w4, b4 = params
    out_dim = w4.shape[1]
    assert out_dim == 1, "kernel specialised for output_size == 1"
    # TODO(synk): output_size > 1 would instead use a lane-dense (hid, 128*k)
    #             padded fc4 tile on the MXU with a bf16 output store.
    return dict(
        w1=w1.astype(jnp.bfloat16), b1=b1.reshape(1, -1),
        w2=w2.astype(jnp.bfloat16), b2=b2.reshape(1, -1),
        w3=w3.astype(jnp.bfloat16), b3=b3.reshape(1, -1),
        w4_row=w4.reshape(1, -1).astype(jnp.float32),   # (1, hid) f32 for VPU+XLU reduce
        b4=b4.reshape(1, 1).astype(jnp.float32),
    )


def _choose_batch_tile(B, requested, min_grid_steps):
    # Multiple of 128 (MXU/sublane friendly); capped so the grid keeps
    # >= min_grid_steps steps (keeps both v7x TensorCores busy).
    bt = max(128, (int(requested) // 128) * 128)
    if min_grid_steps > 1 and B > 128:
        cap = max(128, ((B // min_grid_steps) // 128) * 128)
        bt = min(bt, cap)
    return bt


def mlp_forward(x, prepared, *, batch_tile=1024, min_grid_steps=2):
    B, in_dim = x.shape
    w1, b1 = prepared["w1"], prepared["b1"]
    w2, b2 = prepared["w2"], prepared["b2"]
    w3, b3 = prepared["w3"], prepared["b3"]
    w4r, b4 = prepared["w4_row"], prepared["b4"]
    hid = w1.shape[1]

    bt = _choose_batch_tile(B, batch_tile, min_grid_steps)
    nb = pl.cdiv(B, bt)
    Bp = nb * bt
    # Pad only if B is not already a tile multiple (avoids an extra HBM pass).
    xin = x if Bp == B else jnp.pad(x, ((0, Bp - B), (0, 0)))

    def resident(arr):                      # weights/biases stay VMEM-resident
        return pl.BlockSpec(arr.shape, lambda i: (0, 0))

    # VMEM budget: resident weights + double-buffered x/out tiles + activation
    # headroom, clamped to fit every generation (v5e 16 MiB default .. v7x 64 MiB).
    weight_bytes = sum(int(a.size) * a.dtype.itemsize
                       for a in (w1, b1, w2, b2, w3, b3, w4r, b4))
    tile_io_bytes = 2 * (bt * in_dim * 4 + bt * 4)     # 2x buffered in/out tiles
    act_bytes = 4 * bt * hid * 4                       # fused-layer intermediates
    vmem_limit = int(min(max(weight_bytes + tile_io_bytes + act_bytes + (4 << 20),
                             16 << 20), 48 << 20))

    flops = 2 * Bp * (in_dim * hid + 2 * hid * hid + hid)
    bytes_accessed = Bp * in_dim * 4 + weight_bytes + Bp * 4

    out = pl.pallas_call(
        mlp_kernel,
        out_shape=jax.ShapeDtypeStruct((Bp, 1), jnp.float32),
        grid_spec=pl.GridSpec(
            grid=(nb,),
            in_specs=[
                pl.BlockSpec((bt, in_dim), lambda i: (i, 0)),
                resident(w1), resident(b1),
                resident(w2), resident(b2),
                resident(w3), resident(b3),
                resident(w4r), resident(b4),
            ],
            out_specs=pl.BlockSpec((bt, 1), lambda i: (i, 0)),
        ),
        compiler_params=pltpu.CompilerParams(
            dimension_semantics=("parallel",),    # batch tiles -> both v7x TCs
            vmem_limit_bytes=vmem_limit,
        ),
        cost_estimate=pl.CostEstimate(
            flops=int(flops), transcendentals=0,
            bytes_accessed=int(bytes_accessed)),
    )(xin, w1, b1, w2, b2, w3, b3, w4r, b4)

    return out[:B]                                     # (B, 1)


def init_params(key, input_size, hidden_size, output_size):
    # Deterministic init mimicking torch.nn.Linear (uniform +/- 1/sqrt(fan_in)).
    ks = jax.random.split(key, 8)

    def linear(kw, kb, fan_in, fan_out):
        bound = 1.0 / jnp.sqrt(jnp.float32(fan_in))
        w = jax.random.uniform(kw, (fan_in, fan_out), jnp.float32, -bound, bound)
        b = jax.random.uniform(kb, (1, fan_out), jnp.float32, -bound, bound)
        return w, b

    w1, b1 = linear(ks[0], ks[1], input_size, hidden_size)
    w2, b2 = linear(ks[2], ks[3], hidden_size, hidden_size)
    w3, b3 = linear(ks[4], ks[5], hidden_size, hidden_size)
    w4, b4 = linear(ks[6], ks[7], hidden_size, output_size)
    return (w1, b1, w2, b2, w3, b3, w4, b4)


if __name__ == "__main__":
    key = jax.random.PRNGKey(0)
    k_x, k_p = jax.random.split(key)

    batch = 2048         # two 1024-row tiles -> exercises the big-tile config
    input_size = 64      # stands in for the embedding dim
    hidden_size = 128    # scaled-down analogue of hidden_size=512
    output_size = 1

    x = jax.random.normal(k_x, (batch, input_size), jnp.float32)
    params = init_params(k_p, input_size, hidden_size, output_size)
    prepared = prepare_params(params)      # one-time cast/repack, hoisted

    out = mlp_forward(x, prepared, batch_tile=1024)
    out = jax.block_until_ready(out)

    # Pure-JAX reference: bf16 rounding on fc1..fc3 MXU operands (as in the
    # kernel); fc4 runs fully in f32 (as in the kernel's lane-reduce path).
    w1, b1, w2, b2, w3, b3, w4, b4 = params
    r = lambda a: a.astype(jnp.bfloat16).astype(jnp.float32)
    h = jnp.maximum(r(x) @ r(w1) + b1, 0.0)
    h = jnp.maximum(r(h) @ r(w2) + b2, 0.0)
    h = jnp.maximum(r(h) @ r(w3) + b3, 0.0)
    ref = h @ w4 + b4

    assert out.shape == (batch, output_size)
    err = float(jnp.max(jnp.abs(out - ref)))
    assert jnp.allclose(out, ref, atol=1e-2, rtol=1e-2), err

    print("KERNEL_OK")
</pallas_src>

<mosaic_0001>
module attributes {stable_mosaic.version = 11 : i64} {
  func.func @mlp_kernel(%arg0: i32, %arg1: memref<1024x64xf32, #tpu.memory_space<vmem>>, %arg2: memref<64x128xbf16, #tpu.memory_space<vmem>>, %arg3: memref<1x128xf32, #tpu.memory_space<vmem>>, %arg4: memref<128x128xbf16, #tpu.memory_space<vmem>>, %arg5: memref<1x128xf32, #tpu.memory_space<vmem>>, %arg6: memref<128x128xbf16, #tpu.memory_space<vmem>>, %arg7: memref<1x128xf32, #tpu.memory_space<vmem>>, %arg8: memref<1x128xf32, #tpu.memory_space<vmem>>, %arg9: memref<1x1xf32, #tpu.memory_space<vmem>>, %arg10: memref<1024x1xf32, #tpu.memory_space<vmem>>) attributes {dimension_semantics = [#tpu.dimension_semantics<parallel>], iteration_bounds = array<i64: 2>, scalar_prefetch = 0 : i64, scratch_operands = 0 : i64, tpu.core_type = #tpu.core_type<tc>, window_params = [{transform_indices = @transform_0, window_bounds = array<i64: 1024, 64>}, {pipeline_mode = #tpu.pipeline_mode<synchronous>, transform_indices = @transform_1, window_bounds = array<i64: 64, 128>}, {pipeline_mode = #tpu.pipeline_mode<synchronous>, transform_indices = @transform_2, window_bounds = array<i64: 1, 128>}, {pipeline_mode = #tpu.pipeline_mode<synchronous>, transform_indices = @transform_3, window_bounds = array<i64: 128, 128>}, {pipeline_mode = #tpu.pipeline_mode<synchronous>, transform_indices = @transform_4, window_bounds = array<i64: 1, 128>}, {pipeline_mode = #tpu.pipeline_mode<synchronous>, transform_indices = @transform_5, window_bounds = array<i64: 128, 128>}, {pipeline_mode = #tpu.pipeline_mode<synchronous>, transform_indices = @transform_6, window_bounds = array<i64: 1, 128>}, {pipeline_mode = #tpu.pipeline_mode<synchronous>, transform_indices = @transform_7, window_bounds = array<i64: 1, 128>}, {pipeline_mode = #tpu.pipeline_mode<synchronous>, transform_indices = @transform_8, window_bounds = array<i64: 1, 1>}, {transform_indices = @transform_9, window_bounds = array<i64: 1024, 1>}]} {
    %c0 = arith.constant 0 : index
    %c0_0 = arith.constant 0 : index
    %0 = vector.load %arg1[%c0, %c0_0] : memref<1024x64xf32, #tpu.memory_space<vmem>>, vector<1024x64xf32>
    %1 = arith.truncf %0 : vector<1024x64xf32> to vector<1024x64xbf16>
    %c0_1 = arith.constant 0 : index
    %c0_2 = arith.constant 0 : index
    %2 = vector.load %arg2[%c0_1, %c0_2] : memref<64x128xbf16, #tpu.memory_space<vmem>>, vector<64x128xbf16>
    %cst = arith.constant dense<0.000000e+00> : vector<1024x128xf32>
    %3 = tpu.matmul %1, %2, %cst {dimension_numbers = #tpu.dot_dimension_numbers<[1], [0], [0], [1], [0, 0, 1, 1], [], []>} : vector<1024x64xbf16>, vector<64x128xbf16>, vector<1024x128xf32> -> vector<1024x128xf32>
    %c0_3 = arith.constant 0 : index
    %c0_4 = arith.constant 0 : index
    %4 = vector.load %arg3[%c0_3, %c0_4] : memref<1x128xf32, #tpu.memory_space<vmem>>, vector<1x128xf32>
    %5 = vector.broadcast %4 : vector<1x128xf32> to vector<1024x128xf32>
    %6 = arith.addf %3, %5 : vector<1024x128xf32>
    %cst_5 = arith.constant 0.000000e+00 : f32
    %7 = vector.broadcast %cst_5 : f32 to vector<1024x128xf32>
    %8 = arith.maximumf %6, %7 : vector<1024x128xf32>
    %9 = arith.truncf %8 : vector<1024x128xf32> to vector<1024x128xbf16>
    %c0_6 = arith.constant 0 : index
    %c0_7 = arith.constant 0 : index
    %10 = vector.load %arg4[%c0_6, %c0_7] : memref<128x128xbf16, #tpu.memory_space<vmem>>, vector<128x128xbf16>
    %cst_8 = arith.constant dense<0.000000e+00> : vector<1024x128xf32>
    %11 = tpu.matmul %9, %10, %cst_8 {dimension_numbers = #tpu.dot_dimension_numbers<[1], [0], [0], [1], [0, 0, 1, 1], [], []>} : vector<1024x128xbf16>, vector<128x128xbf16>, vector<1024x128xf32> -> vector<1024x128xf32>
    %c0_9 = arith.constant 0 : index
    %c0_10 = arith.constant 0 : index
    %12 = vector.load %arg5[%c0_9, %c0_10] : memref<1x128xf32, #tpu.memory_space<vmem>>, vector<1x128xf32>
    %13 = vector.broadcast %12 : vector<1x128xf32> to vector<1024x128xf32>
    %14 = arith.addf %11, %13 : vector<1024x128xf32>
    %cst_11 = arith.constant 0.000000e+00 : f32
    %15 = vector.broadcast %cst_11 : f32 to vector<1024x128xf32>
    %16 = arith.maximumf %14, %15 : vector<1024x128xf32>
    %17 = arith.truncf %16 : vector<1024x128xf32> to vector<1024x128xbf16>
    %c0_12 = arith.constant 0 : index
    %c0_13 = arith.constant 0 : index
    %18 = vector.load %arg6[%c0_12, %c0_13] : memref<128x128xbf16, #tpu.memory_space<vmem>>, vector<128x128xbf16>
    %cst_14 = arith.constant dense<0.000000e+00> : vector<1024x128xf32>
    %19 = tpu.matmul %17, %18, %cst_14 {dimension_numbers = #tpu.dot_dimension_numbers<[1], [0], [0], [1], [0, 0, 1, 1], [], []>} : vector<1024x128xbf16>, vector<128x128xbf16>, vector<1024x128xf32> -> vector<1024x128xf32>
    %c0_15 = arith.constant 0 : index
    %c0_16 = arith.constant 0 : index
    %20 = vector.load %arg7[%c0_15, %c0_16] : memref<1x128xf32, #tpu.memory_space<vmem>>, vector<1x128xf32>
    %21 = vector.broadcast %20 : vector<1x128xf32> to vector<1024x128xf32>
    %22 = arith.addf %19, %21 : vector<1024x128xf32>
    %cst_17 = arith.constant 0.000000e+00 : f32
    %23 = vector.broadcast %cst_17 : f32 to vector<1024x128xf32>
    %24 = arith.maximumf %22, %23 : vector<1024x128xf32>
    %c0_18 = arith.constant 0 : index
    %c0_19 = arith.constant 0 : index
    %25 = vector.load %arg8[%c0_18, %c0_19] : memref<1x128xf32, #tpu.memory_space<vmem>>, vector<1x128xf32>
    %26 = vector.broadcast %25 : vector<1x128xf32> to vector<1024x128xf32>
    %27 = arith.mulf %24, %26 : vector<1024x128xf32>
    %cst_20 = arith.constant dense<0.000000e+00> : vector<1024xf32>
    %28 = vector.multi_reduction <add>, %27, %cst_20 [1] : vector<1024x128xf32> to vector<1024xf32>
    %29 = vector.shape_cast %28 : vector<1024xf32> to vector<1024x1xf32>
    %c0_21 = arith.constant 0 : index
    %c0_22 = arith.constant 0 : index
    %30 = vector.load %arg9[%c0_21, %c0_22] : memref<1x1xf32, #tpu.memory_space<vmem>>, vector<1x1xf32>
    %31 = vector.broadcast %30 : vector<1x1xf32> to vector<1024x1xf32>
    %32 = arith.addf %29, %31 : vector<1024x1xf32>
    %c0_23 = arith.constant 0 : index
    %c0_24 = arith.constant 0 : index
    %33 = vector.load %arg10[%c0_23, %c0_24] : memref<1024x1xf32, #tpu.memory_space<vmem>>, vector<1024x1xf32>
    tpu.vector_store %arg10[%c0_23, %c0_24], %32 {strides = array<i32>} : memref<1024x1xf32, #tpu.memory_space<vmem>>, vector<1024x1xf32>,
    return
  }
  func.func @transform_0(%arg0: i32) -> (i32, i32) {
    %c0_i32 = arith.constant 0 : i32
    %c0_i32_0 = arith.constant 0 : i32
    return %arg0, %c0_i32 : i32, i32
  }
  func.func @transform_1(%arg0: i32) -> (i32, i32) {
    %c0_i32 = arith.constant 0 : i32
    %c0_i32_0 = arith.constant 0 : i32
    %c0_i32_1 = arith.constant 0 : i32
    return %c0_i32, %c0_i32_0 : i32, i32
  }
  func.func @transform_2(%arg0: i32) -> (i32, i32) {
    %c0_i32 = arith.constant 0 : i32
    %c0_i32_0 = arith.constant 0 : i32
    %c0_i32_1 = arith.constant 0 : i32
    return %c0_i32, %c0_i32_0 : i32, i32
  }
  func.func @transform_3(%arg0: i32) -> (i32, i32) {
    %c0_i32 = arith.constant 0 : i32
    %c0_i32_0 = arith.constant 0 : i32
    %c0_i32_1 = arith.constant 0 : i32
    return %c0_i32, %c0_i32_0 : i32, i32
  }
  func.func @transform_4(%arg0: i32) -> (i32, i32) {
    %c0_i32 = arith.constant 0 : i32
    %c0_i32_0 = arith.constant 0 : i32
    %c0_i32_1 = arith.constant 0 : i32
    return %c0_i32, %c0_i32_0 : i32, i32
  }
  func.func @transform_5(%arg0: i32) -> (i32, i32) {
    %c0_i32 = arith.constant 0 : i32
    %c0_i32_0 = arith.constant 0 : i32
    %c0_i32_1 = arith.constant 0 : i32
    return %c0_i32, %c0_i32_0 : i32, i32
  }
  func.func @transform_6(%arg0: i32) -> (i32, i32) {
    %c0_i32 = arith.constant 0 : i32
    %c0_i32_0 = arith.constant 0 : i32
    %c0_i32_1 = arith.constant 0 : i32
    return %c0_i32, %c0_i32_0 : i32, i32
  }
  func.func @transform_7(%arg0: i32) -> (i32, i32) {
    %c0_i32 = arith.constant 0 : i32
    %c0_i32_0 = arith.constant 0 : i32
    %c0_i32_1 = arith.constant 0 : i32
    return %c0_i32, %c0_i32_0 : i32, i32
  }
  func.func @transform_8(%arg0: i32) -> (i32, i32) {
    %c0_i32 = arith.constant 0 : i32
    %c0_i32_0 = arith.constant 0 : i32
    %c0_i32_1 = arith.constant 0 : i32
    return %c0_i32, %c0_i32_0 : i32, i32
  }
  func.func @transform_9(%arg0: i32) -> (i32, i32) {
    %c0_i32 = arith.constant 0 : i32
    %c0_i32_0 = arith.constant 0 : i32
    return %arg0, %c0_i32 : i32, i32
  }
}

</mosaic_0001>

<bundles_post_ra>
// kernel: tpu_custom_call.1
= control target key start
LH: loop header
LB: loop body
LE: loop exit
PB: predicated region body
PF: predicated region fallthrough
CT: control target
= control target key end

     0   :  { %s4600_s11 = smov 0   ;;  %s5911_s0 = inlined_call_operand.vmem [shape: f32[2048,64], index: 0, kind: input, shape index: {}]   ;;  %s5912_s1 = inlined_call_operand.vmem [shape: bf16[64,128], index: 1, kind: input, shape index: {}]   ;;  %s5913_s2 = inlined_call_operand.vmem [shape: f32[1,128], index: 2, kind: input, shape index: {}]   ;;  %s5914_s3 = inlined_call_operand.vmem [shape: bf16[128,128], index: 3, kind: input, shape index: {}]   ;;  %s5915_s4 = inlined_call_operand.vmem [shape: f32[1,128], index: 4, kind: input, shape index: {}]   ;;  %s5916_s5 = inlined_call_operand.vmem [shape: bf16[128,128], index: 5, kind: input, shape index: {}]   ;;  %s5917_s6 = inlined_call_operand.vmem [shape: f32[1,128], index: 6, kind: input, shape index: {}]   ;;  %s5918_s7 = inlined_call_operand.vmem [shape: f32[1,128], index: 7, kind: input, shape index: {}]   ;;  %s5919_s8 = inlined_call_operand.<no memory space> [shape: f32[1,1], index: 8, kind: input, shape index: {}]   ;;  %s5920_s9 = inlined_call_operand.vmem [shape: f32[2048,1], index: 9, kind: output, shape index: {}]  }
   0x1   :  { %v14_v0 = vstv %s5919_s8 }
   0x2   :  { %15 = vst [vmem:[#allocation2] sm:$0x1] %v14_v0 }
   0x3 LB: > { %s3763_s12 = sadd.s32 4294967295, %s4545_s11   ;;  %p3767_p0 = scmp.ge.s32.totalorder %s4545_s11, 1  ;;  %s4545_s11 = sphi %s4600_s11, %s21_s11  }
   0x4   : > { %p290_p1 = scmp.lt.s32.totalorder %s4545_s11, 3 }
   0x6   : > { %p291_p2 = pnand %p3767_p0, %p290_p1 }
   0x7   : > { %v4515_v1 = vld [vmem:[%s5912_s1] sm:$0xff] (!%p291_p2)   ;;  %s3768_s8 = sshll.u32 (!%p291_p2), %s3763_s12, 7  ;;  %v4516_v2 = vld [vmem:[%s5912_s1 + $0x8] sm:$0xff] (!%p291_p2)   ;;  %v4517_v3 = vld [vmem:[%s5912_s1 + $0x10] sm:$0xff] (!%p291_p2)   ;;  %vm570_vm0 = vcmask (!%p291_p2), 523264   ;;  %vm3578_vm1 = vcmask (!%p291_p2), 7168  }
   0x8   : > { %294 = sbr.rel (%p291_p2) target bundleno = 1086 (0x43e), region = 56  ;;  %p327_p3 = scmp.lt.s32.totalorder (!%p291_p2), %s3768_s8, 255  ;;  %4075 = vmatprep.subr.bf16.mxu0 (!%p291_p2), %v4515_v1  ;;  %4499 = vmatprep.subr.bf16.mxu1 (!%p291_p2), %v4515_v1  ;;  %v4518_v6 = vld [vmem:[%s5912_s1 + $0x18] sm:$0xff] (!%p291_p2)   ;;  %v4519_v12 = vld [vmem:[%s5914_s3] sm:$0xff] (!%p291_p2)   ;;  %v4520_v28 = vld [vmem:[%s5914_s3 + $0x8] sm:$0xff] (!%p291_p2)  }
   0x9   : > { %4076 = vmatpush3.bf16.msra.mxu0 (!%p291_p2), %v4515_v1  ;;  %4503 = vmatpush3.bf16.msra.mxu1 (!%p291_p2), %v4515_v1  ;;  %v4521_v46 = vld [vmem:[%s5914_s3 + $0x10] sm:$0xff] (!%p291_p2)   ;;  %v4522_v53 = vld [vmem:[%s5914_s3 + $0x18] sm:$0xff] (!%p291_p2)   ;;  %v4523_v59 = vld [vmem:[%s5914_s3 + $0x20] sm:$0xff] (!%p291_p2)  }
   0xa   : > { %4077 = vmatprep.subr.bf16.mxu0 (!%p291_p2), %v4516_v2  ;;  %4500 = vmatprep.subr.bf16.mxu1 (!%p291_p2), %v4516_v2 }
   0xd   : > { %4078 = vmatpush3.bf16.msra.mxu0 (!%p291_p2), %v4516_v2  ;;  %4504 = vmatpush3.bf16.msra.mxu1 (!%p291_p2), %v4516_v2  ;;  %v4524_v2 = vld [vmem:[%s5914_s3 + $0x28] sm:$0xff] (!%p291_p2)  }
   0xe   : > { %4079 = vmatprep.subr.bf16.mxu0 (!%p291_p2), %v4517_v3  ;;  %4501 = vmatprep.subr.bf16.mxu1 (!%p291_p2), %v4517_v3 }
   0xf   : > { %s5922_s8 = smov (!%p327_p3, %s3768_s8), 255 }
  0x10   : > { %s3769_s19 = sshll.u32 %s5922_s8, 3 }
  0x11   : > { %s4625_s22 = scalar_lea.vmem %s5911_s0, %s3769_s19  ;;  %4080 = vmatpush3.bf16.msra.mxu0 %v4517_v3  ;;  %4505 = vmatpush3.bf16.msra.mxu1 %v4517_v3  ;;  %s5401_s10 = scalar_lea.vmem %s5920_s9, %s3769_s19 }
  0x12   : > { %v339_v4 = vld [vmem:[%s4625_s22] sm:$0xff]  ;;  %v340_v5 = vld [vmem:[%s4625_s22 + $0x8] sm:$0xff]  ;;  %v341_v8 = vld [vmem:[%s4625_s22 + $0x10] sm:$0xff]  ;;  %4081 = vmatprep.subr.bf16.mxu0 %v4518_v6  ;;  %4502 = vmatprep.subr.bf16.mxu1 %v4518_v6 }
  0x13   : > { %v467_v7 = vpack.c.bf16 %v340_v5, %v339_v4  ;;  %v342_v9 = vld [vmem:[%s4625_s22 + $0x18] sm:$0xff]  ;;  %v343_v10 = vld [vmem:[%s4625_s22 + $0x20] sm:$0xff]  ;;  %v344_v11 = vld [vmem:[%s4625_s22 + $0x28] sm:$0xff] }
  0x14   : > { %v468_v13 = vpack.c.bf16 %v342_v9, %v341_v8  ;;  %v469_v14 = vpack.c.bf16 %v344_v11, %v343_v10  ;;  %v345_v15 = vld [vmem:[%s4625_s22 + $0x30] sm:$0xff]  ;;  %v346_v16 = vld [vmem:[%s4625_s22 + $0x38] sm:$0xff]  ;;  %v347_v17 = vld [vmem:[%s4625_s22 + $0x40] sm:$0xff] }
  0x15   : > { %4083 = vmatprep.mubr.msk.bf16.mxu0 %vm570_vm0, %v467_v7  ;;  %4082 = vmatpush3.bf16.msra.mxu0 %v4518_v6  ;;  %v348_v18 = vld [vmem:[%s4625_s22 + $0x48] sm:$0xff]  ;;  %v470_v19 = vpack.c.bf16 %v346_v16, %v345_v15  ;;  %v403_v21 = vld [vmem:[%s4625_s22 + $0x200] sm:$0xff]  ;;  %v405_v23 = vld [vmem:[%s4625_s22 + $0x210] sm:$0xff] }
  0x16   : > { %4506 = vmatpush3.bf16.msra.mxu1 %v4518_v6  ;;  %v471_v20 = vpack.c.bf16 %v348_v18, %v347_v17  ;;  %v404_v22 = vld [vmem:[%s4625_s22 + $0x208] sm:$0xff]  ;;  %v406_v25 = vld [vmem:[%s4625_s22 + $0x218] sm:$0xff]  ;;  %v407_v27 = vld [vmem:[%s4625_s22 + $0x220] sm:$0xff] }
  0x17   : > { %4211 = vmatprep.subr.bf16.mxu1 %v4519_v12  ;;  %v499_v24 = vpack.c.bf16 %v404_v22, %v403_v21  ;;  %v500_v26 = vpack.c.bf16 %v406_v25, %v405_v23  ;;  %v408_v29 = vld [vmem:[%s4625_s22 + $0x228] sm:$0xff]  ;;  %v349_v30 = vld [vmem:[%s4625_s22 + $0x50] sm:$0xff]  ;;  %v350_v31 = vld [vmem:[%s4625_s22 + $0x58] sm:$0xff] }
  0x18   : > { %4084 = vmatmul.mubr.msk.bf16.vlgmr.msra.gmra.mrb[0].mxu0 %vm570_vm0, %v468_v13  ;;  %v351_v32 = vld [vmem:[%s4625_s22 + $0x60] sm:$0xff]  ;;  %v501_v33 = vpack.c.bf16 %v408_v29, %v407_v27  ;;  %v352_v34 = vld [vmem:[%s4625_s22 + $0x68] sm:$0xff]  ;;  %v409_v35 = vld [vmem:[%s4625_s22 + $0x230] sm:$0xff]  ;;  %v472_v39 = vpack.c.bf16 %v350_v31, %v349_v30 }
  0x19   : > { %4087 = vmatprep.mubr.msk.bf16.mxu0 %vm570_vm0, %v469_v14  ;;  %4147 = vmatprep.mubr.msk.bf16.mxu1 %vm570_vm0, %v499_v24  ;;  %v410_v36 = vld [vmem:[%s4625_s22 + $0x238] sm:$0xff]  ;;  %v411_v37 = vld [vmem:[%s4625_s22 + $0x240] sm:$0xff]  ;;  %v412_v38 = vld [vmem:[%s4625_s22 + $0x248] sm:$0xff]  ;;  %v473_v40 = vpack.c.bf16 %v352_v34, %v351_v32 }
  0x1a   : > { %4148 = vmatmul.mubr.msk.bf16.vlgmr.msra.gmra.mrb[0].mxu1 %vm570_vm0, %v500_v26  ;;  %v502_v41 = vpack.c.bf16 %v410_v36, %v409_v35  ;;  %v503_v42 = vpack.c.bf16 %v412_v38, %v411_v37  ;;  %v353_v43 = vld [vmem:[%s4625_s22 + $0x70] sm:$0xff]  ;;  %v354_v44 = vld [vmem:[%s4625_s22 + $0x78] sm:$0xff]  ;;  %v355_v45 = vld [vmem:[%s4625_s22 + $0x80] sm:$0xff] }
  0x1b   : > { %4212 = vmatpush3.bf16.msra.mxu1 %v4519_v12  ;;  %4151 = vmatprep.mubr.msk.bf16.mxu1 %vm570_vm0, %v501_v33  ;;  %v356_v47 = vld [vmem:[%s4625_s22 + $0x88] sm:$0xff]  ;;  %v413_v48 = vld [vmem:[%s4625_s22 + $0x250] sm:$0xff]  ;;  %v414_v49 = vld [vmem:[%s4625_s22 + $0x258] sm:$0xff]  ;;  %v474_v52 = vpack.c.bf16 %v354_v44, %v353_v43 }
  0x1c   : > { %4213 = vmatprep.subr.bf16.mxu1 %v4520_v28  ;;  %v415_v50 = vld [vmem:[%s4625_s22 + $0x260] sm:$0xff]  ;;  %v416_v51 = vld [vmem:[%s4625_s22 + $0x268] sm:$0xff]  ;;  %v475_v54 = vpack.c.bf16 %v356_v47, %v355_v45  ;;  %v504_v55 = vpack.c.bf16 %v414_v49, %v413_v48  ;;  %v357_v57 = vld [vmem:[%s4625_s22 + $0x90] sm:$0xff] }
  0x1d   : > { %v505_v56 = vpack.c.bf16 %v416_v51, %v415_v50  ;;  %v358_v58 = vld [vmem:[%s4625_s22 + $0x98] sm:$0xff]  ;;  %v359_v60 = vld [vmem:[%s4625_s22 + $0xa0] sm:$0xff]  ;;  %v360_v61 = vld [vmem:[%s4625_s22 + $0xa8] sm:$0xff] }
  0x1e   : > { %v417_v62 = vld [vmem:[%s4625_s22 + $0x270] sm:$0xff]  ;;  %v418_v63 = vld [vmem:[%s4625_s22 + $0x278] sm:$0xff]  ;;  %v419_v0 = vld [vmem:[%s4625_s22 + $0x280] sm:$0xff]  ;;  %v476_v3 = vpack.c.bf16 %v358_v58, %v357_v57  ;;  %v477_v4 = vpack.c.bf16 %v360_v61, %v359_v60 }
  0x1f   : > { %4214 = vmatpush3.bf16.msra.mxu1 %v4520_v28  ;;  %v420_v1 = vld [vmem:[%s4625_s22 + $0x288] sm:$0xff]  ;;  %v506_v5 = vpack.c.bf16 %v418_v63, %v417_v62  ;;  %v4525_v7 = vld [vmem:[%s5914_s3 + $0x30] sm:$0xff]   ;;  %v362_v9 = vld [vmem:[%s4625_s22 + $0xb8] sm:$0xff] }
  0x20   : > { %4088 = vmatmul.mubr.msk.bf16.gmra.mrb[4].mxu0 %vm570_vm0, %v470_v19  ;;  %4215 = vmatprep.subr.bf16.mxu1 %v4521_v46  ;;  %v507_v6 = vpack.c.bf16 %v420_v1, %v419_v0  ;;  %v361_v8 = vld [vmem:[%s4625_s22 + $0xb0] sm:$0xff]  ;;  %v363_v10 = vld [vmem:[%s4625_s22 + $0xc0] sm:$0xff]  ;;  %v364_v11 = vld [vmem:[%s4625_s22 + $0xc8] sm:$0xff] }
  0x21   : > { %4091 = vmatprep.mubr.msk.bf16.mxu0 %vm570_vm0, %v471_v20  ;;  %v421_v12 = vld [vmem:[%s4625_s22 + $0x290] sm:$0xff]  ;;  %v422_v13 = vld [vmem:[%s4625_s22 + $0x298] sm:$0xff]  ;;  %v423_v14 = vld [vmem:[%s4625_s22 + $0x2a0] sm:$0xff]  ;;  %v478_v17 = vpack.c.bf16 %v362_v9, %v361_v8  ;;  %v479_v18 = vpack.c.bf16 %v364_v11, %v363_v10 }
  0x22   : > { %4152 = vmatmul.mubr.msk.bf16.gmra.mrb[4].mxu1 %vm570_vm0, %v502_v41  ;;  %v424_v15 = vld [vmem:[%s4625_s22 + $0x2a8] sm:$0xff]  ;;  %v4526_v16 = vld [vmem:[%s5914_s3 + $0x38] sm:$0xff]   ;;  %v508_v19 = vpack.c.bf16 %v422_v13, %v421_v12  ;;  %v365_v21 = vld [vmem:[%s4625_s22 + $0xd0] sm:$0xff] }
  0x23   : > { %4155 = vmatprep.mubr.msk.bf16.mxu1 %vm570_vm0, %v503_v42  ;;  %4216 = vmatpush3.bf16.msra.mxu1 %v4521_v46  ;;  %v509_v20 = vpack.c.bf16 %v424_v15, %v423_v14  ;;  %v366_v22 = vld [vmem:[%s4625_s22 + $0xd8] sm:$0xff]  ;;  %v367_v23 = vld [vmem:[%s4625_s22 + $0xe0] sm:$0xff]  ;;  %v368_v24 = vld [vmem:[%s4625_s22 + $0xe8] sm:$0xff] }
  0x24   : > { %4217 = vmatprep.subr.bf16.mxu1 %v4522_v53  ;;  %v425_v25 = vld [vmem:[%s4625_s22 + $0x2b0] sm:$0xff]  ;;  %v426_v26 = vld [vmem:[%s4625_s22 + $0x2b8] sm:$0xff]  ;;  %v427_v27 = vld [vmem:[%s4625_s22 + $0x2c0] sm:$0xff]  ;;  %v480_v29 = vpack.c.bf16 %v366_v22, %v365_v21  ;;  %v481_v30 = vpack.c.bf16 %v368_v24, %v367_v23 }
  0x25   : > { %v428_v28 = vld [vmem:[%s4625_s22 + $0x2c8] sm:$0xff]  ;;  %v510_v31 = vpack.c.bf16 %v426_v26, %v425_v25  ;;  %v369_v33 = vld [vmem:[%s4625_s22 + $0xf0] sm:$0xff]  ;;  %v370_v34 = vld [vmem:[%s4625_s22 + $0xf8] sm:$0xff] }
  0x26   : > { %v511_v32 = vpack.c.bf16 %v428_v28, %v427_v27  ;;  %v371_v35 = vld [vmem:[%s4625_s22 + $0x100] sm:$0xff]  ;;  %v372_v36 = vld [vmem:[%s4625_s22 + $0x108] sm:$0xff]  ;;  %v429_v37 = vld [vmem:[%s4625_s22 + $0x2d0] sm:$0xff]  ;;  %v482_v41 = vpack.c.bf16 %v370_v34, %v369_v33 }
  0x27   : > { %4218 = vmatpush3.bf16.msra.mxu1 %v4522_v53  ;;  %v430_v38 = vld [vmem:[%s4625_s22 + $0x2d8] sm:$0xff]  ;;  %v483_v42 = vpack.c.bf16 %v372_v36, %v371_v35  ;;  %v373_v45 = vld [vmem:[%s4625_s22 + $0x110] sm:$0xff]  ;;  %v375_v47 = vld [vmem:[%s4625_s22 + $0x120] sm:$0xff] }
  0x28   : > { %4092 = vmatmul.mubr.msk.bf16.gmra.mrb[8].mxu0 %vm570_vm0, %v472_v39  ;;  %4219 = vmatprep.subr.bf16.mxu1 %v4523_v59  ;;  %v431_v39 = vld [vmem:[%s4625_s22 + $0x2e0] sm:$0xff]  ;;  %v512_v43 = vpack.c.bf16 %v430_v38, %v429_v37  ;;  %v374_v46 = vld [vmem:[%s4625_s22 + $0x118] sm:$0xff]  ;;  %v376_v48 = vld [vmem:[%s4625_s22 + $0x128] sm:$0xff] }
  0x29   : > { %4095 = vmatprep.mubr.msk.bf16.mxu0 %vm570_vm0, %v473_v40  ;;  %v432_v40 = vld [vmem:[%s4625_s22 + $0x2e8] sm:$0xff]  ;;  %v433_v49 = vld [vmem:[%s4625_s22 + $0x2f0] sm:$0xff]  ;;  %v434_v50 = vld [vmem:[%s4625_s22 + $0x2f8] sm:$0xff]  ;;  %v484_v53 = vpack.c.bf16 %v374_v46, %v373_v45 }
  0x2a   : > { %4156 = vmatmul.mubr.msk.bf16.gmra.mrb[8].mxu1 %vm570_vm0, %v504_v55  ;;  %v513_v44 = vpack.c.bf16 %v432_v40, %v431_v39  ;;  %v435_v51 = vld [vmem:[%s4625_s22 + $0x300] sm:$0xff]  ;;  %v514_v55 = vpack.c.bf16 %v434_v50, %v433_v49  ;;  %v377_v57 = vld [vmem:[%s4625_s22 + $0x130] sm:$0xff]  ;;  %v378_v58 = vld [vmem:[%s4625_s22 + $0x138] sm:$0xff] }
  0x2b   : > { %4159 = vmatprep.mubr.msk.bf16.mxu1 %vm570_vm0, %v505_v56  ;;  %4220 = vmatpush3.bf16.msra.mxu1 %v4523_v59  ;;  %v379_v59 = vld [vmem:[%s4625_s22 + $0x140] sm:$0xff]  ;;  %v380_v60 = vld [vmem:[%s4625_s22 + $0x148] sm:$0xff]  ;;  %v437_v61 = vld [vmem:[%s4625_s22 + $0x310] sm:$0xff]  ;;  %v486_v1 = vpack.c.bf16 %v378_v58, %v377_v57 }
  0x2c   : > { %4221 = vmatprep.subr.bf16.mxu1 %v4524_v2  ;;  %v438_v62 = vld [vmem:[%s4625_s22 + $0x318] sm:$0xff]  ;;  %v439_v63 = vld [vmem:[%s4625_s22 + $0x320] sm:$0xff]  ;;  %v440_v0 = vld [vmem:[%s4625_s22 + $0x328] sm:$0xff] }
  0x2d   : > { %v384_v8 = vld [vmem:[%s4625_s22 + $0x168] sm:$0xff]  ;;  %v441_v9 = vld [vmem:[%s4625_s22 + $0x330] sm:$0xff]  ;;  %v442_v10 = vld [vmem:[%s4625_s22 + $0x338] sm:$0xff] }
  0x2e   : > { %v443_v11 = vld [vmem:[%s4625_s22 + $0x340] sm:$0xff]  ;;  %v444_v12 = vld [vmem:[%s4625_s22 + $0x348] sm:$0xff]  ;;  %v518_v15 = vpack.c.bf16 %v442_v10, %v441_v9  ;;  %v445_v21 = vld [vmem:[%s4625_s22 + $0x350] sm:$0xff] }
  0x2f   : > { %4222 = vmatpush3.bf16.msra.mxu1 %v4524_v2  ;;  %v487_v2 = vpack.c.bf16 %v380_v60, %v379_v59  ;;  %v446_v22 = vld [vmem:[%s4625_s22 + $0x358] sm:$0xff]  ;;  %v447_v23 = vld [vmem:[%s4625_s22 + $0x360] sm:$0xff]  ;;  %v448_v24 = vld [vmem:[%s4625_s22 + $0x368] sm:$0xff] }
  0x30   : > { %4096 = vmatmul.mubr.msk.bf16.gmra.mrb[12].mxu0 %vm570_vm0, %v474_v52  ;;  %4223 = vmatprep.subr.bf16.mxu1 %v4525_v7  ;;  %v436_v52 = vld [vmem:[%s4625_s22 + $0x308] sm:$0xff]  ;;  %v520_v27 = vpack.c.bf16 %v446_v22, %v445_v21  ;;  %v521_v28 = vpack.c.bf16 %v448_v24, %v447_v23  ;;  %v449_v33 = vld [vmem:[%s4625_s22 + $0x370] sm:$0xff]  ;;  %v450_v34 = vld [vmem:[%s4625_s22 + $0x378] sm:$0xff] }
  0x31   : > { %4099 = vmatprep.mubr.msk.bf16.mxu0 %vm570_vm0, %v475_v54  ;;  %v485_v54 = vpack.c.bf16 %v376_v48, %v375_v47  ;;  %v515_v56 = vpack.c.bf16 %v436_v52, %v435_v51  ;;  %v451_v35 = vld [vmem:[%s4625_s22 + $0x380] sm:$0xff]  ;;  %v452_v36 = vld [vmem:[%s4625_s22 + $0x388] sm:$0xff]  ;;  %v522_v39 = vpack.c.bf16 %v450_v34, %v449_v33  ;;  %v453_v45 = vld [vmem:[%s4625_s22 + $0x390] sm:$0xff] }
  0x32   : > { %4160 = vmatmul.mubr.msk.bf16.gmra.mrb[12].mxu1 %vm570_vm0, %v506_v5  ;;  %v381_v5 = vld [vmem:[%s4625_s22 + $0x150] sm:$0xff]  ;;  %v523_v40 = vpack.c.bf16 %v452_v36, %v451_v35  ;;  %v454_v46 = vld [vmem:[%s4625_s22 + $0x398] sm:$0xff]  ;;  %v455_v47 = vld [vmem:[%s4625_s22 + $0x3a0] sm:$0xff] }
  0x33   : > { %4163 = vmatprep.mubr.msk.bf16.mxu1 %vm570_vm0, %v507_v6  ;;  %4224 = vmatpush3.bf16.msra.mxu1 %v4525_v7  ;;  %v382_v6 = vld [vmem:[%s4625_s22 + $0x158] sm:$0xff]  ;;  %v383_v7 = vld [vmem:[%s4625_s22 + $0x160] sm:$0xff]  ;;  %v456_v48 = vld [vmem:[%s4625_s22 + $0x3a8] sm:$0xff]  ;;  %v524_v51 = vpack.c.bf16 %v454_v46, %v453_v45 }
  0x34   : > { %4225 = vmatprep.subr.bf16.mxu1 %v4526_v16  ;;  %v488_v13 = vpack.c.bf16 %v382_v6, %v381_v5  ;;  %v489_v14 = vpack.c.bf16 %v384_v8, %v383_v7  ;;  %v525_v52 = vpack.c.bf16 %v456_v48, %v455_v47  ;;  %v457_v57 = vld [vmem:[%s4625_s22 + $0x3b0] sm:$0xff]  ;;  %v458_v58 = vld [vmem:[%s4625_s22 + $0x3b8] sm:$0xff]  ;;  %v459_v59 = vld [vmem:[%s4625_s22 + $0x3c0] sm:$0xff] }
  0x35   : > { %v460_v60 = vld [vmem:[%s4625_s22 + $0x3c8] sm:$0xff]  ;;  %v463_v5 = vld [vmem:[%s4625_s22 + $0x3e0] sm:$0xff]  ;;  %v465_v10 = vld [vmem:[%s4625_s22 + $0x3f0] sm:$0xff] }
  0x36   : > { %v464_v6 = vld [vmem:[%s4625_s22 + $0x3e8] sm:$0xff]  ;;  %v4529_v24 = vld [vmem:[%s5916_s5 + $0x10] sm:$0xff]  }
  0x37   : > { %4226 = vmatpush3.bf16.msra.mxu1 %v4526_v16  ;;  %v519_v16 = vpack.c.bf16 %v444_v12, %v443_v11  ;;  %v529_v9 = vpack.c.bf16 %v464_v6, %v463_v5  ;;  %v466_v11 = vld [vmem:[%s4625_s22 + $0x3f8] sm:$0xff] }
  0x38   : > { %4100 = vmatmul.mubr.msk.bf16.gmra.mrb[16].mxu0 %vm570_vm0, %v476_v3  ;;  %v516_v3 = vpack.c.bf16 %v438_v62, %v437_v61  ;;  %v530_v12 = vpack.c.bf16 %v466_v11, %v465_v10  ;;  %v4530_v11 = vld [vmem:[%s5916_s5 + $0x18] sm:$0xff]  }
  0x39   : > { %4103 = vmatprep.mubr.msk.bf16.mxu0 %vm570_vm0, %v477_v4  ;;  %v517_v4 = vpack.c.bf16 %v440_v0, %v439_v63  ;;  %v526_v63 = vpack.c.bf16 %v458_v58, %v457_v57  ;;  %v527_v0 = vpack.c.bf16 %v460_v60, %v459_v59 }
  0x3a   : > { %4164 = vmatmul.mubr.msk.bf16.gmra.mrb[16].mxu1 %vm570_vm0, %v508_v19  ;;  %v387_v19 = vld [vmem:[%s4625_s22 + $0x180] sm:$0xff] }
  0x3b   : > { %4167 = vmatprep.mubr.msk.bf16.mxu1 %vm570_vm0, %v509_v20  ;;  %v388_v20 = vld [vmem:[%s4625_s22 + $0x188] sm:$0xff] }
  0x3c   : > { %v491_v26 = vpack.c.bf16 %v388_v20, %v387_v19 }
  0x40   : > { %4104 = vmatmul.mubr.msk.bf16.gmra.mrb[20].mxu0 %vm570_vm0, %v478_v17  ;;  %v385_v17 = vld [vmem:[%s4625_s22 + $0x170] sm:$0xff] }
  0x41   : > { %4107 = vmatprep.mubr.msk.bf16.mxu0 %vm570_vm0, %v479_v18  ;;  %v386_v18 = vld [vmem:[%s4625_s22 + $0x178] sm:$0xff] }
  0x42   : > { %4168 = vmatmul.mubr.msk.bf16.gmra.mrb[20].mxu1 %vm570_vm0, %v510_v31  ;;  %v490_v25 = vpack.c.bf16 %v386_v18, %v385_v17  ;;  %v391_v31 = vld [vmem:[%s4625_s22 + $0x1a0] sm:$0xff] }
  0x43   : > { %4171 = vmatprep.mubr.msk.bf16.mxu1 %vm570_vm0, %v511_v32  ;;  %v392_v32 = vld [vmem:[%s4625_s22 + $0x1a8] sm:$0xff] }
  0x44   : > { %v493_v38 = vpack.c.bf16 %v392_v32, %v391_v31 }
  0x48   : > { %4108 = vmatmul.mubr.msk.bf16.gmra.mrb[24].mxu0 %vm570_vm0, %v480_v29  ;;  %v389_v29 = vld [vmem:[%s4625_s22 + $0x190] sm:$0xff] }
  0x49   : > { %4111 = vmatprep.mubr.msk.bf16.mxu0 %vm570_vm0, %v481_v30  ;;  %v390_v30 = vld [vmem:[%s4625_s22 + $0x198] sm:$0xff] }
  0x4a   : > { %4172 = vmatmul.mubr.msk.bf16.gmra.mrb[24].mxu1 %vm570_vm0, %v512_v43  ;;  %v492_v37 = vpack.c.bf16 %v390_v30, %v389_v29  ;;  %v395_v43 = vld [vmem:[%s4625_s22 + $0x1c0] sm:$0xff] }
  0x4b   : > { %4175 = vmatprep.mubr.msk.bf16.mxu1 %vm570_vm0, %v513_v44  ;;  %v396_v44 = vld [vmem:[%s4625_s22 + $0x1c8] sm:$0xff] }
  0x4c   : > { %v495_v50 = vpack.c.bf16 %v396_v44, %v395_v43 }
  0x50   : > { %4112 = vmatmul.mubr.msk.bf16.gmra.mrb[28].mxu0 %vm570_vm0, %v482_v41  ;;  %v393_v41 = vld [vmem:[%s4625_s22 + $0x1b0] sm:$0xff] }
  0x51   : > { %4115 = vmatprep.mubr.msk.bf16.mxu0 %vm570_vm0, %v483_v42  ;;  %v394_v42 = vld [vmem:[%s4625_s22 + $0x1b8] sm:$0xff] }
  0x52   : > { %4176 = vmatmul.mubr.msk.bf16.gmra.mrb[28].mxu1 %vm570_vm0, %v514_v55  ;;  %v494_v49 = vpack.c.bf16 %v394_v42, %v393_v41  ;;  %v399_v55 = vld [vmem:[%s4625_s22 + $0x1e0] sm:$0xff] }
  0x53   : > { %4179 = vmatprep.mubr.msk.bf16.mxu1 %vm570_vm0, %v515_v56  ;;  %v400_v56 = vld [vmem:[%s4625_s22 + $0x1e8] sm:$0xff] }
  0x54   : > { %v497_v62 = vpack.c.bf16 %v400_v56, %v399_v55 }
  0x58   : > { %4116 = vmatmul.mubr.msk.bf16.gmra.mrb[32].mxu0 %vm570_vm0, %v484_v53  ;;  %v397_v53 = vld [vmem:[%s4625_s22 + $0x1d0] sm:$0xff] }
  0x59   : > { %4119 = vmatprep.mubr.msk.bf16.mxu0 %vm570_vm0, %v485_v54  ;;  %v398_v54 = vld [vmem:[%s4625_s22 + $0x1d8] sm:$0xff] }
  0x5a   : > { %4180 = vmatmul.mubr.msk.bf16.gmra.mrb[32].mxu1 %vm570_vm0, %v516_v3  ;;  %v496_v61 = vpack.c.bf16 %v398_v54, %v397_v53  ;;  %v461_v3 = vld [vmem:[%s4625_s22 + $0x3d0] sm:$0xff] }
  0x5b   : > { %4183 = vmatprep.mubr.msk.bf16.mxu1 %vm570_vm0, %v517_v4  ;;  %v462_v4 = vld [vmem:[%s4625_s22 + $0x3d8] sm:$0xff] }
  0x5c   : > { %v528_v8 = vpack.c.bf16 %v462_v4, %v461_v3 }
  0x60   : > { %4120 = vmatmul.mubr.msk.bf16.gmra.mrb[36].mxu0 %vm570_vm0, %v486_v1  ;;  %v401_v1 = vld [vmem:[%s4625_s22 + $0x1f0] sm:$0xff] }
  0x61   : > { %4123 = vmatprep.mubr.msk.bf16.mxu0 %vm570_vm0, %v487_v2  ;;  %v402_v2 = vld [vmem:[%s4625_s22 + $0x1f8] sm:$0xff] }
  0x62   : > { %4184 = vmatmul.mubr.msk.bf16.gmra.mrb[36].mxu1 %vm570_vm0, %v518_v15  ;;  %v498_v7 = vpack.c.bf16 %v402_v2, %v401_v1  ;;  %v4855_v15 = vld [vmem:[%s5913_s2] ss:$0 sm:$0xff] }
  0x63   : > { %4187 = vmatprep.mubr.msk.bf16.mxu1 %vm570_vm0, %v519_v16 }
  0x68   : > { %4124 = vmatmul.mubr.msk.bf16.gmra.mrb[40].mxu0 %vm570_vm0, %v488_v13  ;;  %v4527_v13 = vld [vmem:[%s5916_s5] sm:$0xff]  }
  0x69   : > { %4127 = vmatprep.mubr.msk.bf16.mxu0 %vm570_vm0, %v489_v14  ;;  %4355 = vmatprep.subr.bf16.mxu0 %v4527_v13  ;;  %v4528_v14 = vld [vmem:[%s5916_s5 + $0x8] sm:$0xff]  }
  0x6a   : > { %4188 = vmatmul.mubr.msk.bf16.gmra.mrb[40].mxu1 %vm570_vm0, %v520_v27  ;;  %4356 = vmatpush3.bf16.msra.mxu0 %v4527_v13 }
  0x6b   : > { %4191 = vmatprep.mubr.msk.bf16.mxu1 %vm570_vm0, %v521_v28  ;;  %4357 = vmatprep.subr.bf16.mxu0 %v4528_v14 }
  0x6e   : > { %4358 = vmatpush3.bf16.msra.mxu0 %v4528_v14 }
  0x6f   : > { %4359 = vmatprep.subr.bf16.mxu0 %v4529_v24 }
  0x70   : > { %4128 = vmatmul.mubr.msk.bf16.gmra.mrb[44].mxu0 %vm570_vm0, %v490_v25 }
  0x71   : > { %4131 = vmatprep.mubr.msk.bf16.mxu0 %vm570_vm0, %v491_v26 }
  0x72   : > { %4192 = vmatmul.mubr.msk.bf16.gmra.mrb[44].mxu1 %vm570_vm0, %v522_v39  ;;  %4360 = vmatpush3.bf16.msra.mxu0 %v4529_v24 }
  0x73   : > { %4195 = vmatprep.mubr.msk.bf16.mxu1 %vm570_vm0, %v523_v40  ;;  %4361 = vmatprep.subr.bf16.mxu0 %v4530_v11 }
  0x76   : > { %4362 = vmatpush3.bf16.msra.mxu0 %v4530_v11 }
  0x78   : > { %4132 = vmatmul.mubr.msk.bf16.gmra.mrb[48].mxu0 %vm570_vm0, %v492_v37 }
  0x79   : > { %4135 = vmatprep.mubr.msk.bf16.mxu0 %vm570_vm0, %v493_v38 }
  0x7a   : > { %4196 = vmatmul.mubr.msk.bf16.gmra.mrb[48].mxu1 %vm570_vm0, %v524_v51 }
  0x7b   : > { %4199 = vmatprep.mubr.msk.bf16.mxu1 %vm570_vm0, %v525_v52 }
  0x80   : > { %4136 = vmatmul.mubr.msk.bf16.gmra.mrb[52].mxu0 %vm570_vm0, %v494_v49 }
  0x81   : > { %4139 = vmatprep.mubr.msk.bf16.mxu0 %vm570_vm0, %v495_v50 }
  0x82   : > { %4200 = vmatmul.mubr.msk.bf16.gmra.mrb[52].mxu1 %vm570_vm0, %v526_v63 }
  0x83   : > { %4203 = vmatprep.mubr.msk.bf16.mxu1 %vm570_vm0, %v527_v0 }
  0x88   : > { %4140 = vmatmul.mubr.msk.bf16.gmra.mrb[56].mxu0 %vm570_vm0, %v496_v61 }
  0x89   : > { %4143 = vmatprep.mubr.msk.bf16.mxu0 %vm570_vm0, %v497_v62 }
  0x8a   : > { %4204 = vmatmul.mubr.msk.bf16.gmra.mrb[56].mxu1 %vm570_vm0, %v528_v8 }
  0x8b   : > { %4207 = vmatprep.mubr.msk.bf16.mxu1 %vm570_vm0, %v529_v9 }
  0x90   : > { %4144 = vmatmul.mubr.msk.bf16.gmra.mrb[60].mxu0 %vm570_vm0, %v498_v7 }
  0x92   : > { %4208 = vmatmul.mubr.msk.bf16.gmra.mrb[60].mxu1 %vm570_vm0, %v530_v12 }
  0xeb   : > { %v4085_v16 = vpop.f32.mrb[0].mxu0 }
  0xec   : > { %v806_v17 = vadd.f32 %v4085_v16, %v4855_v15  ;;  %v797_v18 = vpop.f32.mrb[1].mxu0 }
  0xed   : > { %v798_v19 = vadd.f32 %v4855_v15, %v797_v18  ;;  %v4086_v20 = vpop.f32.mrb[2].mxu0  ;;  %v4149_v34 = vpop.f32.mrb[0].mxu1 }
  0xee   : > { %v809_v21 = vadd.f32 %v4086_v20, %v4855_v15  ;;  %v800_v22 = vpop.f32.mrb[3].mxu0  ;;  %v1310_v25 = vmax.f32 %v806_v17, 0.0  ;;  %v1062_v37 = vadd.f32 %v4149_v34, %v4855_v15  ;;  %v1053_v38 = vpop.f32.mrb[1].mxu1 }
  0xef   : > { %v801_v23 = vadd.f32 %v4855_v15, %v800_v22  ;;  %v1308_v27 = vmax.f32 %v798_v19, 0.0  ;;  %v1054_v41 = vadd.f32 %v4855_v15, %v1053_v38  ;;  %v4150_v42 = vpop.f32.mrb[2].mxu1 }
  0xf0   : > { %v1311_v26 = vmax.f32 %v809_v21, 0.0  ;;  %v1374_v44 = vmax.f32 %v1062_v37, 0.0  ;;  %v1065_v45 = vadd.f32 %v4150_v42, %v4855_v15  ;;  %v1056_v46 = vpop.f32.mrb[3].mxu1 }
  0xf1   : > { %v1309_v28 = vmax.f32 %v801_v23, 0.0  ;;  %v1372_v49 = vmax.f32 %v1054_v41, 0.0  ;;  %v1057_v50 = vadd.f32 %v4855_v15, %v1056_v46 }
  0xf2   : > { %v1437_v29 = vpack.c.bf16 %v1311_v26, %v1310_v25  ;;  %v1375_v53 = vmax.f32 %v1065_v45, 0.0 }
  0xf3   : > { %v1436_v30 = vpack.c.bf16 %v1309_v28, %v1308_v27  ;;  %v4089_v31 = vpop.f32.mrb[4].mxu0  ;;  %v1373_v55 = vmax.f32 %v1057_v50, 0.0 }
  0xf4   : > { %v822_v32 = vadd.f32 %v4089_v31, %v4855_v15  ;;  %v813_v33 = vpop.f32.mrb[5].mxu0  ;;  %v4872_v58 = vpack.c.bf16 %v1375_v53, %v1374_v44 }
  0xf5   : > { %v814_v35 = vadd.f32 %v4855_v15, %v813_v33  ;;  %v4090_v36 = vpop.f32.mrb[6].mxu0  ;;  %4227 = vmatprep.mubr.bf16.mxu1 %v1436_v30  ;;  %v4875_v61 = vpack.c.bf16 %v1373_v55, %v1372_v49  ;;  %v4153_v62 = vpop.f32.mrb[4].mxu1 }
  0xf6   : > { %v825_v39 = vadd.f32 %v4090_v36, %v4855_v15  ;;  %v816_v40 = vpop.f32.mrb[7].mxu0  ;;  %4228 = vmatmul.mubr.bf16.vlgmr.msra.gmra.mrb[64].mxu1 %v1437_v29  ;;  %v1314_v47 = vmax.f32 %v822_v32, 0.0  ;;  %v1078_v1 = vadd.f32 %v4153_v62, %v4855_v15  ;;  %v1069_v2 = vpop.f32.mrb[5].mxu1 }
  0xf7   : > { %v817_v43 = vadd.f32 %v4855_v15, %v816_v40  ;;  %v1312_v51 = vmax.f32 %v814_v35, 0.0  ;;  %v1070_v5 = vadd.f32 %v4855_v15, %v1069_v2  ;;  %v4154_v6 = vpop.f32.mrb[6].mxu1 }
  0xf8   : > { %v1315_v48 = vmax.f32 %v825_v39, 0.0  ;;  %v1378_v8 = vmax.f32 %v1078_v1, 0.0  ;;  %v1081_v9 = vadd.f32 %v4154_v6, %v4855_v15  ;;  %v1072_v10 = vpop.f32.mrb[7].mxu1 }
  0xf9   : > { %v1313_v52 = vmax.f32 %v817_v43, 0.0  ;;  %v1376_v14 = vmax.f32 %v1070_v5, 0.0  ;;  %v1073_v16 = vadd.f32 %v4855_v15, %v1072_v10 }
  0xfa   : > { %v1439_v54 = vpack.c.bf16 %v1315_v48, %v1314_v47  ;;  %v1379_v19 = vmax.f32 %v1081_v9, 0.0 }
  0xfb   : > { %v1438_v56 = vpack.c.bf16 %v1313_v52, %v1312_v51  ;;  %v4093_v57 = vpop.f32.mrb[8].mxu0  ;;  %v1377_v21 = vmax.f32 %v1073_v16, 0.0 }
  0xfc   : > { %v838_v59 = vadd.f32 %v4093_v57, %v4855_v15  ;;  %v829_v60 = vpop.f32.mrb[9].mxu0  ;;  %v4887_v24 = vpack.c.bf16 %v1379_v19, %v1378_v8 }
  0xfd   : > { %v830_v63 = vadd.f32 %v4855_v15, %v829_v60  ;;  %v4094_v0 = vpop.f32.mrb[10].mxu0  ;;  %4231 = vmatprep.mubr.bf16.mxu1 %v1438_v56  ;;  %v4890_v27 = vpack.c.bf16 %v1377_v21, %v1376_v14  ;;  %v4157_v28 = vpop.f32.mrb[8].mxu1 }
  0xfe   : > { %v841_v3 = vadd.f32 %v4094_v0, %v4855_v15  ;;  %v832_v4 = vpop.f32.mrb[11].mxu0  ;;  %4232 = vmatmul.mubr.bf16.gmra.mrb[68].mxu1 %v1439_v54  ;;  %v1318_v12 = vmax.f32 %v838_v59, 0.0  ;;  %v1094_v31 = vadd.f32 %v4157_v28, %v4855_v15  ;;  %v1085_v32 = vpop.f32.mrb[9].mxu1 }
  0xff   : > { %v833_v7 = vadd.f32 %v4855_v15, %v832_v4  ;;  %v1316_v17 = vmax.f32 %v830_v63, 0.0  ;;  %v1086_v35 = vadd.f32 %v4855_v15, %v1085_v32  ;;  %v4158_v36 = vpop.f32.mrb[10].mxu1 }
 0x100   : > { %v1319_v13 = vmax.f32 %v841_v3, 0.0  ;;  %v1382_v38 = vmax.f32 %v1094_v31, 0.0  ;;  %v1097_v39 = vadd.f32 %v4158_v36, %v4855_v15  ;;  %v1088_v40 = vpop.f32.mrb[11].mxu1 }
 0x101   : > { %v1317_v18 = vmax.f32 %v833_v7, 0.0  ;;  %v1380_v43 = vmax.f32 %v1086_v35, 0.0  ;;  %v1089_v44 = vadd.f32 %v4855_v15, %v1088_v40  ;;  %v4531_v7 = vld [vmem:[%s5916_s5 + $0x20] sm:$0xff]  }
 0x102   : > { %v1441_v20 = vpack.c.bf16 %v1319_v13, %v1318_v12  ;;  %v1383_v47 = vmax.f32 %v1097_v39, 0.0  ;;  %4363 = vmatprep.subr.bf16.mxu0 %v4531_v7 }
 0x103   : > { %v1440_v22 = vpack.c.bf16 %v1317_v18, %v1316_v17  ;;  %v4097_v23 = vpop.f32.mrb[12].mxu0  ;;  %v1381_v49 = vmax.f32 %v1089_v44, 0.0  ;;  %4364 = vmatpush3.bf16.msra.mxu0 %v4531_v7  ;;  %v4532_v7 = vld [vmem:[%s5916_s5 + $0x28] sm:$0xff]  }
 0x104   : > { %v854_v25 = vadd.f32 %v4097_v23, %v4855_v15  ;;  %v845_v26 = vpop.f32.mrb[13].mxu0  ;;  %v4899_v52 = vpack.c.bf16 %v1383_v47, %v1382_v38  ;;  %4365 = vmatprep.subr.bf16.mxu0 %v4532_v7 }
 0x105   : > { %v846_v29 = vadd.f32 %v4855_v15, %v845_v26  ;;  %v4098_v30 = vpop.f32.mrb[14].mxu0  ;;  %4235 = vmatprep.mubr.bf16.mxu1 %v1440_v22  ;;  %v4902_v55 = vpack.c.bf16 %v1381_v49, %v1380_v43  ;;  %v4161_v56 = vpop.f32.mrb[12].mxu1 }
 0x106   : > { %v857_v33 = vadd.f32 %v4098_v30, %v4855_v15  ;;  %v848_v34 = vpop.f32.mrb[15].mxu0  ;;  %4236 = vmatmul.mubr.bf16.gmra.mrb[72].mxu1 %v1441_v20  ;;  %v1322_v41 = vmax.f32 %v854_v25, 0.0  ;;  %v1110_v60 = vadd.f32 %v4161_v56, %v4855_v15  ;;  %v1101_v62 = vpop.f32.mrb[13].mxu1 }
 0x107   : > { %v849_v37 = vadd.f32 %v4855_v15, %v848_v34  ;;  %v1320_v45 = vmax.f32 %v846_v29, 0.0  ;;  %v1102_v1 = vadd.f32 %v4855_v15, %v1101_v62  ;;  %v4162_v2 = vpop.f32.mrb[14].mxu1  ;;  %4366 = vmatpush3.bf16.msra.mxu0 %v4532_v7 }
 0x108   : > { %v1323_v42 = vmax.f32 %v857_v33, 0.0  ;;  %v1386_v4 = vmax.f32 %v1110_v60, 0.0  ;;  %v1113_v5 = vadd.f32 %v4162_v2, %v4855_v15  ;;  %v1104_v6 = vpop.f32.mrb[15].mxu1 }
 0x109   : > { %v1321_v46 = vmax.f32 %v849_v37, 0.0  ;;  %v1384_v10 = vmax.f32 %v1102_v1, 0.0  ;;  %v1105_v11 = vadd.f32 %v4855_v15, %v1104_v6 }
 0x10a   : > { %v1443_v48 = vpack.c.bf16 %v1323_v42, %v1322_v41  ;;  %v1387_v14 = vmax.f32 %v1113_v5, 0.0 }
 0x10b   : > { %v1442_v50 = vpack.c.bf16 %v1321_v46, %v1320_v45  ;;  %v4101_v51 = vpop.f32.mrb[16].mxu0  ;;  %v1385_v17 = vmax.f32 %v1105_v11, 0.0 }
 0x10c   : > { %v870_v53 = vadd.f32 %v4101_v51, %v4855_v15  ;;  %v861_v54 = vpop.f32.mrb[17].mxu0  ;;  %v4914_v20 = vpack.c.bf16 %v1387_v14, %v1386_v4 }
 0x10d   : > { %v862_v57 = vadd.f32 %v4855_v15, %v861_v54  ;;  %v4102_v59 = vpop.f32.mrb[18].mxu0  ;;  %4239 = vmatprep.mubr.bf16.mxu1 %v1442_v50  ;;  %v4917_v23 = vpack.c.bf16 %v1385_v17, %v1384_v10  ;;  %v4165_v25 = vpop.f32.mrb[16].mxu1 }
 0x10e   : > { %v873_v63 = vadd.f32 %v4102_v59, %v4855_v15  ;;  %v864_v0 = vpop.f32.mrb[19].mxu0  ;;  %4240 = vmatmul.mubr.bf16.gmra.mrb[76].mxu1 %v1443_v48  ;;  %v1326_v8 = vmax.f32 %v870_v53, 0.0  ;;  %v1126_v29 = vadd.f32 %v4165_v25, %v4855_v15  ;;  %v1117_v30 = vpop.f32.mrb[17].mxu1 }
 0x10f   : > { %v865_v3 = vadd.f32 %v4855_v15, %v864_v0  ;;  %v1324_v12 = vmax.f32 %v862_v57, 0.0  ;;  %v1118_v33 = vadd.f32 %v4855_v15, %v1117_v30  ;;  %v4166_v34 = vpop.f32.mrb[18].mxu1 }
 0x110   : > { %v1327_v9 = vmax.f32 %v873_v63, 0.0  ;;  %v1390_v36 = vmax.f32 %v1126_v29, 0.0  ;;  %v1129_v37 = vadd.f32 %v4166_v34, %v4855_v15  ;;  %v1120_v38 = vpop.f32.mrb[19].mxu1 }
 0x111   : > { %v1325_v13 = vmax.f32 %v865_v3, 0.0  ;;  %v1388_v41 = vmax.f32 %v1118_v33, 0.0  ;;  %v1121_v42 = vadd.f32 %v4855_v15, %v1120_v38 }
 0x112   : > { %v1445_v16 = vpack.c.bf16 %v1327_v9, %v1326_v8  ;;  %v1391_v45 = vmax.f32 %v1129_v37, 0.0 }
 0x113   : > { %v1444_v18 = vpack.c.bf16 %v1325_v13, %v1324_v12  ;;  %v4105_v19 = vpop.f32.mrb[20].mxu0  ;;  %v1389_v47 = vmax.f32 %v1121_v42, 0.0 }
 0x114   : > { %v886_v21 = vadd.f32 %v4105_v19, %v4855_v15  ;;  %v877_v22 = vpop.f32.mrb[21].mxu0  ;;  %v4926_v50 = vpack.c.bf16 %v1391_v45, %v1390_v36 }
 0x115   : > { %v878_v26 = vadd.f32 %v4855_v15, %v877_v22  ;;  %v4106_v28 = vpop.f32.mrb[22].mxu0  ;;  %4243 = vmatprep.mubr.bf16.mxu1 %v1444_v18  ;;  %v4929_v54 = vpack.c.bf16 %v1389_v47, %v1388_v41  ;;  %v4169_v56 = vpop.f32.mrb[20].mxu1 }
 0x116   : > { %v889_v31 = vadd.f32 %v4106_v28, %v4855_v15  ;;  %v880_v32 = vpop.f32.mrb[23].mxu0  ;;  %4244 = vmatmul.mubr.bf16.gmra.mrb[80].mxu1 %v1445_v16  ;;  %v1330_v39 = vmax.f32 %v886_v21, 0.0  ;;  %v1142_v60 = vadd.f32 %v4169_v56, %v4855_v15  ;;  %v1133_v62 = vpop.f32.mrb[21].mxu1 }
 0x117   : > { %v881_v35 = vadd.f32 %v4855_v15, %v880_v32  ;;  %v1328_v43 = vmax.f32 %v878_v26, 0.0  ;;  %v1134_v1 = vadd.f32 %v4855_v15, %v1133_v62  ;;  %v4170_v2 = vpop.f32.mrb[22].mxu1 }
 0x118   : > { %v1331_v40 = vmax.f32 %v889_v31, 0.0  ;;  %v1394_v4 = vmax.f32 %v1142_v60, 0.0  ;;  %v1145_v5 = vadd.f32 %v4170_v2, %v4855_v15  ;;  %v1136_v6 = vpop.f32.mrb[23].mxu1 }
 0x119   : > { %v1329_v44 = vmax.f32 %v881_v35, 0.0  ;;  %v1392_v10 = vmax.f32 %v1134_v1, 0.0  ;;  %v1137_v11 = vadd.f32 %v4855_v15, %v1136_v6 }
 0x11a   : > { %v1447_v46 = vpack.c.bf16 %v1331_v40, %v1330_v39  ;;  %v1395_v14 = vmax.f32 %v1145_v5, 0.0 }
 0x11b   : > { %v1446_v48 = vpack.c.bf16 %v1329_v44, %v1328_v43  ;;  %v4109_v49 = vpop.f32.mrb[24].mxu0  ;;  %v1393_v17 = vmax.f32 %v1137_v11, 0.0  ;;  %v4533_v11 = vld [vmem:[%s5916_s5 + $0x30] sm:$0xff]  }
 0x11c   : > { %v902_v51 = vadd.f32 %v4109_v49, %v4855_v15  ;;  %v893_v53 = vpop.f32.mrb[25].mxu0  ;;  %v4941_v21 = vpack.c.bf16 %v1395_v14, %v1394_v4  ;;  %4367 = vmatprep.subr.bf16.mxu0 %v4533_v11 }
 0x11d   : > { %v894_v57 = vadd.f32 %v4855_v15, %v893_v53  ;;  %v4110_v59 = vpop.f32.mrb[26].mxu0  ;;  %4247 = vmatprep.mubr.bf16.mxu1 %v1446_v48  ;;  %v4944_v26 = vpack.c.bf16 %v1393_v17, %v1392_v10  ;;  %v4173_v28 = vpop.f32.mrb[24].mxu1  ;;  %4368 = vmatpush3.bf16.msra.mxu0 %v4533_v11 }
 0x11e   : > { %v905_v63 = vadd.f32 %v4110_v59, %v4855_v15  ;;  %v896_v0 = vpop.f32.mrb[27].mxu0  ;;  %4248 = vmatmul.mubr.bf16.gmra.mrb[84].mxu1 %v1447_v46  ;;  %v1334_v8 = vmax.f32 %v902_v51, 0.0  ;;  %v1158_v31 = vadd.f32 %v4173_v28, %v4855_v15  ;;  %v1149_v32 = vpop.f32.mrb[25].mxu1 }
 0x11f   : > { %v897_v3 = vadd.f32 %v4855_v15, %v896_v0  ;;  %v1332_v12 = vmax.f32 %v894_v57, 0.0  ;;  %v1150_v35 = vadd.f32 %v4855_v15, %v1149_v32  ;;  %v4174_v36 = vpop.f32.mrb[26].mxu1 }
 0x120   : > { %v1335_v9 = vmax.f32 %v905_v63, 0.0  ;;  %v1398_v38 = vmax.f32 %v1158_v31, 0.0  ;;  %v1161_v39 = vadd.f32 %v4174_v36, %v4855_v15  ;;  %v1152_v40 = vpop.f32.mrb[27].mxu1 }
 0x121   : > { %v1333_v13 = vmax.f32 %v897_v3, 0.0  ;;  %v1396_v43 = vmax.f32 %v1150_v35, 0.0  ;;  %v1153_v44 = vadd.f32 %v4855_v15, %v1152_v40 }
 0x122   : > { %v1449_v16 = vpack.c.bf16 %v1335_v9, %v1334_v8  ;;  %v1399_v47 = vmax.f32 %v1161_v39, 0.0 }
 0x123   : > { %v1448_v18 = vpack.c.bf16 %v1333_v13, %v1332_v12  ;;  %v4113_v19 = vpop.f32.mrb[28].mxu0  ;;  %v1397_v49 = vmax.f32 %v1153_v44, 0.0 }
 0x124   : > { %v918_v22 = vadd.f32 %v4113_v19, %v4855_v15  ;;  %v909_v25 = vpop.f32.mrb[29].mxu0  ;;  %v4953_v56 = vpack.c.bf16 %v1399_v47, %v1398_v38 }
 0x125   : > { %v910_v29 = vadd.f32 %v4855_v15, %v909_v25  ;;  %v4114_v30 = vpop.f32.mrb[30].mxu0  ;;  %4251 = vmatprep.mubr.bf16.mxu1 %v1448_v18  ;;  %v4956_v60 = vpack.c.bf16 %v1397_v49, %v1396_v43  ;;  %v4177_v62 = vpop.f32.mrb[28].mxu1 }
 0x126   : > { %v921_v33 = vadd.f32 %v4114_v30, %v4855_v15  ;;  %v912_v34 = vpop.f32.mrb[31].mxu0  ;;  %4252 = vmatmul.mubr.bf16.gmra.mrb[88].mxu1 %v1449_v16  ;;  %v1338_v41 = vmax.f32 %v918_v22, 0.0  ;;  %v1174_v1 = vadd.f32 %v4177_v62, %v4855_v15  ;;  %v1165_v2 = vpop.f32.mrb[29].mxu1 }
 0x127   : > { %v913_v37 = vadd.f32 %v4855_v15, %v912_v34  ;;  %v1336_v45 = vmax.f32 %v910_v29, 0.0  ;;  %v1166_v5 = vadd.f32 %v4855_v15, %v1165_v2  ;;  %v4178_v6 = vpop.f32.mrb[30].mxu1 }
 0x128   : > { %v1339_v42 = vmax.f32 %v921_v33, 0.0  ;;  %v1402_v8 = vmax.f32 %v1174_v1, 0.0  ;;  %v1177_v9 = vadd.f32 %v4178_v6, %v4855_v15  ;;  %v1168_v10 = vpop.f32.mrb[31].mxu1 }
 0x129   : > { %v1337_v46 = vmax.f32 %v913_v37, 0.0  ;;  %v1400_v14 = vmax.f32 %v1166_v5, 0.0  ;;  %v1169_v16 = vadd.f32 %v4855_v15, %v1168_v10 }
 0x12a   : > { %v1451_v48 = vpack.c.bf16 %v1339_v42, %v1338_v41  ;;  %v1403_v19 = vmax.f32 %v1177_v9, 0.0 }
 0x12b   : > { %v1450_v51 = vpack.c.bf16 %v1337_v46, %v1336_v45  ;;  %v4117_v53 = vpop.f32.mrb[32].mxu0  ;;  %v1401_v25 = vmax.f32 %v1169_v16, 0.0 }
 0x12c   : > { %v934_v57 = vadd.f32 %v4117_v53, %v4855_v15  ;;  %v925_v59 = vpop.f32.mrb[33].mxu0  ;;  %v4968_v30 = vpack.c.bf16 %v1403_v19, %v1402_v8 }
 0x12d   : > { %v926_v63 = vadd.f32 %v4855_v15, %v925_v59  ;;  %v4118_v0 = vpop.f32.mrb[34].mxu0  ;;  %4255 = vmatprep.mubr.bf16.mxu1 %v1450_v51  ;;  %v4971_v33 = vpack.c.bf16 %v1401_v25, %v1400_v14  ;;  %v4181_v34 = vpop.f32.mrb[32].mxu1 }
 0x12e   : > { %v937_v3 = vadd.f32 %v4118_v0, %v4855_v15  ;;  %v928_v4 = vpop.f32.mrb[35].mxu0  ;;  %4256 = vmatmul.mubr.bf16.gmra.mrb[92].mxu1 %v1451_v48  ;;  %v1342_v12 = vmax.f32 %v934_v57, 0.0  ;;  %v1190_v37 = vadd.f32 %v4181_v34, %v4855_v15  ;;  %v1181_v38 = vpop.f32.mrb[33].mxu1 }
 0x12f   : > { %v929_v7 = vadd.f32 %v4855_v15, %v928_v4  ;;  %v1340_v17 = vmax.f32 %v926_v63, 0.0  ;;  %v1182_v41 = vadd.f32 %v4855_v15, %v1181_v38  ;;  %v4182_v42 = vpop.f32.mrb[34].mxu1 }
 0x130   : > { %v1343_v13 = vmax.f32 %v937_v3, 0.0  ;;  %v1406_v44 = vmax.f32 %v1190_v37, 0.0  ;;  %v1193_v45 = vadd.f32 %v4182_v42, %v4855_v15  ;;  %v1184_v46 = vpop.f32.mrb[35].mxu1 }
 0x131   : > { %v1341_v18 = vmax.f32 %v929_v7, 0.0  ;;  %v1404_v49 = vmax.f32 %v1182_v41, 0.0  ;;  %v1185_v51 = vadd.f32 %v4855_v15, %v1184_v46 }
 0x132   : > { %v1453_v22 = vpack.c.bf16 %v1343_v13, %v1342_v12  ;;  %v1407_v59 = vmax.f32 %v1193_v45, 0.0 }
 0x133   : > { %v1452_v28 = vpack.c.bf16 %v1341_v18, %v1340_v17  ;;  %v4121_v29 = vpop.f32.mrb[36].mxu0  ;;  %v1405_v63 = vmax.f32 %v1185_v51, 0.0 }
 0x134   : > { %v950_v31 = vadd.f32 %v4121_v29, %v4855_v15  ;;  %v941_v32 = vpop.f32.mrb[37].mxu0  ;;  %v4980_v2 = vpack.c.bf16 %v1407_v59, %v1406_v44 }
 0x135   : > { %v942_v35 = vadd.f32 %v4855_v15, %v941_v32  ;;  %v4122_v36 = vpop.f32.mrb[38].mxu0  ;;  %4259 = vmatprep.mubr.bf16.mxu1 %v1452_v28  ;;  %v4983_v5 = vpack.c.bf16 %v1405_v63, %v1404_v49  ;;  %v4185_v6 = vpop.f32.mrb[36].mxu1 }
 0x136   : > { %v953_v39 = vadd.f32 %v4122_v36, %v4855_v15  ;;  %v944_v40 = vpop.f32.mrb[39].mxu0  ;;  %4260 = vmatmul.mubr.bf16.gmra.mrb[96].mxu1 %v1453_v22  ;;  %v1346_v47 = vmax.f32 %v950_v31, 0.0  ;;  %v1206_v9 = vadd.f32 %v4185_v6, %v4855_v15  ;;  %v1197_v10 = vpop.f32.mrb[37].mxu1  ;;  %v4534_v22 = vld [vmem:[%s5916_s5 + $0x38] sm:$0xff]  }
 0x137   : > { %v945_v43 = vadd.f32 %v4855_v15, %v944_v40  ;;  %v1344_v53 = vmax.f32 %v942_v35, 0.0  ;;  %v1198_v13 = vadd.f32 %v4855_v15, %v1197_v10  ;;  %v4186_v14 = vpop.f32.mrb[38].mxu1  ;;  %4369 = vmatprep.subr.bf16.mxu0 %v4534_v22 }
 0x138   : > { %v1347_v48 = vmax.f32 %v953_v39, 0.0  ;;  %v1410_v17 = vmax.f32 %v1206_v9, 0.0  ;;  %v1209_v18 = vadd.f32 %v4186_v14, %v4855_v15  ;;  %v1200_v19 = vpop.f32.mrb[39].mxu1  ;;  %4370 = vmatpush3.bf16.msra.mxu0 %v4534_v22 }
 0x139   : > { %v1345_v57 = vmax.f32 %v945_v43, 0.0  ;;  %v1408_v29 = vmax.f32 %v1198_v13, 0.0  ;;  %v1201_v31 = vadd.f32 %v4855_v15, %v1200_v19 }
 0x13a   : > { %v1455_v62 = vpack.c.bf16 %v1347_v48, %v1346_v47  ;;  %v1411_v35 = vmax.f32 %v1209_v18, 0.0 }
 0x13b   : > { %v1454_v0 = vpack.c.bf16 %v1345_v57, %v1344_v53  ;;  %v4125_v1 = vpop.f32.mrb[40].mxu0  ;;  %v1409_v37 = vmax.f32 %v1201_v31, 0.0 }
 0x13c   : > { %v966_v3 = vadd.f32 %v4125_v1, %v4855_v15  ;;  %v957_v4 = vpop.f32.mrb[41].mxu0  ;;  %v4995_v40 = vpack.c.bf16 %v1411_v35, %v1410_v17 }
 0x13d   : > { %v958_v7 = vadd.f32 %v4855_v15, %v957_v4  ;;  %v4126_v8 = vpop.f32.mrb[42].mxu0  ;;  %4263 = vmatprep.mubr.bf16.mxu1 %v1454_v0  ;;  %v4998_v43 = vpack.c.bf16 %v1409_v37, %v1408_v29  ;;  %v4189_v44 = vpop.f32.mrb[40].mxu1 }
 0x13e   : > { %v969_v11 = vadd.f32 %v4126_v8, %v4855_v15  ;;  %v960_v12 = vpop.f32.mrb[43].mxu0  ;;  %4264 = vmatmul.mubr.bf16.gmra.mrb[100].mxu1 %v1455_v62  ;;  %v1350_v25 = vmax.f32 %v966_v3, 0.0  ;;  %v1222_v47 = vadd.f32 %v4189_v44, %v4855_v15  ;;  %v1213_v48 = vpop.f32.mrb[41].mxu1 }
 0x13f   : > { %v961_v16 = vadd.f32 %v4855_v15, %v960_v12  ;;  %v1348_v32 = vmax.f32 %v958_v7, 0.0  ;;  %v1214_v53 = vadd.f32 %v4855_v15, %v1213_v48  ;;  %v4190_v57 = vpop.f32.mrb[42].mxu1 }
 0x140   : > { %v1351_v28 = vmax.f32 %v969_v11, 0.0  ;;  %v1414_v62 = vmax.f32 %v1222_v47, 0.0  ;;  %v1225_v63 = vadd.f32 %v4190_v57, %v4855_v15  ;;  %v1216_v0 = vpop.f32.mrb[43].mxu1 }
 0x141   : > { %v1349_v34 = vmax.f32 %v961_v16, 0.0  ;;  %v1412_v4 = vmax.f32 %v1214_v53, 0.0  ;;  %v1217_v6 = vadd.f32 %v4855_v15, %v1216_v0 }
 0x142   : > { %v1457_v36 = vpack.c.bf16 %v1351_v28, %v1350_v25  ;;  %v1415_v9 = vmax.f32 %v1225_v63, 0.0 }
 0x143   : > { %v1456_v38 = vpack.c.bf16 %v1349_v34, %v1348_v32  ;;  %v4129_v39 = vpop.f32.mrb[44].mxu0  ;;  %v1413_v11 = vmax.f32 %v1217_v6, 0.0 }
 0x144   : > { %v982_v41 = vadd.f32 %v4129_v39, %v4855_v15  ;;  %v973_v42 = vpop.f32.mrb[45].mxu0  ;;  %v5007_v14 = vpack.c.bf16 %v1415_v9, %v1414_v62 }
 0x145   : > { %v974_v45 = vadd.f32 %v4855_v15, %v973_v42  ;;  %v4130_v46 = vpop.f32.mrb[46].mxu0  ;;  %4267 = vmatprep.mubr.bf16.mxu1 %v1456_v38  ;;  %v5010_v18 = vpack.c.bf16 %v1413_v11, %v1412_v4  ;;  %v4193_v19 = vpop.f32.mrb[44].mxu1 }
 0x146   : > { %v985_v49 = vadd.f32 %v4130_v46, %v4855_v15  ;;  %v976_v51 = vpop.f32.mrb[47].mxu0  ;;  %4268 = vmatmul.mubr.bf16.gmra.mrb[104].mxu1 %v1457_v36  ;;  %v1354_v1 = vmax.f32 %v982_v41, 0.0  ;;  %v1238_v28 = vadd.f32 %v4193_v19, %v4855_v15  ;;  %v1229_v29 = vpop.f32.mrb[45].mxu1 }
 0x147   : > { %v977_v59 = vadd.f32 %v4855_v15, %v976_v51  ;;  %v1352_v7 = vmax.f32 %v974_v45, 0.0  ;;  %v1230_v34 = vadd.f32 %v4855_v15, %v1229_v29  ;;  %v4194_v35 = vpop.f32.mrb[46].mxu1 }
 0x148   : > { %v1355_v3 = vmax.f32 %v985_v49, 0.0  ;;  %v1418_v37 = vmax.f32 %v1238_v28, 0.0  ;;  %v1241_v38 = vadd.f32 %v4194_v35, %v4855_v15  ;;  %v1232_v39 = vpop.f32.mrb[47].mxu1 }
 0x149   : > { %v1353_v8 = vmax.f32 %v977_v59, 0.0  ;;  %v1416_v44 = vmax.f32 %v1230_v34, 0.0  ;;  %v1233_v45 = vadd.f32 %v4855_v15, %v1232_v39 }
 0x14a   : > { %v1459_v10 = vpack.c.bf16 %v1355_v3, %v1354_v1  ;;  %v1419_v48 = vmax.f32 %v1241_v38, 0.0 }
 0x14b   : > { %v1458_v12 = vpack.c.bf16 %v1353_v8, %v1352_v7  ;;  %v4133_v13 = vpop.f32.mrb[48].mxu0  ;;  %v1417_v51 = vmax.f32 %v1233_v45, 0.0 }
 0x14c   : > { %v998_v16 = vadd.f32 %v4133_v13, %v4855_v15  ;;  %v989_v17 = vpop.f32.mrb[49].mxu0  ;;  %v5019_v59 = vpack.c.bf16 %v1419_v48, %v1418_v37 }
 0x14d   : > { %v990_v22 = vadd.f32 %v4855_v15, %v989_v17  ;;  %v4134_v25 = vpop.f32.mrb[50].mxu0  ;;  %4271 = vmatprep.mubr.bf16.mxu1 %v1458_v12  ;;  %v5022_v0 = vpack.c.bf16 %v1417_v51, %v1416_v44  ;;  %v4197_v1 = vpop.f32.mrb[48].mxu1 }
 0x14e   : > { %v1001_v31 = vadd.f32 %v4134_v25, %v4855_v15  ;;  %v992_v32 = vpop.f32.mrb[51].mxu0  ;;  %4272 = vmatmul.mubr.bf16.gmra.mrb[108].mxu1 %v1459_v10  ;;  %v1358_v41 = vmax.f32 %v998_v16, 0.0  ;;  %v1254_v6 = vadd.f32 %v4197_v1, %v4855_v15  ;;  %v1245_v7 = vpop.f32.mrb[49].mxu1 }
 0x14f   : > { %v993_v36 = vadd.f32 %v4855_v15, %v992_v32  ;;  %v1356_v46 = vmax.f32 %v990_v22, 0.0  ;;  %v1246_v10 = vadd.f32 %v4855_v15, %v1245_v7  ;;  %v4198_v11 = vpop.f32.mrb[50].mxu1 }
 0x150   : > { %v1359_v42 = vmax.f32 %v1001_v31, 0.0  ;;  %v1422_v13 = vmax.f32 %v1254_v6, 0.0  ;;  %v1257_v16 = vadd.f32 %v4198_v11, %v4855_v15  ;;  %v1248_v17 = vpop.f32.mrb[51].mxu1 }
 0x151   : > { %v1357_v47 = vmax.f32 %v993_v36, 0.0  ;;  %v1420_v25 = vmax.f32 %v1246_v10, 0.0  ;;  %v1249_v28 = vadd.f32 %v4855_v15, %v1248_v17 }
 0x152   : > { %v1461_v49 = vpack.c.bf16 %v1359_v42, %v1358_v41  ;;  %v1423_v32 = vmax.f32 %v1257_v16, 0.0 }
 0x153   : > { %v1460_v53 = vpack.c.bf16 %v1357_v47, %v1356_v46  ;;  %v4137_v57 = vpop.f32.mrb[52].mxu0  ;;  %v1421_v35 = vmax.f32 %v1249_v28, 0.0 }
 0x154   : > { %v1014_v62 = vadd.f32 %v4137_v57, %v4855_v15  ;;  %v1005_v63 = vpop.f32.mrb[53].mxu0  ;;  %v5031_v38 = vpack.c.bf16 %v1423_v32, %v1422_v13 }
 0x155   : > { %v1006_v3 = vadd.f32 %v4855_v15, %v1005_v63  ;;  %v4138_v4 = vpop.f32.mrb[54].mxu0  ;;  %4275 = vmatprep.mubr.bf16.mxu1 %v1460_v53  ;;  %v5034_v42 = vpack.c.bf16 %v1421_v35, %v1420_v25  ;;  %v4201_v44 = vpop.f32.mrb[52].mxu1 }
 0x156   : > { %v1017_v8 = vadd.f32 %v4138_v4, %v4855_v15  ;;  %v1008_v9 = vpop.f32.mrb[55].mxu0  ;;  %4276 = vmatmul.mubr.bf16.gmra.mrb[112].mxu1 %v1461_v49  ;;  %v1362_v19 = vmax.f32 %v1014_v62, 0.0  ;;  %v1270_v47 = vadd.f32 %v4201_v44, %v4855_v15  ;;  %v1261_v48 = vpop.f32.mrb[53].mxu1 }
 0x157   : > { %v1009_v12 = vadd.f32 %v4855_v15, %v1008_v9  ;;  %v1360_v29 = vmax.f32 %v1006_v3, 0.0  ;;  %v1262_v53 = vadd.f32 %v4855_v15, %v1261_v48  ;;  %v4202_v57 = vpop.f32.mrb[54].mxu1 }
 0x158   : > { %v1363_v22 = vmax.f32 %v1017_v8, 0.0  ;;  %v1426_v63 = vmax.f32 %v1270_v47, 0.0  ;;  %v1273_v1 = vadd.f32 %v4202_v57, %v4855_v15  ;;  %v1264_v3 = vpop.f32.mrb[55].mxu1 }
 0x159   : > { %v1361_v31 = vmax.f32 %v1009_v12, 0.0  ;;  %v1424_v7 = vmax.f32 %v1262_v53, 0.0  ;;  %v1265_v8 = vadd.f32 %v4855_v15, %v1264_v3 }
 0x15a   : > { %v1463_v34 = vpack.c.bf16 %v1363_v22, %v1362_v19  ;;  %v1427_v11 = vmax.f32 %v1273_v1, 0.0 }
 0x15b   : > { %v1462_v36 = vpack.c.bf16 %v1361_v31, %v1360_v29  ;;  %v4141_v37 = vpop.f32.mrb[56].mxu0  ;;  %v1425_v13 = vmax.f32 %v1265_v8, 0.0 }
 0x15c   : > { %v1030_v39 = vadd.f32 %v4141_v37, %v4855_v15  ;;  %v1021_v41 = vpop.f32.mrb[57].mxu0  ;;  %v5043_v19 = vpack.c.bf16 %v1427_v11, %v1426_v63 }
 0x15d   : > { %v1022_v45 = vadd.f32 %v4855_v15, %v1021_v41  ;;  %v4142_v46 = vpop.f32.mrb[58].mxu0  ;;  %4279 = vmatprep.mubr.bf16.mxu1 %v1462_v36  ;;  %v5046_v28 = vpack.c.bf16 %v1425_v13, %v1424_v7  ;;  %v4205_v29 = vpop.f32.mrb[56].mxu1 }
 0x15e   : > { %v1033_v49 = vadd.f32 %v4142_v46, %v4855_v15  ;;  %v1024_v51 = vpop.f32.mrb[59].mxu0  ;;  %4280 = vmatmul.mubr.bf16.gmra.mrb[116].mxu1 %v1463_v34  ;;  %v1366_v4 = vmax.f32 %v1030_v39, 0.0  ;;  %v1286_v34 = vadd.f32 %v4205_v29, %v4855_v15  ;;  %v1277_v35 = vpop.f32.mrb[57].mxu1 }
 0x15f   : > { %v1025_v62 = vadd.f32 %v4855_v15, %v1024_v51  ;;  %v1364_v9 = vmax.f32 %v1022_v45, 0.0  ;;  %v1278_v39 = vadd.f32 %v4855_v15, %v1277_v35  ;;  %v4206_v41 = vpop.f32.mrb[58].mxu1 }
 0x160   : > { %v1367_v6 = vmax.f32 %v1033_v49, 0.0  ;;  %v1430_v45 = vmax.f32 %v1286_v34, 0.0  ;;  %v1289_v46 = vadd.f32 %v4206_v41, %v4855_v15  ;;  %v1280_v47 = vpop.f32.mrb[59].mxu1 }
 0x161   : > { %v1365_v10 = vmax.f32 %v1025_v62, 0.0  ;;  %v1428_v51 = vmax.f32 %v1278_v39, 0.0  ;;  %v1281_v53 = vadd.f32 %v4855_v15, %v1280_v47 }
 0x162   : > { %v1465_v12 = vpack.c.bf16 %v1367_v6, %v1366_v4  ;;  %v1431_v63 = vmax.f32 %v1289_v46, 0.0 }
 0x163   : > { %v1464_v16 = vpack.c.bf16 %v1365_v10, %v1364_v9  ;;  %v4145_v17 = vpop.f32.mrb[60].mxu0  ;;  %v1429_v3 = vmax.f32 %v1281_v53, 0.0 }
 0x164   : > { %v1046_v22 = vadd.f32 %v4145_v17, %v4855_v15  ;;  %v1037_v25 = vpop.f32.mrb[61].mxu0  ;;  %v5055_v6 = vpack.c.bf16 %v1431_v63, %v1430_v45 }
 0x165   : > { %v1038_v31 = vadd.f32 %v4855_v15, %v1037_v25  ;;  %v4146_v32 = vpop.f32.mrb[62].mxu0  ;;  %4283 = vmatprep.mubr.bf16.mxu1 %v1464_v16  ;;  %v5057_v7 = vpack.c.bf16 %v1429_v3, %v1428_v51  ;;  %v4209_v8 = vpop.f32.mrb[60].mxu1 }
 0x166   : > { %v1049_v36 = vadd.f32 %v4146_v32, %v4855_v15  ;;  %v1040_v37 = vpop.f32.mrb[63].mxu0  ;;  %4284 = vmatmul.mubr.bf16.gmra.mrb[120].mxu1 %v1465_v12  ;;  %v1370_v48 = vmax.f32 %v1046_v22, 0.0  ;;  %v1302_v9 = vadd.f32 %v4209_v8, %v4855_v15  ;;  %v1293_v10 = vpop.f32.mrb[61].mxu1 }
 0x167   : > { %v1041_v44 = vadd.f32 %v4855_v15, %v1040_v37  ;;  %v1368_v57 = vmax.f32 %v1038_v31, 0.0  ;;  %v1294_v11 = vadd.f32 %v4855_v15, %v1293_v10  ;;  %v4210_v12 = vpop.f32.mrb[62].mxu1 }
 0x168   : > { %v1371_v49 = vmax.f32 %v1049_v36, 0.0  ;;  %v1434_v13 = vmax.f32 %v1302_v9, 0.0  ;;  %v1305_v16 = vadd.f32 %v4210_v12, %v4855_v15  ;;  %v1296_v17 = vpop.f32.mrb[63].mxu1 }
 0x169   : > { %v1369_v62 = vmax.f32 %v1041_v44, 0.0  ;;  %v1432_v22 = vmax.f32 %v1294_v11, 0.0  ;;  %v1297_v25 = vadd.f32 %v4855_v15, %v1296_v17  ;;  %v5093_v15 = vld [vmem:[%s5915_s4] ss:$0 sm:$0xff] }
 0x16a   : > { %v1467_v1 = vpack.c.bf16 %v1371_v49, %v1370_v48  ;;  %v1435_v29 = vmax.f32 %v1305_v16, 0.0 }
 0x16b   : > { %v1466_v4 = vpack.c.bf16 %v1369_v62, %v1368_v57  ;;  %v1433_v31 = vmax.f32 %v1297_v25, 0.0 }
 0x16c   : > { %v5064_v32 = vpack.c.bf16 %v1435_v29, %v1434_v13 }
 0x16d   : > { %4287 = vmatprep.mubr.bf16.mxu1 %v1466_v4  ;;  %v5066_v34 = vpack.c.bf16 %v1433_v31, %v1432_v22 }
 0x16e   : > { %4288 = vmatmul.mubr.bf16.gmra.mrb[124].mxu1 %v1467_v1 }
 0x16f   : > { %4291 = vmatprep.mubr.bf16.mxu1 %v4875_v61 }
 0x176   : > { %4292 = vmatmul.mubr.bf16.gmra.mrb[128].mxu1 %v4872_v58 }
 0x177   : > { %4295 = vmatprep.mubr.bf16.mxu1 %v4890_v27 }
 0x17e   : > { %4296 = vmatmul.mubr.bf16.gmra.mrb[132].mxu1 %v4887_v24 }
 0x17f   : > { %4299 = vmatprep.mubr.bf16.mxu1 %v4902_v55 }
 0x186   : > { %4300 = vmatmul.mubr.bf16.gmra.mrb[136].mxu1 %v4899_v52 }
 0x187   : > { %4303 = vmatprep.mubr.bf16.mxu1 %v4917_v23 }
 0x18e   : > { %4304 = vmatmul.mubr.bf16.gmra.mrb[140].mxu1 %v4914_v20 }
 0x18f   : > { %4307 = vmatprep.mubr.bf16.mxu1 %v4929_v54 }
 0x196   : > { %4308 = vmatmul.mubr.bf16.gmra.mrb[144].mxu1 %v4926_v50 }
 0x197   : > { %4311 = vmatprep.mubr.bf16.mxu1 %v4944_v26 }
 0x19e   : > { %4312 = vmatmul.mubr.bf16.gmra.mrb[148].mxu1 %v4941_v21 }
 0x19f   : > { %4315 = vmatprep.mubr.bf16.mxu1 %v4956_v60 }
 0x1a6   : > { %4316 = vmatmul.mubr.bf16.gmra.mrb[152].mxu1 %v4953_v56 }
 0x1a7   : > { %4319 = vmatprep.mubr.bf16.mxu1 %v4971_v33 }
 0x1ae   : > { %4320 = vmatmul.mubr.bf16.gmra.mrb[156].mxu1 %v4968_v30 }
 0x1af   : > { %4323 = vmatprep.mubr.bf16.mxu1 %v4983_v5 }
 0x1b6   : > { %4324 = vmatmul.mubr.bf16.gmra.mrb[160].mxu1 %v4980_v2 }
 0x1b7   : > { %4327 = vmatprep.mubr.bf16.mxu1 %v4998_v43 }
 0x1be   : > { %4328 = vmatmul.mubr.bf16.gmra.mrb[164].mxu1 %v4995_v40 }
 0x1bf   : > { %4331 = vmatprep.mubr.bf16.mxu1 %v5010_v18 }
 0x1c6   : > { %4332 = vmatmul.mubr.bf16.gmra.mrb[168].mxu1 %v5007_v14 }
 0x1c7   : > { %4335 = vmatprep.mubr.bf16.mxu1 %v5022_v0 }
 0x1c9   : > { %v4229_v58 = vpop.f32.mrb[64].mxu1 }
 0x1ca   : > { %v1614_v61 = vadd.f32 %v4229_v58, %v5093_v15  ;;  %v1605_v24 = vpop.f32.mrb[65].mxu1 }
 0x1cb   : > { %v1606_v27 = vadd.f32 %v5093_v15, %v1605_v24  ;;  %v4230_v52 = vpop.f32.mrb[66].mxu1 }
 0x1cc   : > { %v1617_v55 = vadd.f32 %v4230_v52, %v5093_v15  ;;  %v1608_v20 = vpop.f32.mrb[67].mxu1  ;;  %v2118_v50 = vmax.f32 %v1614_v61, 0.0 }
 0x1cd   : > { %v1609_v23 = vadd.f32 %v5093_v15, %v1608_v20  ;;  %v2116_v21 = vmax.f32 %v1606_v27, 0.0 }
 0x1ce   : > { %v2119_v54 = vmax.f32 %v1617_v55, 0.0  ;;  %4336 = vmatmul.mubr.bf16.gmra.mrb[172].mxu1 %v5019_v59 }
 0x1cf   : > { %v2117_v26 = vmax.f32 %v1609_v23, 0.0  ;;  %4339 = vmatprep.mubr.bf16.mxu1 %v5034_v42 }
 0x1d0   : > { %v2245_v56 = vpack.c.bf16 %v2119_v54, %v2118_v50 }
 0x1d1   : > { %v2244_v60 = vpack.c.bf16 %v2117_v26, %v2116_v21  ;;  %v4233_v30 = vpop.f32.mrb[68].mxu1 }
 0x1d2   : > { %v1630_v33 = vadd.f32 %v4233_v30, %v5093_v15  ;;  %v1621_v2 = vpop.f32.mrb[69].mxu1 }
 0x1d3   : > { %v1622_v5 = vadd.f32 %v5093_v15, %v1621_v2  ;;  %v4234_v40 = vpop.f32.mrb[70].mxu1  ;;  %4371 = vmatprep.mubr.bf16.mxu0 %v2244_v60 }
 0x1d4   : > { %v1633_v43 = vadd.f32 %v4234_v40, %v5093_v15  ;;  %v1624_v14 = vpop.f32.mrb[71].mxu1  ;;  %4372 = vmatmul.mubr.bf16.vlgmr.msra.gmra.mrb[64].mxu0 %v2245_v56  ;;  %v2122_v59 = vmax.f32 %v1630_v33, 0.0 }
 0x1d5   : > { %v1625_v18 = vadd.f32 %v5093_v15, %v1624_v14  ;;  %v2120_v42 = vmax.f32 %v1622_v5, 0.0 }
 0x1d6   : > { %v2123_v0 = vmax.f32 %v1633_v43, 0.0  ;;  %4340 = vmatmul.mubr.bf16.gmra.mrb[176].mxu1 %v5031_v38 }
 0x1d7   : > { %v2121_v35 = vmax.f32 %v1625_v18, 0.0  ;;  %4343 = vmatprep.mubr.bf16.mxu1 %v5046_v28 }
 0x1d8   : > { %v2247_v36 = vpack.c.bf16 %v2123_v0, %v2122_v59 }
 0x1d9   : > { %v2246_v37 = vpack.c.bf16 %v2121_v35, %v2120_v42  ;;  %v4237_v39 = vpop.f32.mrb[72].mxu1 }
 0x1da   : > { %v1646_v41 = vadd.f32 %v4237_v39, %v5093_v15  ;;  %v1637_v44 = vpop.f32.mrb[73].mxu1 }
 0x1db   : > { %v1638_v45 = vadd.f32 %v5093_v15, %v1637_v44  ;;  %v4238_v46 = vpop.f32.mrb[74].mxu1  ;;  %4375 = vmatprep.mubr.bf16.mxu0 %v2246_v37 }
 0x1dc   : > { %v1649_v47 = vadd.f32 %v4238_v46, %v5093_v15  ;;  %v1640_v48 = vpop.f32.mrb[75].mxu1  ;;  %4376 = vmatmul.mubr.bf16.gmra.mrb[68].mxu0 %v2247_v36  ;;  %v2126_v49 = vmax.f32 %v1646_v41, 0.0 }
 0x1dd   : > { %v1641_v38 = vadd.f32 %v5093_v15, %v1640_v48  ;;  %v2124_v28 = vmax.f32 %v1638_v45, 0.0 }
 0x1de   : > { %v2127_v51 = vmax.f32 %v1649_v47, 0.0  ;;  %4344 = vmatmul.mubr.bf16.gmra.mrb[180].mxu1 %v5043_v19 }
 0x1df   : > { %v2125_v53 = vmax.f32 %v1641_v38, 0.0  ;;  %4347 = vmatprep.mubr.bf16.mxu1 %v5057_v7 }
 0x1e0   : > { %v2249_v57 = vpack.c.bf16 %v2127_v51, %v2126_v49 }
 0x1e1   : > { %v2248_v62 = vpack.c.bf16 %v2125_v53, %v2124_v28  ;;  %v4241_v63 = vpop.f32.mrb[76].mxu1 }
 0x1e2   : > { %v1662_v1 = vadd.f32 %v4241_v63, %v5093_v15  ;;  %v1653_v3 = vpop.f32.mrb[77].mxu1 }
 0x1e3   : > { %v1654_v4 = vadd.f32 %v5093_v15, %v1653_v3  ;;  %v4242_v8 = vpop.f32.mrb[78].mxu1  ;;  %4379 = vmatprep.mubr.bf16.mxu0 %v2248_v62 }
 0x1e4   : > { %v1665_v9 = vadd.f32 %v4242_v8, %v5093_v15  ;;  %v1656_v10 = vpop.f32.mrb[79].mxu1  ;;  %4380 = vmatmul.mubr.bf16.gmra.mrb[72].mxu0 %v2249_v57  ;;  %v2130_v11 = vmax.f32 %v1662_v1, 0.0 }
 0x1e5   : > { %v1657_v19 = vadd.f32 %v5093_v15, %v1656_v10  ;;  %v2128_v7 = vmax.f32 %v1654_v4, 0.0 }
 0x1e6   : > { %v2131_v12 = vmax.f32 %v1665_v9, 0.0  ;;  %4348 = vmatmul.mubr.bf16.gmra.mrb[184].mxu1 %v5055_v6 }
 0x1e7   : > { %v2129_v13 = vmax.f32 %v1657_v19, 0.0  ;;  %4351 = vmatprep.mubr.bf16.mxu1 %v5066_v34 }
 0x1e8   : > { %v2251_v16 = vpack.c.bf16 %v2131_v12, %v2130_v11 }
 0x1e9   : > { %v2250_v17 = vpack.c.bf16 %v2129_v13, %v2128_v7  ;;  %v4245_v22 = vpop.f32.mrb[80].mxu1 }
 0x1ea   : > { %v1678_v25 = vadd.f32 %v4245_v22, %v5093_v15  ;;  %v1669_v29 = vpop.f32.mrb[81].mxu1 }
 0x1eb   : > { %v1670_v31 = vadd.f32 %v5093_v15, %v1669_v29  ;;  %v4246_v58 = vpop.f32.mrb[82].mxu1  ;;  %4383 = vmatprep.mubr.bf16.mxu0 %v2250_v17 }
 0x1ec   : > { %v1681_v61 = vadd.f32 %v4246_v58, %v5093_v15  ;;  %v1672_v24 = vpop.f32.mrb[83].mxu1  ;;  %4384 = vmatmul.mubr.bf16.gmra.mrb[76].mxu0 %v2251_v16  ;;  %v2134_v27 = vmax.f32 %v1678_v25, 0.0 }
 0x1ed   : > { %v1673_v6 = vadd.f32 %v5093_v15, %v1672_v24  ;;  %v2132_v34 = vmax.f32 %v1670_v31, 0.0 }
 0x1ee   : > { %v2135_v52 = vmax.f32 %v1681_v61, 0.0  ;;  %4352 = vmatmul.mubr.bf16.gmra.mrb[188].mxu1 %v5064_v32 }
 0x1ef   : > { %v2133_v55 = vmax.f32 %v1673_v6, 0.0 }
 0x1f0   : > { %v2253_v20 = vpack.c.bf16 %v2135_v52, %v2134_v27 }
 0x1f1   : > { %v2252_v23 = vpack.c.bf16 %v2133_v55, %v2132_v34  ;;  %v4249_v50 = vpop.f32.mrb[84].mxu1 }
 0x1f2   : > { %v1694_v54 = vadd.f32 %v4249_v50, %v5093_v15  ;;  %v1685_v21 = vpop.f32.mrb[85].mxu1 }
 0x1f3   : > { %v1686_v26 = vadd.f32 %v5093_v15, %v1685_v21  ;;  %v4250_v56 = vpop.f32.mrb[86].mxu1  ;;  %4387 = vmatprep.mubr.bf16.mxu0 %v2252_v23 }
 0x1f4   : > { %v1697_v60 = vadd.f32 %v4250_v56, %v5093_v15  ;;  %v1688_v30 = vpop.f32.mrb[87].mxu1  ;;  %4388 = vmatmul.mubr.bf16.gmra.mrb[80].mxu0 %v2253_v20  ;;  %v2138_v2 = vmax.f32 %v1694_v54, 0.0 }
 0x1f5   : > { %v1689_v33 = vadd.f32 %v5093_v15, %v1688_v30  ;;  %v2136_v5 = vmax.f32 %v1686_v26, 0.0 }
 0x1f6   : > { %v2139_v32 = vmax.f32 %v1697_v60, 0.0 }
 0x1f7   : > { %v2137_v40 = vmax.f32 %v1689_v33, 0.0 }
 0x1f8   : > { %v2255_v43 = vpack.c.bf16 %v2139_v32, %v2138_v2 }
 0x1f9   : > { %v2254_v14 = vpack.c.bf16 %v2137_v40, %v2136_v5  ;;  %v4253_v18 = vpop.f32.mrb[88].mxu1 }
 0x1fa   : > { %v1710_v59 = vadd.f32 %v4253_v18, %v5093_v15  ;;  %v1701_v0 = vpop.f32.mrb[89].mxu1 }
 0x1fb   : > { %v1702_v42 = vadd.f32 %v5093_v15, %v1701_v0  ;;  %v4254_v35 = vpop.f32.mrb[90].mxu1  ;;  %4391 = vmatprep.mubr.bf16.mxu0 %v2254_v14 }
 0x1fc   : > { %v1713_v36 = vadd.f32 %v4254_v35, %v5093_v15  ;;  %v1704_v37 = vpop.f32.mrb[91].mxu1  ;;  %4392 = vmatmul.mubr.bf16.gmra.mrb[84].mxu0 %v2255_v43  ;;  %v2142_v41 = vmax.f32 %v1710_v59, 0.0 }
 0x1fd   : > { %v1705_v39 = vadd.f32 %v5093_v15, %v1704_v37  ;;  %v2140_v45 = vmax.f32 %v1702_v42, 0.0 }
 0x1fe   : > { %v2143_v44 = vmax.f32 %v1713_v36, 0.0 }
 0x1ff   : > { %v2141_v46 = vmax.f32 %v1705_v39, 0.0 }
 0x200   : > { %v2257_v47 = vpack.c.bf16 %v2143_v44, %v2142_v41 }
 0x201   : > { %v2256_v48 = vpack.c.bf16 %v2141_v46, %v2140_v45  ;;  %v4257_v38 = vpop.f32.mrb[92].mxu1 }
 0x202   : > { %v1726_v49 = vadd.f32 %v4257_v38, %v5093_v15  ;;  %v1717_v51 = vpop.f32.mrb[93].mxu1 }
 0x203   : > { %v1718_v28 = vadd.f32 %v5093_v15, %v1717_v51  ;;  %v4258_v53 = vpop.f32.mrb[94].mxu1  ;;  %4395 = vmatprep.mubr.bf16.mxu0 %v2256_v48 }
 0x204   : > { %v1729_v57 = vadd.f32 %v4258_v53, %v5093_v15  ;;  %v1720_v62 = vpop.f32.mrb[95].mxu1  ;;  %4396 = vmatmul.mubr.bf16.gmra.mrb[88].mxu0 %v2257_v47  ;;  %v2146_v1 = vmax.f32 %v1726_v49, 0.0 }
 0x205   : > { %v1721_v63 = vadd.f32 %v5093_v15, %v1720_v62  ;;  %v2144_v4 = vmax.f32 %v1718_v28, 0.0 }
 0x206   : > { %v2147_v3 = vmax.f32 %v1729_v57, 0.0 }
 0x207   : > { %v2145_v8 = vmax.f32 %v1721_v63, 0.0 }
 0x208   : > { %v2259_v9 = vpack.c.bf16 %v2147_v3, %v2146_v1 }
 0x209   : > { %v2258_v10 = vpack.c.bf16 %v2145_v8, %v2144_v4  ;;  %v4261_v19 = vpop.f32.mrb[96].mxu1 }
 0x20a   : > { %v1742_v11 = vadd.f32 %v4261_v19, %v5093_v15  ;;  %v1733_v12 = vpop.f32.mrb[97].mxu1 }
 0x20b   : > { %v1734_v7 = vadd.f32 %v5093_v15, %v1733_v12  ;;  %v4262_v13 = vpop.f32.mrb[98].mxu1  ;;  %4399 = vmatprep.mubr.bf16.mxu0 %v2258_v10 }
 0x20c   : > { %v1745_v16 = vadd.f32 %v4262_v13, %v5093_v15  ;;  %v1736_v17 = vpop.f32.mrb[99].mxu1  ;;  %4400 = vmatmul.mubr.bf16.gmra.mrb[92].mxu0 %v2259_v9  ;;  %v2150_v25 = vmax.f32 %v1742_v11, 0.0 }
 0x20d   : > { %v1737_v22 = vadd.f32 %v5093_v15, %v1736_v17  ;;  %v2148_v31 = vmax.f32 %v1734_v7, 0.0 }
 0x20e   : > { %v2151_v29 = vmax.f32 %v1745_v16, 0.0 }
 0x20f   : > { %v2149_v58 = vmax.f32 %v1737_v22, 0.0 }
 0x210   : > { %v2261_v61 = vpack.c.bf16 %v2151_v29, %v2150_v25 }
 0x211   : > { %v2260_v24 = vpack.c.bf16 %v2149_v58, %v2148_v31  ;;  %v4265_v6 = vpop.f32.mrb[100].mxu1 }
 0x212   : > { %v1758_v27 = vadd.f32 %v4265_v6, %v5093_v15  ;;  %v1749_v52 = vpop.f32.mrb[101].mxu1 }
 0x213   : > { %v1750_v34 = vadd.f32 %v5093_v15, %v1749_v52  ;;  %v4266_v55 = vpop.f32.mrb[102].mxu1  ;;  %4403 = vmatprep.mubr.bf16.mxu0 %v2260_v24 }
 0x214   : > { %v1761_v20 = vadd.f32 %v4266_v55, %v5093_v15  ;;  %v1752_v23 = vpop.f32.mrb[103].mxu1  ;;  %4404 = vmatmul.mubr.bf16.gmra.mrb[96].mxu0 %v2261_v61  ;;  %v2154_v54 = vmax.f32 %v1758_v27, 0.0 }
 0x215   : > { %v1753_v50 = vadd.f32 %v5093_v15, %v1752_v23  ;;  %v2152_v26 = vmax.f32 %v1750_v34, 0.0 }
 0x216   : > { %v2155_v21 = vmax.f32 %v1761_v20, 0.0 }
 0x217   : > { %v2153_v56 = vmax.f32 %v1753_v50, 0.0 }
 0x218   : > { %v2263_v60 = vpack.c.bf16 %v2155_v21, %v2154_v54 }
 0x219   : > { %v2262_v30 = vpack.c.bf16 %v2153_v56, %v2152_v26  ;;  %v4269_v33 = vpop.f32.mrb[104].mxu1 }
 0x21a   : > { %v1774_v2 = vadd.f32 %v4269_v33, %v5093_v15  ;;  %v1765_v32 = vpop.f32.mrb[105].mxu1 }
 0x21b   : > { %v1766_v5 = vadd.f32 %v5093_v15, %v1765_v32  ;;  %v4270_v40 = vpop.f32.mrb[106].mxu1  ;;  %4407 = vmatprep.mubr.bf16.mxu0 %v2262_v30 }
 0x21c   : > { %v1777_v43 = vadd.f32 %v4270_v40, %v5093_v15  ;;  %v1768_v14 = vpop.f32.mrb[107].mxu1  ;;  %4408 = vmatmul.mubr.bf16.gmra.mrb[100].mxu0 %v2263_v60  ;;  %v2158_v59 = vmax.f32 %v1774_v2, 0.0 }
 0x21d   : > { %v1769_v18 = vadd.f32 %v5093_v15, %v1768_v14  ;;  %v2156_v42 = vmax.f32 %v1766_v5, 0.0 }
 0x21e   : > { %v2159_v0 = vmax.f32 %v1777_v43, 0.0 }
 0x21f   : > { %v2157_v35 = vmax.f32 %v1769_v18, 0.0 }
 0x220   : > { %v2265_v36 = vpack.c.bf16 %v2159_v0, %v2158_v59 }
 0x221   : > { %v2264_v37 = vpack.c.bf16 %v2157_v35, %v2156_v42  ;;  %v4273_v39 = vpop.f32.mrb[108].mxu1 }
 0x222   : > { %v1790_v41 = vadd.f32 %v4273_v39, %v5093_v15  ;;  %v1781_v44 = vpop.f32.mrb[109].mxu1 }
 0x223   : > { %v1782_v45 = vadd.f32 %v5093_v15, %v1781_v44  ;;  %v4274_v46 = vpop.f32.mrb[110].mxu1  ;;  %4411 = vmatprep.mubr.bf16.mxu0 %v2264_v37 }
 0x224   : > { %v1793_v47 = vadd.f32 %v4274_v46, %v5093_v15  ;;  %v1784_v48 = vpop.f32.mrb[111].mxu1  ;;  %4412 = vmatmul.mubr.bf16.gmra.mrb[104].mxu0 %v2265_v36  ;;  %v2162_v49 = vmax.f32 %v1790_v41, 0.0 }
 0x225   : > { %v1785_v38 = vadd.f32 %v5093_v15, %v1784_v48  ;;  %v2160_v28 = vmax.f32 %v1782_v45, 0.0 }
 0x226   : > { %v2163_v51 = vmax.f32 %v1793_v47, 0.0 }
 0x227   : > { %v2161_v53 = vmax.f32 %v1785_v38, 0.0 }
 0x228   : > { %v2267_v57 = vpack.c.bf16 %v2163_v51, %v2162_v49 }
 0x229   : > { %v2266_v62 = vpack.c.bf16 %v2161_v53, %v2160_v28  ;;  %v4277_v63 = vpop.f32.mrb[112].mxu1 }
 0x22a   : > { %v1806_v1 = vadd.f32 %v4277_v63, %v5093_v15  ;;  %v1797_v3 = vpop.f32.mrb[113].mxu1 }
 0x22b   : > { %v1798_v4 = vadd.f32 %v5093_v15, %v1797_v3  ;;  %v4278_v8 = vpop.f32.mrb[114].mxu1  ;;  %4415 = vmatprep.mubr.bf16.mxu0 %v2266_v62 }
 0x22c   : > { %v1809_v9 = vadd.f32 %v4278_v8, %v5093_v15  ;;  %v1800_v10 = vpop.f32.mrb[115].mxu1  ;;  %4416 = vmatmul.mubr.bf16.gmra.mrb[108].mxu0 %v2267_v57  ;;  %v2166_v11 = vmax.f32 %v1806_v1, 0.0 }
 0x22d   : > { %v1801_v19 = vadd.f32 %v5093_v15, %v1800_v10  ;;  %v2164_v7 = vmax.f32 %v1798_v4, 0.0 }
 0x22e   : > { %v2167_v12 = vmax.f32 %v1809_v9, 0.0 }
 0x22f   : > { %v2165_v13 = vmax.f32 %v1801_v19, 0.0 }
 0x230   : > { %v2269_v16 = vpack.c.bf16 %v2167_v12, %v2166_v11 }
 0x231   : > { %v2268_v17 = vpack.c.bf16 %v2165_v13, %v2164_v7  ;;  %v4281_v22 = vpop.f32.mrb[116].mxu1 }
 0x232   : > { %v1822_v25 = vadd.f32 %v4281_v22, %v5093_v15  ;;  %v1813_v29 = vpop.f32.mrb[117].mxu1 }
 0x233   : > { %v1814_v31 = vadd.f32 %v5093_v15, %v1813_v29  ;;  %v4282_v58 = vpop.f32.mrb[118].mxu1  ;;  %4419 = vmatprep.mubr.bf16.mxu0 %v2268_v17 }
 0x234   : > { %v1825_v61 = vadd.f32 %v4282_v58, %v5093_v15  ;;  %v1816_v24 = vpop.f32.mrb[119].mxu1  ;;  %4420 = vmatmul.mubr.bf16.gmra.mrb[112].mxu0 %v2269_v16  ;;  %v2170_v27 = vmax.f32 %v1822_v25, 0.0 }
 0x235   : > { %v1817_v6 = vadd.f32 %v5093_v15, %v1816_v24  ;;  %v2168_v34 = vmax.f32 %v1814_v31, 0.0 }
 0x236   : > { %v2171_v52 = vmax.f32 %v1825_v61, 0.0 }
 0x237   : > { %v2169_v55 = vmax.f32 %v1817_v6, 0.0 }
 0x238   : > { %v2271_v20 = vpack.c.bf16 %v2171_v52, %v2170_v27 }
 0x239   : > { %v2270_v23 = vpack.c.bf16 %v2169_v55, %v2168_v34  ;;  %v4285_v50 = vpop.f32.mrb[120].mxu1 }
 0x23a   : > { %v1838_v54 = vadd.f32 %v4285_v50, %v5093_v15  ;;  %v1829_v21 = vpop.f32.mrb[121].mxu1 }
 0x23b   : > { %v1830_v26 = vadd.f32 %v5093_v15, %v1829_v21  ;;  %v4286_v56 = vpop.f32.mrb[122].mxu1  ;;  %4423 = vmatprep.mubr.bf16.mxu0 %v2270_v23 }
 0x23c   : > { %v1841_v60 = vadd.f32 %v4286_v56, %v5093_v15  ;;  %v1832_v30 = vpop.f32.mrb[123].mxu1  ;;  %4424 = vmatmul.mubr.bf16.gmra.mrb[116].mxu0 %v2271_v20  ;;  %v2174_v2 = vmax.f32 %v1838_v54, 0.0 }
 0x23d   : > { %v1833_v33 = vadd.f32 %v5093_v15, %v1832_v30  ;;  %v2172_v5 = vmax.f32 %v1830_v26, 0.0 }
 0x23e   : > { %v2175_v32 = vmax.f32 %v1841_v60, 0.0 }
 0x23f   : > { %v2173_v40 = vmax.f32 %v1833_v33, 0.0 }
 0x240   : > { %v2273_v43 = vpack.c.bf16 %v2175_v32, %v2174_v2 }
 0x241   : > { %v2272_v14 = vpack.c.bf16 %v2173_v40, %v2172_v5  ;;  %v4289_v18 = vpop.f32.mrb[124].mxu1 }
 0x242   : > { %v1854_v59 = vadd.f32 %v4289_v18, %v5093_v15  ;;  %v1845_v0 = vpop.f32.mrb[125].mxu1 }
 0x243   : > { %v1846_v42 = vadd.f32 %v5093_v15, %v1845_v0  ;;  %v4290_v35 = vpop.f32.mrb[126].mxu1  ;;  %4427 = vmatprep.mubr.bf16.mxu0 %v2272_v14 }
 0x244   : > { %v1857_v36 = vadd.f32 %v4290_v35, %v5093_v15  ;;  %v1848_v37 = vpop.f32.mrb[127].mxu1  ;;  %4428 = vmatmul.mubr.bf16.gmra.mrb[120].mxu0 %v2273_v43  ;;  %v2178_v41 = vmax.f32 %v1854_v59, 0.0 }
 0x245   : > { %v1849_v39 = vadd.f32 %v5093_v15, %v1848_v37  ;;  %v2176_v45 = vmax.f32 %v1846_v42, 0.0 }
 0x246   : > { %v2179_v44 = vmax.f32 %v1857_v36, 0.0 }
 0x247   : > { %v2177_v46 = vmax.f32 %v1849_v39, 0.0 }
 0x248   : > { %v2275_v47 = vpack.c.bf16 %v2179_v44, %v2178_v41 }
 0x249   : > { %v2274_v48 = vpack.c.bf16 %v2177_v46, %v2176_v45  ;;  %v4293_v38 = vpop.f32.mrb[128].mxu1 }
 0x24a   : > { %v1870_v49 = vadd.f32 %v4293_v38, %v5093_v15  ;;  %v1861_v51 = vpop.f32.mrb[129].mxu1 }
 0x24b   : > { %v1862_v28 = vadd.f32 %v5093_v15, %v1861_v51  ;;  %v4294_v53 = vpop.f32.mrb[130].mxu1  ;;  %4431 = vmatprep.mubr.bf16.mxu0 %v2274_v48 }
 0x24c   : > { %v1873_v57 = vadd.f32 %v4294_v53, %v5093_v15  ;;  %v1864_v62 = vpop.f32.mrb[131].mxu1  ;;  %4432 = vmatmul.mubr.bf16.gmra.mrb[124].mxu0 %v2275_v47  ;;  %v2182_v1 = vmax.f32 %v1870_v49, 0.0 }
 0x24d   : > { %v1865_v63 = vadd.f32 %v5093_v15, %v1864_v62  ;;  %v2180_v4 = vmax.f32 %v1862_v28, 0.0 }
 0x24e   : > { %v2183_v3 = vmax.f32 %v1873_v57, 0.0 }
 0x24f   : > { %v2181_v8 = vmax.f32 %v1865_v63, 0.0 }
 0x250   : > { %v2277_v9 = vpack.c.bf16 %v2183_v3, %v2182_v1 }
 0x251   : > { %v2276_v10 = vpack.c.bf16 %v2181_v8, %v2180_v4  ;;  %v4297_v19 = vpop.f32.mrb[132].mxu1 }
 0x252   : > { %v1886_v11 = vadd.f32 %v4297_v19, %v5093_v15  ;;  %v1877_v12 = vpop.f32.mrb[133].mxu1 }
 0x253   : > { %v1878_v7 = vadd.f32 %v5093_v15, %v1877_v12  ;;  %v4298_v13 = vpop.f32.mrb[134].mxu1  ;;  %4435 = vmatprep.mubr.bf16.mxu0 %v2276_v10 }
 0x254   : > { %v1889_v16 = vadd.f32 %v4298_v13, %v5093_v15  ;;  %v1880_v17 = vpop.f32.mrb[135].mxu1  ;;  %4436 = vmatmul.mubr.bf16.gmra.mrb[128].mxu0 %v2277_v9  ;;  %v2186_v25 = vmax.f32 %v1886_v11, 0.0 }
 0x255   : > { %v1881_v22 = vadd.f32 %v5093_v15, %v1880_v17  ;;  %v2184_v31 = vmax.f32 %v1878_v7, 0.0 }
 0x256   : > { %v2187_v29 = vmax.f32 %v1889_v16, 0.0 }
 0x257   : > { %v2185_v58 = vmax.f32 %v1881_v22, 0.0 }
 0x258   : > { %v2279_v61 = vpack.c.bf16 %v2187_v29, %v2186_v25 }
 0x259   : > { %v2278_v24 = vpack.c.bf16 %v2185_v58, %v2184_v31  ;;  %v4301_v6 = vpop.f32.mrb[136].mxu1 }
 0x25a   : > { %v1902_v27 = vadd.f32 %v4301_v6, %v5093_v15  ;;  %v1893_v52 = vpop.f32.mrb[137].mxu1 }
 0x25b   : > { %v1894_v34 = vadd.f32 %v5093_v15, %v1893_v52  ;;  %v4302_v55 = vpop.f32.mrb[138].mxu1  ;;  %4439 = vmatprep.mubr.bf16.mxu0 %v2278_v24 }
 0x25c   : > { %v1905_v20 = vadd.f32 %v4302_v55, %v5093_v15  ;;  %v1896_v23 = vpop.f32.mrb[139].mxu1  ;;  %4440 = vmatmul.mubr.bf16.gmra.mrb[132].mxu0 %v2279_v61  ;;  %v2190_v54 = vmax.f32 %v1902_v27, 0.0 }
 0x25d   : > { %v1897_v50 = vadd.f32 %v5093_v15, %v1896_v23  ;;  %v2188_v26 = vmax.f32 %v1894_v34, 0.0 }
 0x25e   : > { %v2191_v21 = vmax.f32 %v1905_v20, 0.0 }
 0x25f   : > { %v2189_v56 = vmax.f32 %v1897_v50, 0.0 }
 0x260   : > { %v2281_v60 = vpack.c.bf16 %v2191_v21, %v2190_v54 }
 0x261   : > { %v2280_v30 = vpack.c.bf16 %v2189_v56, %v2188_v26  ;;  %v4305_v33 = vpop.f32.mrb[140].mxu1 }
 0x262   : > { %v1918_v2 = vadd.f32 %v4305_v33, %v5093_v15  ;;  %v1909_v32 = vpop.f32.mrb[141].mxu1 }
 0x263   : > { %v1910_v5 = vadd.f32 %v5093_v15, %v1909_v32  ;;  %v4306_v40 = vpop.f32.mrb[142].mxu1  ;;  %4443 = vmatprep.mubr.bf16.mxu0 %v2280_v30 }
 0x264   : > { %v1921_v43 = vadd.f32 %v4306_v40, %v5093_v15  ;;  %v1912_v14 = vpop.f32.mrb[143].mxu1  ;;  %4444 = vmatmul.mubr.bf16.gmra.mrb[136].mxu0 %v2281_v60  ;;  %v2194_v59 = vmax.f32 %v1918_v2, 0.0 }
 0x265   : > { %v1913_v18 = vadd.f32 %v5093_v15, %v1912_v14  ;;  %v2192_v42 = vmax.f32 %v1910_v5, 0.0 }
 0x266   : > { %v2195_v0 = vmax.f32 %v1921_v43, 0.0 }
 0x267   : > { %v2193_v35 = vmax.f32 %v1913_v18, 0.0 }
 0x268   : > { %v2283_v36 = vpack.c.bf16 %v2195_v0, %v2194_v59 }
 0x269   : > { %v2282_v37 = vpack.c.bf16 %v2193_v35, %v2192_v42  ;;  %v4309_v39 = vpop.f32.mrb[144].mxu1 }
 0x26a   : > { %v1934_v41 = vadd.f32 %v4309_v39, %v5093_v15  ;;  %v1925_v44 = vpop.f32.mrb[145].mxu1 }
 0x26b   : > { %v1926_v45 = vadd.f32 %v5093_v15, %v1925_v44  ;;  %v4310_v46 = vpop.f32.mrb[146].mxu1  ;;  %4447 = vmatprep.mubr.bf16.mxu0 %v2282_v37 }
 0x26c   : > { %v1937_v47 = vadd.f32 %v4310_v46, %v5093_v15  ;;  %v1928_v48 = vpop.f32.mrb[147].mxu1  ;;  %4448 = vmatmul.mubr.bf16.gmra.mrb[140].mxu0 %v2283_v36  ;;  %v2198_v49 = vmax.f32 %v1934_v41, 0.0 }
 0x26d   : > { %v1929_v38 = vadd.f32 %v5093_v15, %v1928_v48  ;;  %v2196_v28 = vmax.f32 %v1926_v45, 0.0 }
 0x26e   : > { %v2199_v51 = vmax.f32 %v1937_v47, 0.0 }
 0x26f   : > { %v2197_v53 = vmax.f32 %v1929_v38, 0.0 }
 0x270   : > { %v2285_v57 = vpack.c.bf16 %v2199_v51, %v2198_v49 }
 0x271   : > { %v2284_v62 = vpack.c.bf16 %v2197_v53, %v2196_v28  ;;  %v4313_v63 = vpop.f32.mrb[148].mxu1 }
 0x272   : > { %v1950_v1 = vadd.f32 %v4313_v63, %v5093_v15  ;;  %v1941_v3 = vpop.f32.mrb[149].mxu1 }
 0x273   : > { %v1942_v4 = vadd.f32 %v5093_v15, %v1941_v3  ;;  %v4314_v8 = vpop.f32.mrb[150].mxu1  ;;  %4451 = vmatprep.mubr.bf16.mxu0 %v2284_v62 }
 0x274   : > { %v1953_v9 = vadd.f32 %v4314_v8, %v5093_v15  ;;  %v1944_v10 = vpop.f32.mrb[151].mxu1  ;;  %4452 = vmatmul.mubr.bf16.gmra.mrb[144].mxu0 %v2285_v57  ;;  %v2202_v11 = vmax.f32 %v1950_v1, 0.0 }
 0x275   : > { %v1945_v19 = vadd.f32 %v5093_v15, %v1944_v10  ;;  %v2200_v7 = vmax.f32 %v1942_v4, 0.0 }
 0x276   : > { %v2203_v12 = vmax.f32 %v1953_v9, 0.0 }
 0x277   : > { %v2201_v13 = vmax.f32 %v1945_v19, 0.0 }
 0x278   : > { %v2287_v16 = vpack.c.bf16 %v2203_v12, %v2202_v11 }
 0x279   : > { %v2286_v17 = vpack.c.bf16 %v2201_v13, %v2200_v7  ;;  %v4317_v22 = vpop.f32.mrb[152].mxu1 }
 0x27a   : > { %v1966_v25 = vadd.f32 %v4317_v22, %v5093_v15  ;;  %v1957_v29 = vpop.f32.mrb[153].mxu1 }
 0x27b   : > { %v1958_v31 = vadd.f32 %v5093_v15, %v1957_v29  ;;  %v4318_v58 = vpop.f32.mrb[154].mxu1  ;;  %4455 = vmatprep.mubr.bf16.mxu0 %v2286_v17 }
 0x27c   : > { %v1969_v61 = vadd.f32 %v4318_v58, %v5093_v15  ;;  %v1960_v24 = vpop.f32.mrb[155].mxu1  ;;  %4456 = vmatmul.mubr.bf16.gmra.mrb[148].mxu0 %v2287_v16  ;;  %v2206_v27 = vmax.f32 %v1966_v25, 0.0 }
 0x27d   : > { %v1961_v6 = vadd.f32 %v5093_v15, %v1960_v24  ;;  %v2204_v34 = vmax.f32 %v1958_v31, 0.0 }
 0x27e   : > { %v2207_v52 = vmax.f32 %v1969_v61, 0.0 }
 0x27f   : > { %v2205_v55 = vmax.f32 %v1961_v6, 0.0 }
 0x280   : > { %v2289_v20 = vpack.c.bf16 %v2207_v52, %v2206_v27 }
 0x281   : > { %v2288_v23 = vpack.c.bf16 %v2205_v55, %v2204_v34  ;;  %v4321_v50 = vpop.f32.mrb[156].mxu1 }
 0x282   : > { %v1982_v54 = vadd.f32 %v4321_v50, %v5093_v15  ;;  %v1973_v21 = vpop.f32.mrb[157].mxu1 }
 0x283   : > { %v1974_v26 = vadd.f32 %v5093_v15, %v1973_v21  ;;  %v4322_v56 = vpop.f32.mrb[158].mxu1  ;;  %4459 = vmatprep.mubr.bf16.mxu0 %v2288_v23 }
 0x284   : > { %v1985_v60 = vadd.f32 %v4322_v56, %v5093_v15  ;;  %v1976_v30 = vpop.f32.mrb[159].mxu1  ;;  %4460 = vmatmul.mubr.bf16.gmra.mrb[152].mxu0 %v2289_v20  ;;  %v2210_v2 = vmax.f32 %v1982_v54, 0.0  ;;  %v5219_v54 = vld [vmem:[%s5917_s6] ss:$0 sm:$0xff] }
 0x285   : > { %v1977_v33 = vadd.f32 %v5093_v15, %v1976_v30  ;;  %v2208_v5 = vmax.f32 %v1974_v26, 0.0 }
 0x286   : > { %v2211_v32 = vmax.f32 %v1985_v60, 0.0 }
 0x287   : > { %v2209_v40 = vmax.f32 %v1977_v33, 0.0 }
 0x288   : > { %v2291_v43 = vpack.c.bf16 %v2211_v32, %v2210_v2 }
 0x289   : > { %v2290_v14 = vpack.c.bf16 %v2209_v40, %v2208_v5  ;;  %v4325_v18 = vpop.f32.mrb[160].mxu1 }
 0x28a   : > { %v1998_v59 = vadd.f32 %v4325_v18, %v5093_v15  ;;  %v1989_v0 = vpop.f32.mrb[161].mxu1  ;;  %v5226_v18 = vld [vmem:[%s5918_s7] ss:$0 sm:$0xff] }
 0x28b   : > { %v1990_v42 = vadd.f32 %v5093_v15, %v1989_v0  ;;  %v4326_v35 = vpop.f32.mrb[162].mxu1  ;;  %4463 = vmatprep.mubr.bf16.mxu0 %v2290_v14 }
 0x28c   : > { %v2001_v36 = vadd.f32 %v4326_v35, %v5093_v15  ;;  %v1992_v37 = vpop.f32.mrb[163].mxu1  ;;  %4464 = vmatmul.mubr.bf16.gmra.mrb[156].mxu0 %v2291_v43  ;;  %v2214_v41 = vmax.f32 %v1998_v59, 0.0 }
 0x28d   : > { %v1993_v39 = vadd.f32 %v5093_v15, %v1992_v37  ;;  %v2212_v45 = vmax.f32 %v1990_v42, 0.0 }
 0x28e   : > { %v2215_v44 = vmax.f32 %v2001_v36, 0.0 }
 0x28f   : > { %v2213_v46 = vmax.f32 %v1993_v39, 0.0 }
 0x290   : > { %v2293_v47 = vpack.c.bf16 %v2215_v44, %v2214_v41 }
 0x291   : > { %v2292_v48 = vpack.c.bf16 %v2213_v46, %v2212_v45  ;;  %v4329_v38 = vpop.f32.mrb[164].mxu1 }
 0x292   : > { %v2014_v49 = vadd.f32 %v4329_v38, %v5093_v15  ;;  %v2005_v51 = vpop.f32.mrb[165].mxu1 }
 0x293   : > { %v2006_v28 = vadd.f32 %v5093_v15, %v2005_v51  ;;  %v4330_v53 = vpop.f32.mrb[166].mxu1  ;;  %4467 = vmatprep.mubr.bf16.mxu0 %v2292_v48 }
 0x294   : > { %v2017_v57 = vadd.f32 %v4330_v53, %v5093_v15  ;;  %v2008_v62 = vpop.f32.mrb[167].mxu1  ;;  %4468 = vmatmul.mubr.bf16.gmra.mrb[160].mxu0 %v2293_v47  ;;  %v2218_v1 = vmax.f32 %v2014_v49, 0.0 }
 0x295   : > { %v2009_v63 = vadd.f32 %v5093_v15, %v2008_v62  ;;  %v2216_v4 = vmax.f32 %v2006_v28, 0.0 }
 0x296   : > { %v2219_v3 = vmax.f32 %v2017_v57, 0.0 }
 0x297   : > { %v2217_v8 = vmax.f32 %v2009_v63, 0.0 }
 0x298   : > { %v2295_v9 = vpack.c.bf16 %v2219_v3, %v2218_v1 }
 0x299   : > { %v2294_v10 = vpack.c.bf16 %v2217_v8, %v2216_v4  ;;  %v4333_v19 = vpop.f32.mrb[168].mxu1 }
 0x29a   : > { %v2030_v11 = vadd.f32 %v4333_v19, %v5093_v15  ;;  %v2021_v12 = vpop.f32.mrb[169].mxu1 }
 0x29b   : > { %v2022_v7 = vadd.f32 %v5093_v15, %v2021_v12  ;;  %v4334_v13 = vpop.f32.mrb[170].mxu1  ;;  %4471 = vmatprep.mubr.bf16.mxu0 %v2294_v10 }
 0x29c   : > { %v2033_v16 = vadd.f32 %v4334_v13, %v5093_v15  ;;  %v2024_v17 = vpop.f32.mrb[171].mxu1  ;;  %4472 = vmatmul.mubr.bf16.gmra.mrb[164].mxu0 %v2295_v9  ;;  %v2222_v25 = vmax.f32 %v2030_v11, 0.0 }
 0x29d   : > { %v2025_v22 = vadd.f32 %v5093_v15, %v2024_v17  ;;  %v2220_v31 = vmax.f32 %v2022_v7, 0.0 }
 0x29e   : > { %v2223_v29 = vmax.f32 %v2033_v16, 0.0 }
 0x29f   : > { %v2221_v58 = vmax.f32 %v2025_v22, 0.0 }
 0x2a0   : > { %v2297_v61 = vpack.c.bf16 %v2223_v29, %v2222_v25 }
 0x2a1   : > { %v2296_v24 = vpack.c.bf16 %v2221_v58, %v2220_v31  ;;  %v4337_v6 = vpop.f32.mrb[172].mxu1 }
 0x2a2   : > { %v2046_v27 = vadd.f32 %v4337_v6, %v5093_v15  ;;  %v2037_v52 = vpop.f32.mrb[173].mxu1 }
 0x2a3   : > { %v2038_v34 = vadd.f32 %v5093_v15, %v2037_v52  ;;  %v4338_v55 = vpop.f32.mrb[174].mxu1  ;;  %4475 = vmatprep.mubr.bf16.mxu0 %v2296_v24  ;;  %v5249_v52 = vld [vmem:[%s5915_s4] ss:$0 sm:$0xff] }
 0x2a4   : > { %v2049_v20 = vadd.f32 %v4338_v55, %v5093_v15  ;;  %v2040_v23 = vpop.f32.mrb[175].mxu1  ;;  %4476 = vmatmul.mubr.bf16.gmra.mrb[168].mxu0 %v2297_v61  ;;  %v2226_v21 = vmax.f32 %v2046_v27, 0.0 }
 0x2a5   : > { %v2041_v50 = vadd.f32 %v5093_v15, %v2040_v23  ;;  %v2224_v56 = vmax.f32 %v2038_v34, 0.0 }
 0x2a6   : > { %v2227_v26 = vmax.f32 %v2049_v20, 0.0 }
 0x2a7   : > { %v2225_v60 = vmax.f32 %v2041_v50, 0.0  ;;  %v4373_v30 = vpop.f32.mrb[64].mxu0 }
 0x2a8   : > { %v2299_v33 = vpack.c.bf16 %v2227_v26, %v2226_v21  ;;  %v2422_v2 = vadd.f32 %v4373_v30, %v5219_v54  ;;  %v2413_v32 = vpop.f32.mrb[65].mxu0 }
 0x2a9   : > { %v2298_v5 = vpack.c.bf16 %v2225_v60, %v2224_v56  ;;  %v2414_v40 = vadd.f32 %v5219_v54, %v2413_v32  ;;  %v4341_v43 = vpop.f32.mrb[176].mxu1  ;;  %v4374_v14 = vpop.f32.mrb[66].mxu0 }
 0x2aa   : > { %v2926_v59 = vmax.f32 %v2422_v2, 0.0  ;;  %v2062_v0 = vadd.f32 %v4341_v43, %v5093_v15  ;;  %v2425_v42 = vadd.f32 %v4374_v14, %v5219_v54  ;;  %v2053_v35 = vpop.f32.mrb[177].mxu1  ;;  %v2416_v36 = vpop.f32.mrb[67].mxu0 }
 0x2ab   : > { %v2924_v37 = vmax.f32 %v2414_v40, 0.0  ;;  %v2054_v39 = vadd.f32 %v5093_v15, %v2053_v35  ;;  %v2417_v41 = vadd.f32 %v5219_v54, %v2416_v36  ;;  %v4342_v44 = vpop.f32.mrb[178].mxu1  ;;  %4479 = vmatprep.mubr.bf16.mxu0 %v2298_v5 }
 0x2ac   : > { %v2927_v45 = vmax.f32 %v2425_v42, 0.0  ;;  %v2065_v46 = vadd.f32 %v4342_v44, %v5093_v15  ;;  %v2056_v47 = vpop.f32.mrb[179].mxu1  ;;  %4480 = vmatmul.mubr.bf16.gmra.mrb[172].mxu0 %v2299_v33  ;;  %v3061_v48 = vmul.f32 %v5226_v18, %v2926_v59  ;;  %v2230_v28 = vmax.f32 %v2062_v0, 0.0 }
 0x2ad   : > { %v2925_v38 = vmax.f32 %v2417_v41, 0.0  ;;  %v2057_v49 = vadd.f32 %v5093_v15, %v2056_v47  ;;  %v3059_v51 = vmul.f32 %v5226_v18, %v2924_v37  ;;  %v2228_v57 = vmax.f32 %v2054_v39, 0.0 }
 0x2ae   : > { %v2231_v53 = vmax.f32 %v2065_v46, 0.0  ;;  %3191 = vadd.xlane.f32.xlu1 %v3061_v48  ;;  %v3062_v8 = vmul.f32 %v5226_v18, %v2927_v45 }
 0x2af   : > { %v2229_v62 = vmax.f32 %v2057_v49, 0.0  ;;  %v4377_v63 = vpop.f32.mrb[68].mxu0  ;;  %3187 = vadd.xlane.f32.xlu0 %v3059_v51  ;;  %v3060_v12 = vmul.f32 %v5226_v18, %v2925_v38 }
 0x2b0   : > { %v2301_v1 = vpack.c.bf16 %v2231_v53, %v2230_v28  ;;  %v2438_v3 = vadd.f32 %v4377_v63, %v5219_v54  ;;  %v2429_v4 = vpop.f32.mrb[69].mxu0 }
 0x2b1   : > { %v2300_v9 = vpack.c.bf16 %v2229_v62, %v2228_v57  ;;  %v2430_v10 = vadd.f32 %v5219_v54, %v2429_v4  ;;  %v4345_v19 = vpop.f32.mrb[180].mxu1  ;;  %v4378_v11 = vpop.f32.mrb[70].mxu0 }
 0x2b2   : > { %v2930_v7 = vmax.f32 %v2438_v3, 0.0  ;;  %v2078_v13 = vadd.f32 %v4345_v19, %v5093_v15  ;;  %v2441_v16 = vadd.f32 %v4378_v11, %v5219_v54  ;;  %v2069_v17 = vpop.f32.mrb[181].mxu1  ;;  %3193 = vadd.xlane.f32.xlu1 %v3062_v8  ;;  %v2432_v22 = vpop.f32.mrb[71].mxu0 }
 0x2b3   : > { %v2070_v25 = vadd.f32 %v5093_v15, %v2069_v17  ;;  %v2433_v29 = vadd.f32 %v5219_v54, %v2432_v22  ;;  %v4346_v31 = vpop.f32.mrb[182].mxu1  ;;  %4483 = vmatprep.mubr.bf16.mxu0 %v2300_v9  ;;  %3189 = vadd.xlane.f32.xlu0 %v3060_v12  ;;  %v2928_v27 = vmax.f32 %v2430_v10, 0.0 }
 0x2b4   : > { %v2931_v58 = vmax.f32 %v2441_v16, 0.0  ;;  %v2081_v61 = vadd.f32 %v4346_v31, %v5093_v15  ;;  %v2072_v24 = vpop.f32.mrb[183].mxu1  ;;  %4484 = vmatmul.mubr.bf16.gmra.mrb[176].mxu0 %v2301_v1  ;;  %v3065_v6 = vmul.f32 %v5226_v18, %v2930_v7  ;;  %v2234_v55 = vmax.f32 %v2078_v13, 0.0 }
 0x2b5   : > { %v2073_v34 = vadd.f32 %v5249_v52, %v2072_v24  ;;  %v2929_v20 = vmax.f32 %v2433_v29, 0.0  ;;  %v2232_v21 = vmax.f32 %v2070_v25, 0.0  ;;  %v3063_v40 = vmul.f32 %v5226_v18, %v2928_v27 }
 0x2b6   : > { %v2235_v23 = vmax.f32 %v2081_v61, 0.0  ;;  %v3066_v50 = vmul.f32 %v5226_v18, %v2931_v58 }
 0x2b7   : > { %v2233_v26 = vmax.f32 %v2073_v34, 0.0  ;;  %v4381_v15 = vpop.f32.mrb[72].mxu0  ;;  %3199 = vadd.xlane.f32.xlu0 %v3065_v6  ;;  %v3064_v35 = vmul.f32 %v5226_v18, %v2929_v20 }
 0x2b8   : > { %v2303_v56 = vpack.c.bf16 %v2235_v23, %v2234_v55  ;;  %v2454_v60 = vadd.f32 %v4381_v15, %v5219_v54  ;;  %3201 = vadd.xlane.f32.xlu1 %v3066_v50  ;;  %v2445_v30 = vpop.f32.mrb[73].mxu0 }
 0x2b9   : > { %v2302_v33 = vpack.c.bf16 %v2233_v26, %v2232_v21  ;;  %v2446_v2 = vadd.f32 %v5219_v54, %v2445_v30  ;;  %v4349_v32 = vpop.f32.mrb[184].mxu1  ;;  %v4382_v5 = vpop.f32.mrb[74].mxu0 }
 0x2ba   : > { %v2934_v43 = vmax.f32 %v2454_v60, 0.0  ;;  %v2094_v14 = vadd.f32 %v5249_v52, %v4349_v32  ;;  %v2457_v59 = vadd.f32 %v4382_v5, %v5219_v54  ;;  %v2085_v0 = vpop.f32.mrb[185].mxu1  ;;  %v2448_v42 = vpop.f32.mrb[75].mxu0 }
 0x2bb   : > { %v2086_v36 = vadd.f32 %v5249_v52, %v2085_v0  ;;  %v2449_v37 = vadd.f32 %v5219_v54, %v2448_v42  ;;  %v4350_v39 = vpop.f32.mrb[186].mxu1  ;;  %4487 = vmatprep.mubr.bf16.mxu0 %v2302_v33  ;;  %3195 = vadd.xlane.f32.xlu0 %v3063_v40  ;;  %v2932_v47 = vmax.f32 %v2446_v2, 0.0 }
 0x2bc   : > { %v2935_v41 = vmax.f32 %v2457_v59, 0.0  ;;  %v2097_v44 = vadd.f32 %v5249_v52, %v4350_v39  ;;  %v2088_v45 = vpop.f32.mrb[187].mxu1  ;;  %4488 = vmatmul.mubr.bf16.gmra.mrb[180].mxu0 %v2303_v56  ;;  %3197 = vadd.xlane.f32.xlu1 %v3064_v35  ;;  %v3069_v46 = vmul.f32 %v5226_v18, %v2934_v43  ;;  %v2238_v38 = vmax.f32 %v2094_v14, 0.0 }
 0x2bd   : > { %v2089_v48 = vadd.f32 %v5249_v52, %v2088_v45  ;;  %v2933_v49 = vmax.f32 %v2449_v37, 0.0  ;;  %v2236_v53 = vmax.f32 %v2086_v36, 0.0  ;;  %v3067_v19 = vmul.f32 %v5226_v18, %v2932_v47 }
 0x2be   : > { %v2239_v51 = vmax.f32 %v2097_v44, 0.0  ;;  %v3070_v28 = vmul.f32 %v5226_v18, %v2935_v41 }
 0x2bf   : > { %v2237_v57 = vmax.f32 %v2089_v48, 0.0  ;;  %v4385_v62 = vpop.f32.mrb[76].mxu0  ;;  %3207 = vadd.xlane.f32.xlu0 %v3069_v46  ;;  %v3068_v17 = vmul.f32 %v5226_v18, %v2933_v49 }
 0x2c0   : > { %v2305_v63 = vpack.c.bf16 %v2239_v51, %v2238_v38  ;;  %v2470_v1 = vadd.f32 %v4385_v62, %v5219_v54  ;;  %v2461_v3 = vpop.f32.mrb[77].mxu0  ;;  %3209 = vadd.xlane.f32.xlu1 %v3070_v28 }
 0x2c1   : > { %v2304_v4 = vpack.c.bf16 %v2237_v57, %v2236_v53  ;;  %v2462_v8 = vadd.f32 %v5219_v54, %v2461_v3  ;;  %v4353_v9 = vpop.f32.mrb[188].mxu1  ;;  %v4386_v10 = vpop.f32.mrb[78].mxu0 }
 0x2c2   : > { %v2938_v11 = vmax.f32 %v2470_v1, 0.0  ;;  %v2110_v12 = vadd.f32 %v5249_v52, %v4353_v9  ;;  %v2473_v7 = vadd.f32 %v4386_v10, %v5219_v54  ;;  %v2101_v13 = vpop.f32.mrb[189].mxu1  ;;  %v2464_v16 = vpop.f32.mrb[79].mxu0 }
 0x2c3   : > { %v2102_v22 = vadd.f32 %v5249_v52, %v2101_v13  ;;  %v2465_v25 = vadd.f32 %v5219_v54, %v2464_v16  ;;  %v4354_v29 = vpop.f32.mrb[190].mxu1  ;;  %4491 = vmatprep.mubr.bf16.mxu0 %v2304_v4  ;;  %3203 = vadd.xlane.f32.xlu0 %v3067_v19  ;;  %v2936_v6 = vmax.f32 %v2462_v8, 0.0 }
 0x2c4   : > { %v2939_v31 = vmax.f32 %v2473_v7, 0.0  ;;  %v2113_v58 = vadd.f32 %v5249_v52, %v4354_v29  ;;  %v2104_v61 = vpop.f32.mrb[191].mxu1  ;;  %4492 = vmatmul.mubr.bf16.gmra.mrb[184].mxu0 %v2305_v63  ;;  %3205 = vadd.xlane.f32.xlu1 %v3068_v17  ;;  %v3073_v24 = vmul.f32 %v5226_v18, %v2938_v11  ;;  %v2242_v34 = vmax.f32 %v2110_v12, 0.0 }
 0x2c5   : > { %v2105_v27 = vadd.f32 %v5249_v52, %v2104_v61  ;;  %v2937_v55 = vmax.f32 %v2465_v25, 0.0  ;;  %v2240_v50 = vmax.f32 %v2102_v22, 0.0  ;;  %v3071_v52 = vmul.f32 %v5226_v18, %v2936_v6 }
 0x2c6   : > { %v2243_v20 = vmax.f32 %v2113_v58, 0.0  ;;  %v3074_v23 = vmul.f32 %v5226_v18, %v2939_v31 }
 0x2c7   : > { %v2241_v21 = vmax.f32 %v2105_v27, 0.0  ;;  %v4389_v26 = vpop.f32.mrb[80].mxu0  ;;  %3215 = vadd.xlane.f32.xlu0 %v3073_v24  ;;  %v3072_v43 = vmul.f32 %v5226_v18, %v2937_v55 }
 0x2c8   : > { %v2307_v15 = vpack.c.bf16 %v2243_v20, %v2242_v34  ;;  %v2486_v56 = vadd.f32 %v4389_v26, %v5219_v54  ;;  %v2477_v60 = vpop.f32.mrb[81].mxu0  ;;  %3217 = vadd.xlane.f32.xlu1 %v3074_v23 }
 0x2c9   : > { %v2306_v30 = vpack.c.bf16 %v2241_v21, %v2240_v50  ;;  %v2478_v33 = vadd.f32 %v5219_v54, %v2477_v60  ;;  %v4390_v2 = vpop.f32.mrb[82].mxu0 }
 0x2ca   : > { %v2942_v32 = vmax.f32 %v2486_v56, 0.0  ;;  %v2489_v5 = vadd.f32 %v4390_v2, %v5219_v54  ;;  %v2480_v40 = vpop.f32.mrb[83].mxu0 }
 0x2cb   : > { %v2481_v14 = vadd.f32 %v5219_v54, %v2480_v40  ;;  %4495 = vmatprep.mubr.bf16.mxu0 %v2306_v30  ;;  %3211 = vadd.xlane.f32.xlu0 %v3071_v52  ;;  %v2940_v42 = vmax.f32 %v2478_v33, 0.0 }
 0x2cc   : > { %v2943_v59 = vmax.f32 %v2489_v5, 0.0  ;;  %4496 = vmatmul.mubr.bf16.gmra.mrb[188].mxu0 %v2307_v15  ;;  %3213 = vadd.xlane.f32.xlu1 %v3072_v43  ;;  %v3077_v0 = vmul.f32 %v5226_v18, %v2942_v32 }
 0x2cd   : > { %v2941_v35 = vmax.f32 %v2481_v14, 0.0  ;;  %v3075_v46 = vmul.f32 %v5226_v18, %v2940_v42 }
 0x2ce   : > { %v3078_v36 = vmul.f32 %v5226_v18, %v2943_v59 }
 0x2cf   : > { %v4393_v37 = vpop.f32.mrb[84].mxu0  ;;  %3223 = vadd.xlane.f32.xlu0 %v3077_v0  ;;  %v3076_v49 = vmul.f32 %v5226_v18, %v2941_v35 }
 0x2d0   : > { %v2502_v39 = vadd.f32 %v4393_v37, %v5219_v54  ;;  %v2493_v41 = vpop.f32.mrb[85].mxu0  ;;  %3225 = vadd.xlane.f32.xlu1 %v3078_v36 }
 0x2d1   : > { %v2494_v44 = vadd.f32 %v5219_v54, %v2493_v41  ;;  %v4394_v45 = vpop.f32.mrb[86].mxu0 }
 0x2d2   : > { %v2946_v47 = vmax.f32 %v2502_v39, 0.0  ;;  %v2505_v48 = vadd.f32 %v4394_v45, %v5219_v54  ;;  %v2496_v38 = vpop.f32.mrb[87].mxu0 }
 0x2d3   : > { %v2497_v51 = vadd.f32 %v5219_v54, %v2496_v38  ;;  %3219 = vadd.xlane.f32.xlu0 %v3075_v46  ;;  %v2944_v57 = vmax.f32 %v2494_v44, 0.0 }
 0x2d4   : > { %v2947_v28 = vmax.f32 %v2505_v48, 0.0  ;;  %3221 = vadd.xlane.f32.xlu1 %v3076_v49  ;;  %v3081_v53 = vmul.f32 %v5226_v18, %v2946_v47 }
 0x2d5   : > { %v2945_v62 = vmax.f32 %v2497_v51, 0.0  ;;  %v3079_v10 = vmul.f32 %v5226_v18, %v2944_v57 }
 0x2d6   : > { %v3082_v63 = vmul.f32 %v5226_v18, %v2947_v28 }
 0x2d7   : > { %v4397_v1 = vpop.f32.mrb[88].mxu0  ;;  %3231 = vadd.xlane.f32.xlu0 %v3081_v53  ;;  %v3080_v7 = vmul.f32 %v5226_v18, %v2945_v62 }
 0x2d8   : > { %v2518_v3 = vadd.f32 %v4397_v1, %v5219_v54  ;;  %v2509_v4 = vpop.f32.mrb[89].mxu0  ;;  %3233 = vadd.xlane.f32.xlu1 %v3082_v63 }
 0x2d9   : > { %v2510_v8 = vadd.f32 %v5219_v54, %v2509_v4  ;;  %v4398_v9 = vpop.f32.mrb[90].mxu0 }
 0x2da   : > { %v2950_v19 = vmax.f32 %v2518_v3, 0.0  ;;  %v2521_v11 = vadd.f32 %v4398_v9, %v5219_v54  ;;  %v2512_v12 = vpop.f32.mrb[91].mxu0 }
 0x2db   : > { %v2513_v13 = vadd.f32 %v5219_v54, %v2512_v12  ;;  %3227 = vadd.xlane.f32.xlu0 %v3079_v10  ;;  %v2948_v22 = vmax.f32 %v2510_v8, 0.0 }
 0x2dc   : > { %v2951_v16 = vmax.f32 %v2521_v11, 0.0  ;;  %3229 = vadd.xlane.f32.xlu1 %v3080_v7  ;;  %v3085_v17 = vmul.f32 %v5226_v18, %v2950_v19 }
 0x2dd   : > { %v2949_v25 = vmax.f32 %v2513_v13, 0.0  ;;  %v3083_v27 = vmul.f32 %v5226_v18, %v2948_v22 }
 0x2de   : > { %v3086_v29 = vmul.f32 %v5226_v18, %v2951_v16 }
 0x2df   : > { %v4401_v31 = vpop.f32.mrb[92].mxu0  ;;  %3239 = vadd.xlane.f32.xlu0 %v3085_v17  ;;  %v3084_v23 = vmul.f32 %v5226_v18, %v2949_v25 }
 0x2e0   : > { %v2534_v58 = vadd.f32 %v4401_v31, %v5219_v54  ;;  %v2525_v61 = vpop.f32.mrb[93].mxu0  ;;  %3241 = vadd.xlane.f32.xlu1 %v3086_v29 }
 0x2e1   : > { %v2526_v24 = vadd.f32 %v5219_v54, %v2525_v61  ;;  %v4402_v6 = vpop.f32.mrb[94].mxu0 }
 0x2e2   : > { %v2954_v34 = vmax.f32 %v2534_v58, 0.0  ;;  %v2537_v55 = vadd.f32 %v4402_v6, %v5219_v54  ;;  %v2528_v20 = vpop.f32.mrb[95].mxu0 }
 0x2e3   : > { %v2529_v50 = vadd.f32 %v5219_v54, %v2528_v20  ;;  %3235 = vadd.xlane.f32.xlu0 %v3083_v27  ;;  %v2952_v15 = vmax.f32 %v2526_v24, 0.0 }
 0x2e4   : > { %v2955_v21 = vmax.f32 %v2537_v55, 0.0  ;;  %3237 = vadd.xlane.f32.xlu1 %v3084_v23  ;;  %v3089_v26 = vmul.f32 %v5226_v18, %v2954_v34 }
 0x2e5   : > { %v2953_v56 = vmax.f32 %v2529_v50, 0.0  ;;  %v3087_v5 = vmul.f32 %v5226_v18, %v2952_v15 }
 0x2e6   : > { %v3090_v60 = vmul.f32 %v5226_v18, %v2955_v21 }
 0x2e7   : > { %v4405_v30 = vpop.f32.mrb[96].mxu0  ;;  %3247 = vadd.xlane.f32.xlu0 %v3089_v26  ;;  %v3088_v59 = vmul.f32 %v5226_v18, %v2953_v56 }
 0x2e8   : > { %v2550_v33 = vadd.f32 %v4405_v30, %v5219_v54  ;;  %v2541_v2 = vpop.f32.mrb[97].mxu0  ;;  %3249 = vadd.xlane.f32.xlu1 %v3090_v60 }
 0x2e9   : > { %v2542_v52 = vadd.f32 %v5219_v54, %v2541_v2  ;;  %v4406_v32 = vpop.f32.mrb[98].mxu0 }
 0x2ea   : > { %v2958_v40 = vmax.f32 %v2550_v33, 0.0  ;;  %v2553_v43 = vadd.f32 %v4406_v32, %v5219_v54  ;;  %v2544_v14 = vpop.f32.mrb[99].mxu0 }
 0x2eb   : > { %v2545_v0 = vadd.f32 %v5219_v54, %v2544_v14  ;;  %3243 = vadd.xlane.f32.xlu0 %v3087_v5  ;;  %v2956_v36 = vmax.f32 %v2542_v52, 0.0 }
 0x2ec   : > { %v2959_v42 = vmax.f32 %v2553_v43, 0.0  ;;  %3245 = vadd.xlane.f32.xlu1 %v3088_v59  ;;  %v3093_v35 = vmul.f32 %v5226_v18, %v2958_v40 }
 0x2ed   : > { %v2957_v37 = vmax.f32 %v2545_v0, 0.0  ;;  %v3091_v48 = vmul.f32 %v5226_v18, %v2956_v36 }
 0x2ee   : > { %v3094_v39 = vmul.f32 %v5226_v18, %v2959_v42 }
 0x2ef   : > { %v4409_v41 = vpop.f32.mrb[100].mxu0  ;;  %3255 = vadd.xlane.f32.xlu0 %v3093_v35  ;;  %v3092_v28 = vmul.f32 %v5226_v18, %v2957_v37 }
 0x2f0   : > { %v2566_v44 = vadd.f32 %v4409_v41, %v5219_v54  ;;  %v2557_v45 = vpop.f32.mrb[101].mxu0  ;;  %3257 = vadd.xlane.f32.xlu1 %v3094_v39 }
 0x2f1   : > { %v2558_v46 = vadd.f32 %v5219_v54, %v2557_v45  ;;  %v4410_v47 = vpop.f32.mrb[102].mxu0 }
 0x2f2   : > { %v2962_v38 = vmax.f32 %v2566_v44, 0.0  ;;  %v2569_v49 = vadd.f32 %v4410_v47, %v5219_v54  ;;  %v2560_v51 = vpop.f32.mrb[103].mxu0 }
 0x2f3   : > { %v2561_v53 = vadd.f32 %v5219_v54, %v2560_v51  ;;  %3251 = vadd.xlane.f32.xlu0 %v3091_v48  ;;  %v2960_v63 = vmax.f32 %v2558_v46, 0.0 }
 0x2f4   : > { %v2963_v57 = vmax.f32 %v2569_v49, 0.0  ;;  %3253 = vadd.xlane.f32.xlu1 %v3092_v28  ;;  %v3097_v62 = vmul.f32 %v5226_v18, %v2962_v38 }
 0x2f5   : > { %v2961_v1 = vmax.f32 %v2561_v53, 0.0  ;;  %v3095_v11 = vmul.f32 %v5226_v18, %v2960_v63 }
 0x2f6   : > { %v3098_v3 = vmul.f32 %v5226_v18, %v2963_v57 }
 0x2f7   : > { %v4413_v4 = vpop.f32.mrb[104].mxu0  ;;  %3263 = vadd.xlane.f32.xlu0 %v3097_v62  ;;  %v3096_v16 = vmul.f32 %v5226_v18, %v2961_v1 }
 0x2f8   : > { %v2582_v8 = vadd.f32 %v4413_v4, %v5219_v54  ;;  %v2573_v9 = vpop.f32.mrb[105].mxu0  ;;  %3265 = vadd.xlane.f32.xlu1 %v3098_v3 }
 0x2f9   : > { %v2574_v10 = vadd.f32 %v5219_v54, %v2573_v9  ;;  %v4414_v19 = vpop.f32.mrb[106].mxu0 }
 0x2fa   : > { %v2966_v12 = vmax.f32 %v2582_v8, 0.0  ;;  %v2585_v7 = vadd.f32 %v4414_v19, %v5219_v54  ;;  %v2576_v13 = vpop.f32.mrb[107].mxu0 }
 0x2fb   : > { %v2577_v17 = vadd.f32 %v5219_v54, %v2576_v13  ;;  %3259 = vadd.xlane.f32.xlu0 %v3095_v11  ;;  %v2964_v29 = vmax.f32 %v2574_v10, 0.0 }
 0x2fc   : > { %v2967_v22 = vmax.f32 %v2585_v7, 0.0  ;;  %3261 = vadd.xlane.f32.xlu1 %v3096_v16  ;;  %v3101_v25 = vmul.f32 %v5226_v18, %v2966_v12 }
 0x2fd   : > { %v2965_v31 = vmax.f32 %v2577_v17, 0.0  ;;  %v3099_v55 = vmul.f32 %v5226_v18, %v2964_v29 }
 0x2fe   : > { %v3102_v58 = vmul.f32 %v5226_v18, %v2967_v22 }
 0x2ff   : > { %v4417_v61 = vpop.f32.mrb[108].mxu0  ;;  %3271 = vadd.xlane.f32.xlu0 %v3101_v25  ;;  %v3100_v21 = vmul.f32 %v5226_v18, %v2965_v31 }
 0x300   : > { %v2598_v24 = vadd.f32 %v4417_v61, %v5219_v54  ;;  %v2589_v6 = vpop.f32.mrb[109].mxu0  ;;  %3273 = vadd.xlane.f32.xlu1 %v3102_v58 }
 0x301   : > { %v2590_v27 = vadd.f32 %v5219_v54, %v2589_v6  ;;  %v4418_v34 = vpop.f32.mrb[110].mxu0 }
 0x302   : > { %v2970_v20 = vmax.f32 %v2598_v24, 0.0  ;;  %v2601_v23 = vadd.f32 %v4418_v34, %v5219_v54  ;;  %v2592_v50 = vpop.f32.mrb[111].mxu0 }
 0x303   : > { %v2593_v26 = vadd.f32 %v5219_v54, %v2592_v50  ;;  %3267 = vadd.xlane.f32.xlu0 %v3099_v55  ;;  %v2968_v60 = vmax.f32 %v2590_v27, 0.0 }
 0x304   : > { %v2971_v15 = vmax.f32 %v2601_v23, 0.0  ;;  %3269 = vadd.xlane.f32.xlu1 %v3100_v21  ;;  %v3105_v56 = vmul.f32 %v5226_v18, %v2970_v20 }
 0x305   : > { %v2969_v30 = vmax.f32 %v2593_v26, 0.0  ;;  %v3103_v43 = vmul.f32 %v5226_v18, %v2968_v60 }
 0x306   : > { %v3106_v33 = vmul.f32 %v5226_v18, %v2971_v15 }
 0x307   : > { %v4421_v2 = vpop.f32.mrb[112].mxu0  ;;  %3279 = vadd.xlane.f32.xlu0 %v3105_v56  ;;  %v3104_v42 = vmul.f32 %v5226_v18, %v2969_v30 }
 0x308   : > { %v2614_v52 = vadd.f32 %v4421_v2, %v5219_v54  ;;  %v2605_v32 = vpop.f32.mrb[113].mxu0  ;;  %3281 = vadd.xlane.f32.xlu1 %v3106_v33 }
 0x309   : > { %v2606_v5 = vadd.f32 %v5219_v54, %v2605_v32  ;;  %v4422_v40 = vpop.f32.mrb[114].mxu0 }
 0x30a   : > { %v2974_v14 = vmax.f32 %v2614_v52, 0.0  ;;  %v2617_v59 = vadd.f32 %v4422_v40, %v5219_v54  ;;  %v2608_v0 = vpop.f32.mrb[115].mxu0 }
 0x30b   : > { %v2609_v35 = vadd.f32 %v5219_v54, %v2608_v0  ;;  %3275 = vadd.xlane.f32.xlu0 %v3103_v43  ;;  %v2972_v39 = vmax.f32 %v2606_v5, 0.0 }
 0x30c   : > { %v2975_v36 = vmax.f32 %v2617_v59, 0.0  ;;  %3277 = vadd.xlane.f32.xlu1 %v3104_v42  ;;  %v3109_v37 = vmul.f32 %v5226_v18, %v2974_v14 }
 0x30d   : > { %v2973_v41 = vmax.f32 %v2609_v35, 0.0  ;;  %v3107_v49 = vmul.f32 %v5226_v18, %v2972_v39 }
 0x30e   : > { %v3110_v44 = vmul.f32 %v5226_v18, %v2975_v36 }
 0x30f   : > { %v4425_v45 = vpop.f32.mrb[116].mxu0  ;;  %3287 = vadd.xlane.f32.xlu0 %v3109_v37  ;;  %v3108_v57 = vmul.f32 %v5226_v18, %v2973_v41 }
 0x310   : > { %v2630_v46 = vadd.f32 %v4425_v45, %v5219_v54  ;;  %v2621_v47 = vpop.f32.mrb[117].mxu0  ;;  %3289 = vadd.xlane.f32.xlu1 %v3110_v44 }
 0x311   : > { %v2622_v48 = vadd.f32 %v5219_v54, %v2621_v47  ;;  %v4426_v38 = vpop.f32.mrb[118].mxu0 }
 0x312   : > { %v2978_v51 = vmax.f32 %v2630_v46, 0.0  ;;  %v2633_v28 = vadd.f32 %v4426_v38, %v5219_v54  ;;  %v2624_v53 = vpop.f32.mrb[119].mxu0 }
 0x313   : > { %v2625_v62 = vadd.f32 %v5219_v54, %v2624_v53  ;;  %3283 = vadd.xlane.f32.xlu0 %v3107_v49  ;;  %v2976_v3 = vmax.f32 %v2622_v48, 0.0 }
 0x314   : > { %v2979_v63 = vmax.f32 %v2633_v28, 0.0  ;;  %3285 = vadd.xlane.f32.xlu1 %v3108_v57  ;;  %v3113_v1 = vmul.f32 %v5226_v18, %v2978_v51 }
 0x315   : > { %v2977_v4 = vmax.f32 %v2625_v62, 0.0  ;;  %v3111_v7 = vmul.f32 %v5226_v18, %v2976_v3 }
 0x316   : > { %v3114_v8 = vmul.f32 %v5226_v18, %v2979_v63 }
 0x317   : > { %v4429_v9 = vpop.f32.mrb[120].mxu0  ;;  %3295 = vadd.xlane.f32.xlu0 %v3113_v1  ;;  %v3112_v22 = vmul.f32 %v5226_v18, %v2977_v4 }
 0x318   : > { %v2646_v10 = vadd.f32 %v4429_v9, %v5219_v54  ;;  %v2637_v19 = vpop.f32.mrb[121].mxu0  ;;  %3297 = vadd.xlane.f32.xlu1 %v3114_v8 }
 0x319   : > { %v2638_v11 = vadd.f32 %v5219_v54, %v2637_v19  ;;  %v4430_v12 = vpop.f32.mrb[122].mxu0 }
 0x31a   : > { %v2982_v13 = vmax.f32 %v2646_v10, 0.0  ;;  %v2649_v16 = vadd.f32 %v4430_v12, %v5219_v54  ;;  %v2640_v17 = vpop.f32.mrb[123].mxu0 }
 0x31b   : > { %v2641_v25 = vadd.f32 %v5219_v54, %v2640_v17  ;;  %3291 = vadd.xlane.f32.xlu0 %v3111_v7  ;;  %v2980_v58 = vmax.f32 %v2638_v11, 0.0 }
 0x31c   : > { %v2983_v29 = vmax.f32 %v2649_v16, 0.0  ;;  %3293 = vadd.xlane.f32.xlu1 %v3112_v22  ;;  %v3117_v31 = vmul.f32 %v5226_v18, %v2982_v13  ;;  %v5391_v16 = vld [vmem:[#allocation2] ss:$0 sm:$0xff] }
 0x31d   : > { %v2981_v61 = vmax.f32 %v2641_v25, 0.0  ;;  %v3115_v23 = vmul.f32 %v5226_v18, %v2980_v58 }
 0x31e   : > { %v3118_v24 = vmul.f32 %v5226_v18, %v2983_v29 }
 0x31f   : > { %v4433_v6 = vpop.f32.mrb[124].mxu0  ;;  %3303 = vadd.xlane.f32.xlu0 %v3117_v31  ;;  %v3116_v15 = vmul.f32 %v5226_v18, %v2981_v61 }
 0x320   : > { %v2662_v27 = vadd.f32 %v4433_v6, %v5219_v54  ;;  %v2653_v34 = vpop.f32.mrb[125].mxu0  ;;  %3305 = vadd.xlane.f32.xlu1 %v3118_v24 }
 0x321   : > { %v2654_v55 = vadd.f32 %v5219_v54, %v2653_v34  ;;  %v4434_v20 = vpop.f32.mrb[126].mxu0 }
 0x322   : > { %v2986_v50 = vmax.f32 %v2662_v27, 0.0  ;;  %v2665_v21 = vadd.f32 %v4434_v20, %v5219_v54  ;;  %v2656_v26 = vpop.f32.mrb[127].mxu0 }
 0x323   : > { %v2657_v56 = vadd.f32 %v5219_v54, %v2656_v26  ;;  %3299 = vadd.xlane.f32.xlu0 %v3115_v23  ;;  %v2984_v33 = vmax.f32 %v2654_v55, 0.0 }
 0x324   : > { %v2987_v60 = vmax.f32 %v2665_v21, 0.0  ;;  %3301 = vadd.xlane.f32.xlu1 %v3116_v15  ;;  %v3121_v30 = vmul.f32 %v5226_v18, %v2986_v50 }
 0x325   : > { %v2985_v2 = vmax.f32 %v2657_v56, 0.0  ;;  %v3119_v59 = vmul.f32 %v5226_v18, %v2984_v33 }
 0x326   : > { %v3122_v52 = vmul.f32 %v5226_v18, %v2987_v60 }
 0x327   : > { %v4437_v32 = vpop.f32.mrb[128].mxu0  ;;  %3311 = vadd.xlane.f32.xlu0 %v3121_v30  ;;  %v3120_v36 = vmul.f32 %v5226_v18, %v2985_v2 }
 0x328   : > { %v2678_v5 = vadd.f32 %v4437_v32, %v5219_v54  ;;  %v2669_v40 = vpop.f32.mrb[129].mxu0  ;;  %3313 = vadd.xlane.f32.xlu1 %v3122_v52 }
 0x329   : > { %v2670_v43 = vadd.f32 %v5219_v54, %v2669_v40  ;;  %v4438_v14 = vpop.f32.mrb[130].mxu0 }
 0x32a   : > { %v2990_v0 = vmax.f32 %v2678_v5, 0.0  ;;  %v2681_v42 = vadd.f32 %v4438_v14, %v5219_v54  ;;  %v2672_v35 = vpop.f32.mrb[131].mxu0 }
 0x32b   : > { %v2673_v37 = vadd.f32 %v5219_v54, %v2672_v35  ;;  %3307 = vadd.xlane.f32.xlu0 %v3119_v59  ;;  %v2988_v44 = vmax.f32 %v2670_v43, 0.0 }
 0x32c   : > { %v2991_v39 = vmax.f32 %v2681_v42, 0.0  ;;  %3309 = vadd.xlane.f32.xlu1 %v3120_v36  ;;  %v3125_v41 = vmul.f32 %v5226_v18, %v2990_v0 }
 0x32d   : > { %v2989_v45 = vmax.f32 %v2673_v37, 0.0  ;;  %v3123_v28 = vmul.f32 %v5226_v18, %v2988_v44 }
 0x32e   : > { %v3126_v46 = vmul.f32 %v5226_v18, %v2991_v39 }
 0x32f   : > { %v4441_v47 = vpop.f32.mrb[132].mxu0  ;;  %3319 = vadd.xlane.f32.xlu0 %v3125_v41  ;;  %v3124_v63 = vmul.f32 %v5226_v18, %v2989_v45 }
 0x330   : > { %v2694_v48 = vadd.f32 %v4441_v47, %v5219_v54  ;;  %v2685_v38 = vpop.f32.mrb[133].mxu0  ;;  %3321 = vadd.xlane.f32.xlu1 %v3126_v46 }
 0x331   : > { %v2686_v49 = vadd.f32 %v5219_v54, %v2685_v38  ;;  %v4442_v51 = vpop.f32.mrb[134].mxu0 }
 0x332   : > { %v2994_v53 = vmax.f32 %v2694_v48, 0.0  ;;  %v2697_v57 = vadd.f32 %v4442_v51, %v5219_v54  ;;  %v2688_v62 = vpop.f32.mrb[135].mxu0 }
 0x333   : > { %v2689_v1 = vadd.f32 %v5219_v54, %v2688_v62  ;;  %3315 = vadd.xlane.f32.xlu0 %v3123_v28  ;;  %v2992_v8 = vmax.f32 %v2686_v49, 0.0 }
 0x334   : > { %v2995_v3 = vmax.f32 %v2697_v57, 0.0  ;;  %3317 = vadd.xlane.f32.xlu1 %v3124_v63  ;;  %v3129_v4 = vmul.f32 %v5226_v18, %v2994_v53 }
 0x335   : > { %v2993_v9 = vmax.f32 %v2689_v1, 0.0  ;;  %v3127_v17 = vmul.f32 %v5226_v18, %v2992_v8 }
 0x336   : > { %v3130_v10 = vmul.f32 %v5226_v18, %v2995_v3 }
 0x337   : > { %v4445_v19 = vpop.f32.mrb[136].mxu0  ;;  %3327 = vadd.xlane.f32.xlu0 %v3129_v4  ;;  %v3128_v31 = vmul.f32 %v5226_v18, %v2993_v9 }
 0x338   : > { %v2710_v11 = vadd.f32 %v4445_v19, %v5219_v54  ;;  %v2701_v12 = vpop.f32.mrb[137].mxu0  ;;  %3329 = vadd.xlane.f32.xlu1 %v3130_v10 }
 0x339   : > { %v2702_v7 = vadd.f32 %v5219_v54, %v2701_v12  ;;  %v4446_v13 = vpop.f32.mrb[138].mxu0 }
 0x33a   : > { %v2998_v22 = vmax.f32 %v2710_v11, 0.0  ;;  %v2713_v25 = vadd.f32 %v4446_v13, %v5219_v54  ;;  %v2704_v29 = vpop.f32.mrb[139].mxu0 }
 0x33b   : > { %v2705_v58 = vadd.f32 %v5219_v54, %v2704_v29  ;;  %v3192_v61 = vpop.xlane.xlu1 %3191  ;;  %3323 = vadd.xlane.f32.xlu0 %v3127_v17  ;;  %v2996_v55 = vmax.f32 %v2702_v7, 0.0 }
 0x33c   : > { %v2999_v24 = vmax.f32 %v2713_v25, 0.0  ;;  %v3452_v6 = vadd.f32 %v5391_v16, %v3192_v61  ;;  %3325 = vadd.xlane.f32.xlu1 %v3128_v31  ;;  %v3188_v27 = vpop.xlane.xlu0 %3187  ;;  %v3133_v34 = vmul.f32 %v5226_v18, %v2998_v22  ;;  %v5455_v25 = vld [vmem:[%s5917_s6] ss:$0 sm:$0xff] }
 0x33d   : > { %v3450_v20 = vadd.f32 %v5391_v16, %v3188_v27  ;;  %v2997_v23 = vmax.f32 %v2705_v58, 0.0  ;;  %v3131_v32 = vmul.f32 %v5226_v18, %v2996_v55  ;;  %v5463_v27 = vld [vmem:[%s5918_s7] ss:$0 sm:$0xff] }
 0x33e   : > { %3581 = vst.msk [vmem:[%s5401_s10 + $0x10] sm:$0xff] %vm3578_vm1, %v3452_v6  ;;  %v3134_v50 = vmul.f32 %v5226_v18, %v2999_v24 }
 0x33f   : > { %3579 = vst.msk [vmem:[%s5401_s10] sm:$0xff] %vm3578_vm1, %v3450_v20  ;;  %v3194_v21 = vpop.xlane.xlu1 %3193  ;;  %v4449_v26 = vpop.f32.mrb[140].mxu0  ;;  %3335 = vadd.xlane.f32.xlu0 %v3133_v34  ;;  %v3132_v14 = vmul.f32 %v5226_v18, %v2997_v23 }
 0x340   : > { %v3453_v15 = vadd.f32 %v5391_v16, %v3194_v21  ;;  %v2726_v56 = vadd.f32 %v4449_v26, %v5219_v54  ;;  %v2717_v60 = vpop.f32.mrb[141].mxu0  ;;  %3337 = vadd.xlane.f32.xlu1 %v3134_v50  ;;  %v3190_v30 = vpop.xlane.xlu0 %3189 }
 0x341   : > { %v2718_v33 = vadd.f32 %v5219_v54, %v2717_v60  ;;  %v3451_v2 = vadd.f32 %v5391_v16, %v3190_v30  ;;  %v4450_v52 = vpop.f32.mrb[142].mxu0 }
 0x342   : > { %3582 = vst.msk [vmem:[%s5401_s10 + $0x18] sm:$0xff] %vm3578_vm1, %v3453_v15  ;;  %v3002_v5 = vmax.f32 %v2726_v56, 0.0  ;;  %v2729_v40 = vadd.f32 %v4450_v52, %v5219_v54  ;;  %v2720_v43 = vpop.f32.mrb[143].mxu0 }
 0x343   : > { %3580 = vst.msk [vmem:[%s5401_s10 + $0x8] sm:$0xff] %vm3578_vm1, %v3451_v2  ;;  %v2721_v59 = vadd.f32 %v5219_v54, %v2720_v43  ;;  %3331 = vadd.xlane.f32.xlu0 %v3131_v32  ;;  %v3000_v36 = vmax.f32 %v2718_v33, 0.0 }
 0x344   : > { %v3003_v0 = vmax.f32 %v2729_v40, 0.0  ;;  %3333 = vadd.xlane.f32.xlu1 %v3132_v14  ;;  %v3200_v42 = vpop.xlane.xlu0 %3199  ;;  %v3137_v35 = vmul.f32 %v5226_v18, %v3002_v5 }
 0x345   : > { %v3456_v37 = vadd.f32 %v5391_v16, %v3200_v42  ;;  %v3202_v39 = vpop.xlane.xlu1 %3201  ;;  %v3001_v41 = vmax.f32 %v2721_v59, 0.0  ;;  %v3135_v57 = vmul.f32 %v5226_v18, %v3000_v36 }
 0x346   : > { %v3457_v44 = vadd.f32 %v5391_v16, %v3202_v39  ;;  %v3138_v45 = vmul.f32 %v5226_v18, %v3003_v0 }
 0x347   : > { %3585 = vst.msk [vmem:[%s5401_s10 + $0x30] sm:$0xff] %vm3578_vm1, %v3456_v37  ;;  %v4453_v46 = vpop.f32.mrb[144].mxu0  ;;  %3343 = vadd.xlane.f32.xlu0 %v3137_v35  ;;  %v3136_v4 = vmul.f32 %v5226_v18, %v3001_v41 }
 0x348   : > { %3586 = vst.msk [vmem:[%s5401_s10 + $0x38] sm:$0xff] %vm3578_vm1, %v3457_v44  ;;  %v2742_v47 = vadd.f32 %v4453_v46, %v5219_v54  ;;  %v2733_v48 = vpop.f32.mrb[145].mxu0  ;;  %3345 = vadd.xlane.f32.xlu1 %v3138_v45  ;;  %v3196_v38 = vpop.xlane.xlu0 %3195 }
 0x349   : > { %v2734_v49 = vadd.f32 %v5219_v54, %v2733_v48  ;;  %v3454_v51 = vadd.f32 %v5391_v16, %v3196_v38  ;;  %v4454_v28 = vpop.f32.mrb[146].mxu0  ;;  %v3198_v53 = vpop.xlane.xlu1 %3197 }
 0x34a   : > { %v3006_v62 = vmax.f32 %v2742_v47, 0.0  ;;  %v2745_v63 = vadd.f32 %v4454_v28, %v5219_v54  ;;  %v3455_v1 = vadd.f32 %v5391_v16, %v3198_v53  ;;  %v2736_v3 = vpop.f32.mrb[147].mxu0 }
 0x34b   : > { %3583 = vst.msk [vmem:[%s5401_s10 + $0x20] sm:$0xff] %vm3578_vm1, %v3454_v51  ;;  %v2737_v8 = vadd.f32 %v5219_v54, %v2736_v3  ;;  %3339 = vadd.xlane.f32.xlu0 %v3135_v57  ;;  %v3004_v11 = vmax.f32 %v2734_v49, 0.0 }
 0x34c   : > { %v3007_v9 = vmax.f32 %v2745_v63, 0.0  ;;  %3584 = vst.msk [vmem:[%s5401_s10 + $0x28] sm:$0xff] %vm3578_vm1, %v3455_v1  ;;  %3341 = vadd.xlane.f32.xlu1 %v3136_v4  ;;  %v3208_v10 = vpop.xlane.xlu0 %3207  ;;  %v3141_v19 = vmul.f32 %v5226_v18, %v3006_v62 }
 0x34d   : > { %v3460_v12 = vadd.f32 %v5391_v16, %v3208_v10  ;;  %v3210_v7 = vpop.xlane.xlu1 %3209  ;;  %v3005_v13 = vmax.f32 %v2737_v8, 0.0  ;;  %v3139_v34 = vmul.f32 %v5463_v27, %v3004_v11 }
 0x34e   : > { %v3461_v17 = vadd.f32 %v5391_v16, %v3210_v7  ;;  %v3142_v22 = vmul.f32 %v5226_v18, %v3007_v9 }
 0x34f   : > { %3589 = vst.msk [vmem:[%s5401_s10 + $0x50] sm:$0xff] %vm3578_vm1, %v3460_v12  ;;  %v4457_v54 = vpop.f32.mrb[148].mxu0  ;;  %3351 = vadd.xlane.f32.xlu0 %v3141_v19  ;;  %v3140_v21 = vmul.f32 %v5463_v27, %v3005_v13 }
 0x350   : > { %3590 = vst.msk [vmem:[%s5401_s10 + $0x58] sm:$0xff] %vm3578_vm1, %v3461_v17  ;;  %v2758_v29 = vadd.f32 %v5455_v25, %v4457_v54  ;;  %v2749_v31 = vpop.f32.mrb[149].mxu0  ;;  %3353 = vadd.xlane.f32.xlu1 %v3142_v22  ;;  %v3204_v58 = vpop.xlane.xlu0 %3203 }
 0x351   : > { %v2750_v18 = vadd.f32 %v5455_v25, %v2749_v31  ;;  %v3458_v61 = vadd.f32 %v5391_v16, %v3204_v58  ;;  %v4458_v24 = vpop.f32.mrb[150].mxu0  ;;  %v3206_v6 = vpop.xlane.xlu1 %3205 }
 0x352   : > { %v3010_v55 = vmax.f32 %v2758_v29, 0.0  ;;  %v2761_v20 = vadd.f32 %v5455_v25, %v4458_v24  ;;  %v3459_v23 = vadd.f32 %v5391_v16, %v3206_v6  ;;  %v2752_v50 = vpop.f32.mrb[151].mxu0 }
 0x353   : > { %3587 = vst.msk [vmem:[%s5401_s10 + $0x40] sm:$0xff] %vm3578_vm1, %v3458_v61  ;;  %v2753_v26 = vadd.f32 %v5455_v25, %v2752_v50  ;;  %3347 = vadd.xlane.f32.xlu0 %v3139_v34  ;;  %v3008_v30 = vmax.f32 %v2750_v18, 0.0 }
 0x354   : > { %v3011_v15 = vmax.f32 %v2761_v20, 0.0  ;;  %3588 = vst.msk [vmem:[%s5401_s10 + $0x48] sm:$0xff] %vm3578_vm1, %v3459_v23  ;;  %3349 = vadd.xlane.f32.xlu1 %v3140_v21  ;;  %v3216_v56 = vpop.xlane.xlu0 %3215  ;;  %v3145_v60 = vmul.f32 %v5463_v27, %v3010_v55 }
 0x355   : > { %v3464_v33 = vadd.f32 %v5391_v16, %v3216_v56  ;;  %v3218_v2 = vpop.xlane.xlu1 %3217  ;;  %v3009_v52 = vmax.f32 %v2753_v26, 0.0  ;;  %v3143_v37 = vmul.f32 %v5463_v27, %v3008_v30 }
 0x356   : > { %v3465_v32 = vadd.f32 %v5391_v16, %v3218_v2  ;;  %v3146_v5 = vmul.f32 %v5463_v27, %v3011_v15 }
 0x357   : > { %3593 = vst.msk [vmem:[%s5401_s10 + $0x70] sm:$0xff] %vm3578_vm1, %v3464_v33  ;;  %v4461_v40 = vpop.f32.mrb[152].mxu0  ;;  %3359 = vadd.xlane.f32.xlu0 %v3145_v60  ;;  %v3144_v46 = vmul.f32 %v5463_v27, %v3009_v52 }
 0x358   : > { %3594 = vst.msk [vmem:[%s5401_s10 + $0x78] sm:$0xff] %vm3578_vm1, %v3465_v32  ;;  %v2774_v43 = vadd.f32 %v5455_v25, %v4461_v40  ;;  %v2765_v14 = vpop.f32.mrb[153].mxu0  ;;  %3361 = vadd.xlane.f32.xlu1 %v3146_v5  ;;  %v3212_v59 = vpop.xlane.xlu0 %3211 }
 0x359   : > { %v2766_v0 = vadd.f32 %v5455_v25, %v2765_v14  ;;  %v3462_v42 = vadd.f32 %v5391_v16, %v3212_v59  ;;  %v4462_v35 = vpop.f32.mrb[154].mxu0  ;;  %v3214_v36 = vpop.xlane.xlu1 %3213 }
 0x35a   : > { %v3014_v39 = vmax.f32 %v2774_v43, 0.0  ;;  %v2777_v41 = vadd.f32 %v5455_v25, %v4462_v35  ;;  %v3463_v44 = vadd.f32 %v5391_v16, %v3214_v36  ;;  %v2768_v45 = vpop.f32.mrb[155].mxu0 }
 0x35b   : > { %3591 = vst.msk [vmem:[%s5401_s10 + $0x60] sm:$0xff] %vm3578_vm1, %v3462_v42  ;;  %v2769_v47 = vadd.f32 %v5455_v25, %v2768_v45  ;;  %3355 = vadd.xlane.f32.xlu0 %v3143_v37  ;;  %v3012_v51 = vmax.f32 %v2766_v0, 0.0 }
 0x35c   : > { %v3015_v48 = vmax.f32 %v2777_v41, 0.0  ;;  %3592 = vst.msk [vmem:[%s5401_s10 + $0x68] sm:$0xff] %vm3578_vm1, %v3463_v44  ;;  %3357 = vadd.xlane.f32.xlu1 %v3144_v46  ;;  %v3224_v38 = vpop.xlane.xlu0 %3223  ;;  %v3149_v49 = vmul.f32 %v5463_v27, %v3014_v39 }
 0x35d   : > { %v3468_v28 = vadd.f32 %v5391_v16, %v3224_v38  ;;  %v3226_v53 = vpop.xlane.xlu1 %3225  ;;  %v3013_v57 = vmax.f32 %v2769_v47, 0.0  ;;  %v3147_v12 = vmul.f32 %v5463_v27, %v3012_v51 }
 0x35e   : > { %v3469_v62 = vadd.f32 %v5391_v16, %v3226_v53  ;;  %v3150_v63 = vmul.f32 %v5463_v27, %v3015_v48 }
 0x35f   : > { %3597 = vst.msk [vmem:[%s5401_s10 + $0x90] sm:$0xff] %vm3578_vm1, %v3468_v28  ;;  %v4465_v1 = vpop.f32.mrb[156].mxu0  ;;  %3367 = vadd.xlane.f32.xlu0 %v3149_v49  ;;  %v3148_v54 = vmul.f32 %v5463_v27, %v3013_v57 }
 0x360   : > { %3598 = vst.msk [vmem:[%s5401_s10 + $0x98] sm:$0xff] %vm3578_vm1, %v3469_v62  ;;  %v2790_v3 = vadd.f32 %v5455_v25, %v4465_v1  ;;  %v2781_v4 = vpop.f32.mrb[157].mxu0  ;;  %3369 = vadd.xlane.f32.xlu1 %v3150_v63  ;;  %v3220_v8 = vpop.xlane.xlu0 %3219 }
 0x361   : > { %v2782_v9 = vadd.f32 %v5455_v25, %v2781_v4  ;;  %v3466_v10 = vadd.f32 %v5391_v16, %v3220_v8  ;;  %v4466_v19 = vpop.f32.mrb[158].mxu0  ;;  %v3222_v11 = vpop.xlane.xlu1 %3221 }
 0x362   : > { %v3018_v7 = vmax.f32 %v2790_v3, 0.0  ;;  %v2793_v13 = vadd.f32 %v5455_v25, %v4466_v19  ;;  %v3467_v17 = vadd.f32 %v5391_v16, %v3222_v11  ;;  %v2784_v22 = vpop.f32.mrb[159].mxu0 }
 0x363   : > { %3595 = vst.msk [vmem:[%s5401_s10 + $0x80] sm:$0xff] %vm3578_vm1, %v3466_v10  ;;  %v2785_v29 = vadd.f32 %v5455_v25, %v2784_v22  ;;  %3363 = vadd.xlane.f32.xlu0 %v3147_v12  ;;  %v3016_v61 = vmax.f32 %v2782_v9, 0.0 }
 0x364   : > { %v3019_v31 = vmax.f32 %v2793_v13, 0.0  ;;  %3596 = vst.msk [vmem:[%s5401_s10 + $0x88] sm:$0xff] %vm3578_vm1, %v3467_v17  ;;  %3365 = vadd.xlane.f32.xlu1 %v3148_v54  ;;  %v3232_v58 = vpop.xlane.xlu0 %3231  ;;  %v3153_v18 = vmul.f32 %v5463_v27, %v3018_v7 }
 0x365   : > { %v3472_v24 = vadd.f32 %v5391_v16, %v3232_v58  ;;  %v3234_v6 = vpop.xlane.xlu1 %3233  ;;  %v3017_v34 = vmax.f32 %v2785_v29, 0.0  ;;  %v3151_v33 = vmul.f32 %v5463_v27, %v3016_v61 }
 0x366   : > { %v3473_v55 = vadd.f32 %v5391_v16, %v3234_v6  ;;  %v3154_v20 = vmul.f32 %v5463_v27, %v3019_v31 }
 0x367   : > { %3601 = vst.msk [vmem:[%s5401_s10 + $0xb0] sm:$0xff] %vm3578_vm1, %v3472_v24  ;;  %v4469_v23 = vpop.f32.mrb[160].mxu0  ;;  %3375 = vadd.xlane.f32.xlu0 %v3153_v18  ;;  %v3152_v40 = vmul.f32 %v5463_v27, %v3017_v34 }
 0x368   : > { %3602 = vst.msk [vmem:[%s5401_s10 + $0xb8] sm:$0xff] %vm3578_vm1, %v3473_v55  ;;  %v2806_v50 = vadd.f32 %v5455_v25, %v4469_v23  ;;  %v2797_v21 = vpop.f32.mrb[161].mxu0  ;;  %3377 = vadd.xlane.f32.xlu1 %v3154_v20  ;;  %v3228_v26 = vpop.xlane.xlu0 %3227 }
 0x369   : > { %v2798_v15 = vadd.f32 %v5455_v25, %v2797_v21  ;;  %v3470_v56 = vadd.f32 %v5391_v16, %v3228_v26  ;;  %v4470_v60 = vpop.f32.mrb[162].mxu0  ;;  %v3230_v30 = vpop.xlane.xlu1 %3229 }
 0x36a   : > { %v3022_v2 = vmax.f32 %v2806_v50, 0.0  ;;  %v2809_v52 = vadd.f32 %v5455_v25, %v4470_v60  ;;  %v3471_v32 = vadd.f32 %v5391_v16, %v3230_v30  ;;  %v2800_v5 = vpop.f32.mrb[163].mxu0 }
 0x36b   : > { %3599 = vst.msk [vmem:[%s5401_s10 + $0xa0] sm:$0xff] %vm3578_vm1, %v3470_v56  ;;  %v2801_v43 = vadd.f32 %v5455_v25, %v2800_v5  ;;  %3371 = vadd.xlane.f32.xlu0 %v3151_v33  ;;  %v3020_v42 = vmax.f32 %v2798_v15, 0.0 }
 0x36c   : > { %v3023_v14 = vmax.f32 %v2809_v52, 0.0  ;;  %3600 = vst.msk [vmem:[%s5401_s10 + $0xa8] sm:$0xff] %vm3578_vm1, %v3471_v32  ;;  %3373 = vadd.xlane.f32.xlu1 %v3152_v40  ;;  %v3240_v59 = vpop.xlane.xlu0 %3239  ;;  %v3157_v0 = vmul.f32 %v5463_v27, %v3022_v2 }
 0x36d   : > { %v3476_v35 = vadd.f32 %v5391_v16, %v3240_v59  ;;  %v3242_v36 = vpop.xlane.xlu1 %3241  ;;  %v3021_v37 = vmax.f32 %v2801_v43, 0.0  ;;  %v3155_v48 = vmul.f32 %v5463_v27, %v3020_v42 }
 0x36e   : > { %v3477_v39 = vadd.f32 %v5391_v16, %v3242_v36  ;;  %v3158_v41 = vmul.f32 %v5463_v27, %v3023_v14 }
 0x36f   : > { %3605 = vst.msk [vmem:[%s5401_s10 + $0xd0] sm:$0xff] %vm3578_vm1, %v3476_v35  ;;  %v4473_v44 = vpop.f32.mrb[164].mxu0  ;;  %3383 = vadd.xlane.f32.xlu0 %v3157_v0  ;;  %v3156_v53 = vmul.f32 %v5463_v27, %v3021_v37 }
 0x370   : > { %3606 = vst.msk [vmem:[%s5401_s10 + $0xd8] sm:$0xff] %vm3578_vm1, %v3477_v39  ;;  %v2822_v45 = vadd.f32 %v5455_v25, %v4473_v44  ;;  %v2813_v46 = vpop.f32.mrb[165].mxu0  ;;  %3385 = vadd.xlane.f32.xlu1 %v3158_v41  ;;  %v3236_v47 = vpop.xlane.xlu0 %3235 }
 0x371   : > { %v2814_v38 = vadd.f32 %v5455_v25, %v2813_v46  ;;  %v3474_v49 = vadd.f32 %v5391_v16, %v3236_v47  ;;  %v4474_v51 = vpop.f32.mrb[166].mxu0  ;;  %v3238_v28 = vpop.xlane.xlu1 %3237 }
 0x372   : > { %v3026_v57 = vmax.f32 %v2822_v45, 0.0  ;;  %v2825_v62 = vadd.f32 %v5455_v25, %v4474_v51  ;;  %v3475_v63 = vadd.f32 %v5391_v16, %v3238_v28  ;;  %v2816_v1 = vpop.f32.mrb[167].mxu0 }
 0x373   : > { %3603 = vst.msk [vmem:[%s5401_s10 + $0xc0] sm:$0xff] %vm3578_vm1, %v3474_v49  ;;  %v2817_v3 = vadd.f32 %v5455_v25, %v2816_v1  ;;  %3379 = vadd.xlane.f32.xlu0 %v3155_v48  ;;  %v3024_v10 = vmax.f32 %v2814_v38, 0.0 }
 0x374   : > { %v3161_v4 = vmul.f32 %v5463_v27, %v3026_v57  ;;  %v3027_v8 = vmax.f32 %v2825_v62, 0.0  ;;  %3604 = vst.msk [vmem:[%s5401_s10 + $0xc8] sm:$0xff] %vm3578_vm1, %v3475_v63  ;;  %3381 = vadd.xlane.f32.xlu1 %v3156_v53  ;;  %v3248_v9 = vpop.xlane.xlu0 %3247 }
 0x375   : > { %v3480_v19 = vadd.f32 %v5391_v16, %v3248_v9  ;;  %v3250_v11 = vpop.xlane.xlu1 %3249  ;;  %v3025_v7 = vmax.f32 %v2817_v3, 0.0  ;;  %v3159_v31 = vmul.f32 %v5463_v27, %v3024_v10 }
 0x376   : > { %v3162_v12 = vmul.f32 %v5463_v27, %v3027_v8  ;;  %v3481_v13 = vadd.f32 %v5391_v16, %v3250_v11 }
 0x377   : > { %3609 = vst.msk [vmem:[%s5401_s10 + $0xf0] sm:$0xff] %vm3578_vm1, %v3480_v19  ;;  %v4477_v17 = vpop.f32.mrb[168].mxu0  ;;  %3391 = vadd.xlane.f32.xlu0 %v3161_v4  ;;  %v3160_v6 = vmul.f32 %v5463_v27, %v3025_v7 }
 0x378   : > { %3610 = vst.msk [vmem:[%s5401_s10 + $0xf8] sm:$0xff] %vm3578_vm1, %v3481_v13  ;;  %v2838_v22 = vadd.f32 %v5455_v25, %v4477_v17  ;;  %v2829_v54 = vpop.f32.mrb[169].mxu0  ;;  %3393 = vadd.xlane.f32.xlu1 %v3162_v12  ;;  %v3244_v29 = vpop.xlane.xlu0 %3243 }
 0x379   : > { %v2830_v58 = vadd.f32 %v5455_v25, %v2829_v54  ;;  %v3478_v18 = vadd.f32 %v5391_v16, %v3244_v29  ;;  %v4478_v61 = vpop.f32.mrb[170].mxu0  ;;  %v3246_v24 = vpop.xlane.xlu1 %3245 }
 0x37a   : > { %v3030_v34 = vmax.f32 %v2838_v22, 0.0  ;;  %v2841_v55 = vadd.f32 %v5455_v25, %v4478_v61  ;;  %v3479_v20 = vadd.f32 %v5391_v16, %v3246_v24  ;;  %v2832_v23 = vpop.f32.mrb[171].mxu0 }
 0x37b   : > { %3607 = vst.msk [vmem:[%s5401_s10 + $0xe0] sm:$0xff] %vm3578_vm1, %v3478_v18  ;;  %v2833_v50 = vadd.f32 %v5455_v25, %v2832_v23  ;;  %3387 = vadd.xlane.f32.xlu0 %v3159_v31  ;;  %v3028_v56 = vmax.f32 %v2830_v58, 0.0 }
 0x37c   : > { %v3165_v21 = vmul.f32 %v5463_v27, %v3030_v34  ;;  %v3031_v26 = vmax.f32 %v2841_v55, 0.0  ;;  %3608 = vst.msk [vmem:[%s5401_s10 + $0xe8] sm:$0xff] %vm3578_vm1, %v3479_v20  ;;  %3389 = vadd.xlane.f32.xlu1 %v3160_v6  ;;  %v3256_v15 = vpop.xlane.xlu0 %3255 }
 0x37d   : > { %v3484_v60 = vadd.f32 %v5391_v16, %v3256_v15  ;;  %v3258_v30 = vpop.xlane.xlu1 %3257  ;;  %v3029_v2 = vmax.f32 %v2833_v50, 0.0  ;;  %v3163_v14 = vmul.f32 %v5463_v27, %v3028_v56 }
 0x37e   : > { %v3166_v33 = vmul.f32 %v5463_v27, %v3031_v26  ;;  %v3485_v52 = vadd.f32 %v5391_v16, %v3258_v30 }
 0x37f   : > { %3613 = vst.msk [vmem:[%s5401_s10 + $0x110] sm:$0xff] %vm3578_vm1, %v3484_v60  ;;  %v4481_v32 = vpop.f32.mrb[172].mxu0  ;;  %3399 = vadd.xlane.f32.xlu0 %v3165_v21  ;;  %v3164_v36 = vmul.f32 %v5463_v27, %v3029_v2 }
 0x380   : > { %3614 = vst.msk [vmem:[%s5401_s10 + $0x118] sm:$0xff] %vm3578_vm1, %v3485_v52  ;;  %v2854_v5 = vadd.f32 %v5455_v25, %v4481_v32  ;;  %v2845_v40 = vpop.f32.mrb[173].mxu0  ;;  %3401 = vadd.xlane.f32.xlu1 %v3166_v33  ;;  %v3252_v43 = vpop.xlane.xlu0 %3251 }
 0x381   : > { %v2846_v59 = vadd.f32 %v5455_v25, %v2845_v40  ;;  %v3482_v0 = vadd.f32 %v5391_v16, %v3252_v43  ;;  %v4482_v42 = vpop.f32.mrb[174].mxu0  ;;  %v3254_v35 = vpop.xlane.xlu1 %3253 }
 0x382   : > { %v3034_v37 = vmax.f32 %v2854_v5, 0.0  ;;  %v2857_v39 = vadd.f32 %v5455_v25, %v4482_v42  ;;  %v3483_v41 = vadd.f32 %v5391_v16, %v3254_v35  ;;  %v2848_v44 = vpop.f32.mrb[175].mxu0 }
 0x383   : > { %3611 = vst.msk [vmem:[%s5401_s10 + $0x100] sm:$0xff] %vm3578_vm1, %v3482_v0  ;;  %v2849_v45 = vadd.f32 %v5455_v25, %v2848_v44  ;;  %3395 = vadd.xlane.f32.xlu0 %v3163_v14  ;;  %v3032_v38 = vmax.f32 %v2846_v59, 0.0 }
 0x384   : > { %v3169_v46 = vmul.f32 %v5463_v27, %v3034_v37  ;;  %v3035_v47 = vmax.f32 %v2857_v39, 0.0  ;;  %3612 = vst.msk [vmem:[%s5401_s10 + $0x108] sm:$0xff] %vm3578_vm1, %v3483_v41  ;;  %3397 = vadd.xlane.f32.xlu1 %v3164_v36  ;;  %v3264_v48 = vpop.xlane.xlu0 %3263 }
 0x385   : > { %v3488_v49 = vadd.f32 %v5391_v16, %v3264_v48  ;;  %v3266_v51 = vpop.xlane.xlu1 %3265  ;;  %v3033_v53 = vmax.f32 %v2849_v45, 0.0  ;;  %v3167_v4 = vmul.f32 %v5463_v27, %v3032_v38 }
 0x386   : > { %v3170_v28 = vmul.f32 %v5463_v27, %v3035_v47  ;;  %v3489_v57 = vadd.f32 %v5391_v16, %v3266_v51 }
 0x387   : > { %3617 = vst.msk [vmem:[%s5401_s10 + $0x130] sm:$0xff] %vm3578_vm1, %v3488_v49  ;;  %v4485_v62 = vpop.f32.mrb[176].mxu0  ;;  %3407 = vadd.xlane.f32.xlu0 %v3169_v46  ;;  %v3168_v11 = vmul.f32 %v5463_v27, %v3033_v53 }
 0x388   : > { %3618 = vst.msk [vmem:[%s5401_s10 + $0x138] sm:$0xff] %vm3578_vm1, %v3489_v57  ;;  %v2870_v63 = vadd.f32 %v5455_v25, %v4485_v62  ;;  %v2861_v1 = vpop.f32.mrb[177].mxu0  ;;  %3409 = vadd.xlane.f32.xlu1 %v3170_v28  ;;  %v3260_v3 = vpop.xlane.xlu0 %3259 }
 0x389   : > { %v2862_v8 = vadd.f32 %v5455_v25, %v2861_v1  ;;  %v3486_v9 = vadd.f32 %v5391_v16, %v3260_v3  ;;  %v4486_v10 = vpop.f32.mrb[178].mxu0  ;;  %v3262_v19 = vpop.xlane.xlu1 %3261 }
 0x38a   : > { %v3038_v12 = vmax.f32 %v2870_v63, 0.0  ;;  %v2873_v7 = vadd.f32 %v5455_v25, %v4486_v10  ;;  %v3487_v13 = vadd.f32 %v5391_v16, %v3262_v19  ;;  %v2864_v17 = vpop.f32.mrb[179].mxu0 }
 0x38b   : > { %3615 = vst.msk [vmem:[%s5401_s10 + $0x120] sm:$0xff] %vm3578_vm1, %v3486_v9  ;;  %v2865_v22 = vadd.f32 %v5455_v25, %v2864_v17  ;;  %3403 = vadd.xlane.f32.xlu0 %v3167_v4  ;;  %v3036_v58 = vmax.f32 %v2862_v8, 0.0 }
 0x38c   : > { %v3173_v54 = vmul.f32 %v5463_v27, %v3038_v12  ;;  %v3039_v29 = vmax.f32 %v2873_v7, 0.0  ;;  %3616 = vst.msk [vmem:[%s5401_s10 + $0x128] sm:$0xff] %vm3578_vm1, %v3487_v13  ;;  %3405 = vadd.xlane.f32.xlu1 %v3168_v11  ;;  %v3272_v31 = vpop.xlane.xlu0 %3271 }
 0x38d   : > { %v3492_v18 = vadd.f32 %v5391_v16, %v3272_v31  ;;  %v3274_v61 = vpop.xlane.xlu1 %3273  ;;  %v3037_v6 = vmax.f32 %v2865_v22, 0.0  ;;  %v3171_v21 = vmul.f32 %v5463_v27, %v3036_v58 }
 0x38e   : > { %v3174_v24 = vmul.f32 %v5463_v27, %v3039_v29  ;;  %v3493_v34 = vadd.f32 %v5391_v16, %v3274_v61 }
 0x38f   : > { %3621 = vst.msk [vmem:[%s5401_s10 + $0x150] sm:$0xff] %vm3578_vm1, %v3492_v18  ;;  %v4489_v55 = vpop.f32.mrb[180].mxu0  ;;  %3415 = vadd.xlane.f32.xlu0 %v3173_v54  ;;  %v3172_v30 = vmul.f32 %v5463_v27, %v3037_v6 }
 0x390   : > { %3622 = vst.msk [vmem:[%s5401_s10 + $0x158] sm:$0xff] %vm3578_vm1, %v3493_v34  ;;  %v2886_v20 = vadd.f32 %v5455_v25, %v4489_v55  ;;  %v2877_v23 = vpop.f32.mrb[181].mxu0  ;;  %3417 = vadd.xlane.f32.xlu1 %v3174_v24  ;;  %v3268_v50 = vpop.xlane.xlu0 %3267 }
 0x391   : > { %v2878_v26 = vadd.f32 %v5455_v25, %v2877_v23  ;;  %v3490_v15 = vadd.f32 %v5391_v16, %v3268_v50  ;;  %v4490_v56 = vpop.f32.mrb[182].mxu0  ;;  %v3270_v60 = vpop.xlane.xlu1 %3269 }
 0x392   : > { %v3042_v33 = vmax.f32 %v2886_v20, 0.0  ;;  %v2889_v2 = vadd.f32 %v5455_v25, %v4490_v56  ;;  %v3491_v52 = vadd.f32 %v5391_v16, %v3270_v60  ;;  %v2880_v32 = vpop.f32.mrb[183].mxu0 }
 0x393   : > { %3619 = vst.msk [vmem:[%s5401_s10 + $0x140] sm:$0xff] %vm3578_vm1, %v3490_v15  ;;  %v2881_v5 = vadd.f32 %v5455_v25, %v2880_v32  ;;  %3411 = vadd.xlane.f32.xlu0 %v3171_v21  ;;  %v3040_v59 = vmax.f32 %v2878_v26, 0.0 }
 0x394   : > { %v3177_v40 = vmul.f32 %v5463_v27, %v3042_v33  ;;  %v3043_v43 = vmax.f32 %v2889_v2, 0.0  ;;  %3620 = vst.msk [vmem:[%s5401_s10 + $0x148] sm:$0xff] %vm3578_vm1, %v3491_v52  ;;  %3413 = vadd.xlane.f32.xlu1 %v3172_v30  ;;  %v3280_v14 = vpop.xlane.xlu0 %3279 }
 0x395   : > { %v3496_v0 = vadd.f32 %v5391_v16, %v3280_v14  ;;  %v3282_v42 = vpop.xlane.xlu1 %3281  ;;  %v3041_v36 = vmax.f32 %v2881_v5, 0.0  ;;  %v3175_v46 = vmul.f32 %v5463_v27, %v3040_v59 }
 0x396   : > { %v3178_v35 = vmul.f32 %v5463_v27, %v3043_v43  ;;  %v3497_v37 = vadd.f32 %v5391_v16, %v3282_v42 }
 0x397   : > { %3625 = vst.msk [vmem:[%s5401_s10 + $0x170] sm:$0xff] %vm3578_vm1, %v3496_v0  ;;  %v4493_v39 = vpop.f32.mrb[184].mxu0  ;;  %3423 = vadd.xlane.f32.xlu0 %v3177_v40  ;;  %v3176_v51 = vmul.f32 %v5463_v27, %v3041_v36 }
 0x398   : > { %3626 = vst.msk [vmem:[%s5401_s10 + $0x178] sm:$0xff] %vm3578_vm1, %v3497_v37  ;;  %v2902_v41 = vadd.f32 %v5455_v25, %v4493_v39  ;;  %v2893_v44 = vpop.f32.mrb[185].mxu0  ;;  %3425 = vadd.xlane.f32.xlu1 %v3178_v35  ;;  %v3276_v45 = vpop.xlane.xlu0 %3275 }
 0x399   : > { %v2894_v47 = vadd.f32 %v5455_v25, %v2893_v44  ;;  %v3494_v48 = vadd.f32 %v5391_v16, %v3276_v45  ;;  %v4494_v38 = vpop.f32.mrb[186].mxu0  ;;  %v3278_v49 = vpop.xlane.xlu1 %3277 }
 0x39a   : > { %v3046_v28 = vmax.f32 %v2902_v41, 0.0  ;;  %v2905_v53 = vadd.f32 %v5455_v25, %v4494_v38  ;;  %v3495_v57 = vadd.f32 %v5391_v16, %v3278_v49  ;;  %v2896_v62 = vpop.f32.mrb[187].mxu0 }
 0x39b   : > { %3623 = vst.msk [vmem:[%s5401_s10 + $0x160] sm:$0xff] %vm3578_vm1, %v3494_v48  ;;  %v2897_v63 = vadd.f32 %v5455_v25, %v2896_v62  ;;  %3419 = vadd.xlane.f32.xlu0 %v3175_v46  ;;  %v3044_v8 = vmax.f32 %v2894_v47, 0.0 }
 0x39c   : > { %v3181_v1 = vmul.f32 %v5463_v27, %v3046_v28  ;;  %v3047_v3 = vmax.f32 %v2905_v53, 0.0  ;;  %3624 = vst.msk [vmem:[%s5401_s10 + $0x168] sm:$0xff] %vm3578_vm1, %v3495_v57  ;;  %3421 = vadd.xlane.f32.xlu1 %v3176_v51  ;;  %v3288_v4 = vpop.xlane.xlu0 %3287 }
 0x39d   : > { %v3500_v9 = vadd.f32 %v5391_v16, %v3288_v4  ;;  %v3290_v10 = vpop.xlane.xlu1 %3289  ;;  %v3045_v11 = vmax.f32 %v2897_v63, 0.0  ;;  %v3179_v22 = vmul.f32 %v5463_v27, %v3044_v8 }
 0x39e   : > { %v3182_v19 = vmul.f32 %v5463_v27, %v3047_v3  ;;  %v3501_v12 = vadd.f32 %v5391_v16, %v3290_v10 }
 0x39f   : > { %3629 = vst.msk [vmem:[%s5401_s10 + $0x190] sm:$0xff] %vm3578_vm1, %v3500_v9  ;;  %v4497_v7 = vpop.f32.mrb[188].mxu0  ;;  %3431 = vadd.xlane.f32.xlu0 %v3181_v1  ;;  %v3180_v61 = vmul.f32 %v5463_v27, %v3045_v11 }
 0x3a0   : > { %3630 = vst.msk [vmem:[%s5401_s10 + $0x198] sm:$0xff] %vm3578_vm1, %v3501_v12  ;;  %v2909_v13 = vpop.f32.mrb[189].mxu0  ;;  %3433 = vadd.xlane.f32.xlu1 %v3182_v19  ;;  %v3284_v17 = vpop.xlane.xlu0 %3283  ;;  %v2918_v54 = vadd.f32 %v5455_v25, %v4497_v7 }
 0x3a1   : > { %v2910_v29 = vadd.f32 %v5455_v25, %v2909_v13  ;;  %v3498_v31 = vadd.f32 %v5391_v16, %v3284_v17  ;;  %v4498_v58 = vpop.f32.mrb[190].mxu0  ;;  %v3286_v18 = vpop.xlane.xlu1 %3285 }
 0x3a2   : > { %v3499_v24 = vadd.f32 %v5391_v16, %v3286_v18  ;;  %v2912_v6 = vpop.f32.mrb[191].mxu0  ;;  %v2921_v55 = vadd.f32 %v5455_v25, %v4498_v58  ;;  %v3050_v50 = vmax.f32 %v2918_v54, 0.0 }
 0x3a3   : > { %v3048_v34 = vmax.f32 %v2910_v29, 0.0  ;;  %3627 = vst.msk [vmem:[%s5401_s10 + $0x180] sm:$0xff] %vm3578_vm1, %v3498_v31  ;;  %v2913_v20 = vadd.f32 %v5455_v25, %v2912_v6  ;;  %3427 = vadd.xlane.f32.xlu0 %v3179_v22 }
 0x3a4   : > { %3628 = vst.msk [vmem:[%s5401_s10 + $0x188] sm:$0xff] %vm3578_vm1, %v3499_v24  ;;  %3429 = vadd.xlane.f32.xlu1 %v3180_v61  ;;  %v3296_v23 = vpop.xlane.xlu0 %3295  ;;  %v3051_v30 = vmax.f32 %v2921_v55, 0.0  ;;  %v3185_v2 = vmul.f32 %v5463_v27, %v3050_v50  ;;  %v5751_v24 = vld [vmem:[#allocation2] ss:$0 sm:$0xff] }
 0x3a5   : > { %v3183_v21 = vmul.f32 %v5463_v27, %v3048_v34  ;;  %v3049_v26 = vmax.f32 %v2913_v20, 0.0  ;;  %v3504_v15 = vadd.f32 %v5391_v16, %v3296_v23  ;;  %v3298_v56 = vpop.xlane.xlu1 %3297 }
 0x3a6   : > { %v3505_v60 = vadd.f32 %v5391_v16, %v3298_v56  ;;  %v3186_v40 = vmul.f32 %v5463_v27, %v3051_v30 }
 0x3a7   : > { %v3184_v33 = vmul.f32 %v5463_v27, %v3049_v26  ;;  %3633 = vst.msk [vmem:[%s5401_s10 + $0x1b0] sm:$0xff] %vm3578_vm1, %v3504_v15  ;;  %3435 = vadd.xlane.f32.xlu0 %v3183_v21 }
 0x3a8   : > { %3634 = vst.msk [vmem:[%s5401_s10 + $0x1b8] sm:$0xff] %vm3578_vm1, %v3505_v60  ;;  %v3292_v25 = vpop.xlane.xlu0 %3291 }
 0x3a9   : > { %v3502_v52 = vadd.f32 %v5391_v16, %v3292_v25  ;;  %3437 = vadd.xlane.f32.xlu1 %v3184_v33  ;;  %v3294_v32 = vpop.xlane.xlu1 %3293 }
 0x3aa   : > { %v3503_v5 = vadd.f32 %v5391_v16, %v3294_v32 }
 0x3ab   : > { %3631 = vst.msk [vmem:[%s5401_s10 + $0x1a0] sm:$0xff] %vm3578_vm1, %v3502_v52  ;;  %3439 = vadd.xlane.f32.xlu0 %v3185_v2 }
 0x3ac   : > { %3632 = vst.msk [vmem:[%s5401_s10 + $0x1a8] sm:$0xff] %vm3578_vm1, %v3503_v5  ;;  %v3304_v43 = vpop.xlane.xlu0 %3303 }
 0x3ad   : > { %v3508_v14 = vadd.f32 %v5391_v16, %v3304_v43  ;;  %3441 = vadd.xlane.f32.xlu1 %v3186_v40  ;;  %v3306_v59 = vpop.xlane.xlu1 %3305 }
 0x3ae   : > { %v3509_v0 = vadd.f32 %v5391_v16, %v3306_v59 }
 0x3af   : > { %3637 = vst.msk [vmem:[%s5401_s10 + $0x1d0] sm:$0xff] %vm3578_vm1, %v3508_v14 }
 0x3b0   : > { %3638 = vst.msk [vmem:[%s5401_s10 + $0x1d8] sm:$0xff] %vm3578_vm1, %v3509_v0  ;;  %v3300_v27 = vpop.xlane.xlu0 %3299 }
 0x3b1   : > { %v3506_v42 = vadd.f32 %v5391_v16, %v3300_v27  ;;  %v3302_v35 = vpop.xlane.xlu1 %3301 }
 0x3b2   : > { %v3507_v36 = vadd.f32 %v5391_v16, %v3302_v35 }
 0x3b3   : > { %3635 = vst.msk [vmem:[%s5401_s10 + $0x1c0] sm:$0xff] %vm3578_vm1, %v3506_v42 }
 0x3b4   : > { %3636 = vst.msk [vmem:[%s5401_s10 + $0x1c8] sm:$0xff] %vm3578_vm1, %v3507_v36  ;;  %v3312_v37 = vpop.xlane.xlu0 %3311 }
 0x3b5   : > { %v3512_v39 = vadd.f32 %v5391_v16, %v3312_v37  ;;  %v3314_v41 = vpop.xlane.xlu1 %3313 }
 0x3b6   : > { %v3513_v44 = vadd.f32 %v5391_v16, %v3314_v41 }
 0x3b7   : > { %3641 = vst.msk [vmem:[%s5401_s10 + $0x1f0] sm:$0xff] %vm3578_vm1, %v3512_v39 }
 0x3b8   : > { %3642 = vst.msk [vmem:[%s5401_s10 + $0x1f8] sm:$0xff] %vm3578_vm1, %v3513_v44  ;;  %v3308_v45 = vpop.xlane.xlu0 %3307 }
 0x3b9   : > { %v3510_v46 = vadd.f32 %v5391_v16, %v3308_v45  ;;  %v3310_v47 = vpop.xlane.xlu1 %3309 }
 0x3ba   : > { %v3511_v48 = vadd.f32 %v5391_v16, %v3310_v47 }
 0x3bb   : > { %3639 = vst.msk [vmem:[%s5401_s10 + $0x1e0] sm:$0xff] %vm3578_vm1, %v3510_v46 }
 0x3bc   : > { %3640 = vst.msk [vmem:[%s5401_s10 + $0x1e8] sm:$0xff] %vm3578_vm1, %v3511_v48  ;;  %v3320_v38 = vpop.xlane.xlu0 %3319 }
 0x3bd   : > { %v3516_v49 = vadd.f32 %v5391_v16, %v3320_v38  ;;  %v3322_v51 = vpop.xlane.xlu1 %3321 }
 0x3be   : > { %v3517_v28 = vadd.f32 %v5391_v16, %v3322_v51 }
 0x3bf   : > { %3645 = vst.msk [vmem:[%s5401_s10 + $0x210] sm:$0xff] %vm3578_vm1, %v3516_v49 }
 0x3c0   : > { %3646 = vst.msk [vmem:[%s5401_s10 + $0x218] sm:$0xff] %vm3578_vm1, %v3517_v28  ;;  %v3316_v53 = vpop.xlane.xlu0 %3315 }
 0x3c1   : > { %v3514_v57 = vadd.f32 %v5391_v16, %v3316_v53  ;;  %v3318_v62 = vpop.xlane.xlu1 %3317 }
 0x3c2   : > { %v3515_v63 = vadd.f32 %v5391_v16, %v3318_v62 }
 0x3c3   : > { %3643 = vst.msk [vmem:[%s5401_s10 + $0x200] sm:$0xff] %vm3578_vm1, %v3514_v57 }
 0x3c4   : > { %3644 = vst.msk [vmem:[%s5401_s10 + $0x208] sm:$0xff] %vm3578_vm1, %v3515_v63  ;;  %v3328_v1 = vpop.xlane.xlu0 %3327 }
 0x3c5   : > { %v3520_v3 = vadd.f32 %v5391_v16, %v3328_v1  ;;  %v3330_v4 = vpop.xlane.xlu1 %3329 }
 0x3c6   : > { %v3521_v8 = vadd.f32 %v5391_v16, %v3330_v4 }
 0x3c7   : > { %3649 = vst.msk [vmem:[%s5401_s10 + $0x230] sm:$0xff] %vm3578_vm1, %v3520_v3 }
 0x3c8   : > { %3650 = vst.msk [vmem:[%s5401_s10 + $0x238] sm:$0xff] %vm3578_vm1, %v3521_v8  ;;  %v3324_v9 = vpop.xlane.xlu0 %3323 }
 0x3c9   : > { %v3518_v10 = vadd.f32 %v5391_v16, %v3324_v9  ;;  %v3326_v19 = vpop.xlane.xlu1 %3325 }
 0x3ca   : > { %v3519_v11 = vadd.f32 %v5391_v16, %v3326_v19 }
 0x3cb   : > { %3647 = vst.msk [vmem:[%s5401_s10 + $0x220] sm:$0xff] %vm3578_vm1, %v3518_v10 }
 0x3cc   : > { %3648 = vst.msk [vmem:[%s5401_s10 + $0x228] sm:$0xff] %vm3578_vm1, %v3519_v11  ;;  %v3336_v12 = vpop.xlane.xlu0 %3335 }
 0x3cd   : > { %v3524_v7 = vadd.f32 %v5391_v16, %v3336_v12  ;;  %v3338_v13 = vpop.xlane.xlu1 %3337 }
 0x3ce   : > { %v3525_v17 = vadd.f32 %v5391_v16, %v3338_v13 }
 0x3cf   : > { %3653 = vst.msk [vmem:[%s5401_s10 + $0x250] sm:$0xff] %vm3578_vm1, %v3524_v7 }
 0x3d0   : > { %3654 = vst.msk [vmem:[%s5401_s10 + $0x258] sm:$0xff] %vm3578_vm1, %v3525_v17  ;;  %v3332_v22 = vpop.xlane.xlu0 %3331 }
 0x3d1   : > { %v3522_v54 = vadd.f32 %v5391_v16, %v3332_v22  ;;  %v3334_v29 = vpop.xlane.xlu1 %3333 }
 0x3d2   : > { %v3523_v31 = vadd.f32 %v5391_v16, %v3334_v29 }
 0x3d3   : > { %3651 = vst.msk [vmem:[%s5401_s10 + $0x240] sm:$0xff] %vm3578_vm1, %v3522_v54 }
 0x3d4   : > { %3652 = vst.msk [vmem:[%s5401_s10 + $0x248] sm:$0xff] %vm3578_vm1, %v3523_v31  ;;  %v3344_v58 = vpop.xlane.xlu0 %3343 }
 0x3d5   : > { %v3528_v18 = vadd.f32 %v5391_v16, %v3344_v58  ;;  %v3346_v61 = vpop.xlane.xlu1 %3345 }
 0x3d6   : > { %v3529_v6 = vadd.f32 %v5751_v24, %v3346_v61 }
 0x3d7   : > { %3657 = vst.msk [vmem:[%s5401_s10 + $0x270] sm:$0xff] %vm3578_vm1, %v3528_v18 }
 0x3d8   : > { %3658 = vst.msk [vmem:[%s5401_s10 + $0x278] sm:$0xff] %vm3578_vm1, %v3529_v6  ;;  %v3340_v34 = vpop.xlane.xlu0 %3339 }
 0x3d9   : > { %v3526_v55 = vadd.f32 %v5751_v24, %v3340_v34  ;;  %v3342_v20 = vpop.xlane.xlu1 %3341 }
 0x3da   : > { %v3527_v23 = vadd.f32 %v5751_v24, %v3342_v20 }
 0x3db   : > { %3655 = vst.msk [vmem:[%s5401_s10 + $0x260] sm:$0xff] %vm3578_vm1, %v3526_v55 }
 0x3dc   : > { %3656 = vst.msk [vmem:[%s5401_s10 + $0x268] sm:$0xff] %vm3578_vm1, %v3527_v23  ;;  %v3352_v16 = vpop.xlane.xlu0 %3351 }
 0x3dd   : > { %v3532_v50 = vadd.f32 %v5751_v24, %v3352_v16  ;;  %v3354_v21 = vpop.xlane.xlu1 %3353 }
 0x3de   : > { %v3533_v26 = vadd.f32 %v5751_v24, %v3354_v21 }
 0x3df   : > { %3661 = vst.msk [vmem:[%s5401_s10 + $0x290] sm:$0xff] %vm3578_vm1, %v3532_v50 }
 0x3e0   : > { %3662 = vst.msk [vmem:[%s5401_s10 + $0x298] sm:$0xff] %vm3578_vm1, %v3533_v26  ;;  %v3348_v15 = vpop.xlane.xlu0 %3347 }
 0x3e1   : > { %v3530_v56 = vadd.f32 %v5751_v24, %v3348_v15  ;;  %v3350_v60 = vpop.xlane.xlu1 %3349 }
 0x3e2   : > { %v3531_v30 = vadd.f32 %v5751_v24, %v3350_v60 }
 0x3e3   : > { %3659 = vst.msk [vmem:[%s5401_s10 + $0x280] sm:$0xff] %vm3578_vm1, %v3530_v56 }
 0x3e4   : > { %3660 = vst.msk [vmem:[%s5401_s10 + $0x288] sm:$0xff] %vm3578_vm1, %v3531_v30  ;;  %v3360_v33 = vpop.xlane.xlu0 %3359 }
 0x3e5   : > { %v3536_v25 = vadd.f32 %v5751_v24, %v3360_v33  ;;  %v3362_v2 = vpop.xlane.xlu1 %3361 }
 0x3e6   : > { %v3537_v52 = vadd.f32 %v5751_v24, %v3362_v2 }
 0x3e7   : > { %3665 = vst.msk [vmem:[%s5401_s10 + $0x2b0] sm:$0xff] %vm3578_vm1, %v3536_v25 }
 0x3e8   : > { %3666 = vst.msk [vmem:[%s5401_s10 + $0x2b8] sm:$0xff] %vm3578_vm1, %v3537_v52  ;;  %v3356_v32 = vpop.xlane.xlu0 %3355 }
 0x3e9   : > { %v3534_v5 = vadd.f32 %v5751_v24, %v3356_v32  ;;  %v3358_v40 = vpop.xlane.xlu1 %3357 }
 0x3ea   : > { %v3535_v43 = vadd.f32 %v5751_v24, %v3358_v40 }
 0x3eb   : > { %3663 = vst.msk [vmem:[%s5401_s10 + $0x2a0] sm:$0xff] %vm3578_vm1, %v3534_v5 }
 0x3ec   : > { %3664 = vst.msk [vmem:[%s5401_s10 + $0x2a8] sm:$0xff] %vm3578_vm1, %v3535_v43  ;;  %v3368_v14 = vpop.xlane.xlu0 %3367 }
 0x3ed   : > { %v3540_v59 = vadd.f32 %v5751_v24, %v3368_v14  ;;  %v3370_v0 = vpop.xlane.xlu1 %3369 }
 0x3ee   : > { %v3541_v27 = vadd.f32 %v5751_v24, %v3370_v0 }
 0x3ef   : > { %3669 = vst.msk [vmem:[%s5401_s10 + $0x2d0] sm:$0xff] %vm3578_vm1, %v3540_v59 }
 0x3f0   : > { %3670 = vst.msk [vmem:[%s5401_s10 + $0x2d8] sm:$0xff] %vm3578_vm1, %v3541_v27  ;;  %v3364_v42 = vpop.xlane.xlu0 %3363 }
 0x3f1   : > { %v3538_v35 = vadd.f32 %v5751_v24, %v3364_v42  ;;  %v3366_v36 = vpop.xlane.xlu1 %3365 }
 0x3f2   : > { %v3539_v37 = vadd.f32 %v5751_v24, %v3366_v36 }
 0x3f3   : > { %3667 = vst.msk [vmem:[%s5401_s10 + $0x2c0] sm:$0xff] %vm3578_vm1, %v3538_v35 }
 0x3f4   : > { %3668 = vst.msk [vmem:[%s5401_s10 + $0x2c8] sm:$0xff] %vm3578_vm1, %v3539_v37  ;;  %v3376_v39 = vpop.xlane.xlu0 %3375 }
 0x3f5   : > { %v3544_v41 = vadd.f32 %v5751_v24, %v3376_v39  ;;  %v3378_v44 = vpop.xlane.xlu1 %3377 }
 0x3f6   : > { %v3545_v45 = vadd.f32 %v5751_v24, %v3378_v44 }
 0x3f7   : > { %3673 = vst.msk [vmem:[%s5401_s10 + $0x2f0] sm:$0xff] %vm3578_vm1, %v3544_v41 }
 0x3f8   : > { %3674 = vst.msk [vmem:[%s5401_s10 + $0x2f8] sm:$0xff] %vm3578_vm1, %v3545_v45  ;;  %v3372_v46 = vpop.xlane.xlu0 %3371 }
 0x3f9   : > { %v3542_v47 = vadd.f32 %v5751_v24, %v3372_v46  ;;  %v3374_v48 = vpop.xlane.xlu1 %3373 }
 0x3fa   : > { %v3543_v38 = vadd.f32 %v5751_v24, %v3374_v48 }
 0x3fb   : > { %3671 = vst.msk [vmem:[%s5401_s10 + $0x2e0] sm:$0xff] %vm3578_vm1, %v3542_v47 }
 0x3fc   : > { %3672 = vst.msk [vmem:[%s5401_s10 + $0x2e8] sm:$0xff] %vm3578_vm1, %v3543_v38  ;;  %v3384_v49 = vpop.xlane.xlu0 %3383 }
 0x3fd   : > { %v3548_v51 = vadd.f32 %v5751_v24, %v3384_v49  ;;  %v3386_v28 = vpop.xlane.xlu1 %3385 }
 0x3fe   : > { %v3549_v53 = vadd.f32 %v5751_v24, %v3386_v28 }
 0x3ff   : > { %3677 = vst.msk [vmem:[%s5401_s10 + $0x310] sm:$0xff] %vm3578_vm1, %v3548_v51 }
 0x400   : > { %3678 = vst.msk [vmem:[%s5401_s10 + $0x318] sm:$0xff] %vm3578_vm1, %v3549_v53  ;;  %v3380_v57 = vpop.xlane.xlu0 %3379 }
 0x401   : > { %v3546_v62 = vadd.f32 %v5751_v24, %v3380_v57  ;;  %v3382_v63 = vpop.xlane.xlu1 %3381 }
 0x402   : > { %v3547_v1 = vadd.f32 %v5751_v24, %v3382_v63 }
 0x403   : > { %3675 = vst.msk [vmem:[%s5401_s10 + $0x300] sm:$0xff] %vm3578_vm1, %v3546_v62 }
 0x404   : > { %3676 = vst.msk [vmem:[%s5401_s10 + $0x308] sm:$0xff] %vm3578_vm1, %v3547_v1  ;;  %v3392_v3 = vpop.xlane.xlu0 %3391 }
 0x405   : > { %v3552_v4 = vadd.f32 %v5751_v24, %v3392_v3  ;;  %v3394_v8 = vpop.xlane.xlu1 %3393 }
 0x406   : > { %v3553_v9 = vadd.f32 %v5751_v24, %v3394_v8 }
 0x407   : > { %3681 = vst.msk [vmem:[%s5401_s10 + $0x330] sm:$0xff] %vm3578_vm1, %v3552_v4 }
 0x408   : > { %3682 = vst.msk [vmem:[%s5401_s10 + $0x338] sm:$0xff] %vm3578_vm1, %v3553_v9  ;;  %v3388_v10 = vpop.xlane.xlu0 %3387 }
 0x409   : > { %v3550_v19 = vadd.f32 %v5751_v24, %v3388_v10  ;;  %v3390_v11 = vpop.xlane.xlu1 %3389 }
 0x40a   : > { %v3551_v12 = vadd.f32 %v5751_v24, %v3390_v11 }
 0x40b   : > { %3679 = vst.msk [vmem:[%s5401_s10 + $0x320] sm:$0xff] %vm3578_vm1, %v3550_v19 }
 0x40c   : > { %3680 = vst.msk [vmem:[%s5401_s10 + $0x328] sm:$0xff] %vm3578_vm1, %v3551_v12  ;;  %v3400_v7 = vpop.xlane.xlu0 %3399 }
 0x40d   : > { %v3556_v13 = vadd.f32 %v5751_v24, %v3400_v7  ;;  %v3402_v17 = vpop.xlane.xlu1 %3401 }
 0x40e   : > { %v3557_v22 = vadd.f32 %v5751_v24, %v3402_v17 }
 0x40f   : > { %3685 = vst.msk [vmem:[%s5401_s10 + $0x350] sm:$0xff] %vm3578_vm1, %v3556_v13 }
 0x410   : > { %3686 = vst.msk [vmem:[%s5401_s10 + $0x358] sm:$0xff] %vm3578_vm1, %v3557_v22  ;;  %v3396_v54 = vpop.xlane.xlu0 %3395 }
 0x411   : > { %v3554_v29 = vadd.f32 %v5751_v24, %v3396_v54  ;;  %v3398_v31 = vpop.xlane.xlu1 %3397 }
 0x412   : > { %v3555_v58 = vadd.f32 %v5751_v24, %v3398_v31 }
 0x413   : > { %3683 = vst.msk [vmem:[%s5401_s10 + $0x340] sm:$0xff] %vm3578_vm1, %v3554_v29 }
 0x414   : > { %3684 = vst.msk [vmem:[%s5401_s10 + $0x348] sm:$0xff] %vm3578_vm1, %v3555_v58  ;;  %v3408_v18 = vpop.xlane.xlu0 %3407 }
 0x415   : > { %v3560_v61 = vadd.f32 %v5751_v24, %v3408_v18  ;;  %v3410_v6 = vpop.xlane.xlu1 %3409 }
 0x416   : > { %v3561_v34 = vadd.f32 %v5751_v24, %v3410_v6 }
 0x417   : > { %3689 = vst.msk [vmem:[%s5401_s10 + $0x370] sm:$0xff] %vm3578_vm1, %v3560_v61 }
 0x418   : > { %3690 = vst.msk [vmem:[%s5401_s10 + $0x378] sm:$0xff] %vm3578_vm1, %v3561_v34  ;;  %v3404_v55 = vpop.xlane.xlu0 %3403 }
 0x419   : > { %v3558_v20 = vadd.f32 %v5751_v24, %v3404_v55  ;;  %v3406_v23 = vpop.xlane.xlu1 %3405 }
 0x41a   : > { %v3559_v16 = vadd.f32 %v5751_v24, %v3406_v23 }
 0x41b   : > { %3687 = vst.msk [vmem:[%s5401_s10 + $0x360] sm:$0xff] %vm3578_vm1, %v3558_v20 }
 0x41c   : > { %3688 = vst.msk [vmem:[%s5401_s10 + $0x368] sm:$0xff] %vm3578_vm1, %v3559_v16  ;;  %v3416_v50 = vpop.xlane.xlu0 %3415 }
 0x41d   : > { %v3564_v21 = vadd.f32 %v5751_v24, %v3416_v50  ;;  %v3418_v26 = vpop.xlane.xlu1 %3417 }
 0x41e   : > { %v3565_v15 = vadd.f32 %v5751_v24, %v3418_v26 }
 0x41f   : > { %3693 = vst.msk [vmem:[%s5401_s10 + $0x390] sm:$0xff] %vm3578_vm1, %v3564_v21 }
 0x420   : > { %3694 = vst.msk [vmem:[%s5401_s10 + $0x398] sm:$0xff] %vm3578_vm1, %v3565_v15  ;;  %v3412_v56 = vpop.xlane.xlu0 %3411 }
 0x421   : > { %v3562_v60 = vadd.f32 %v5751_v24, %v3412_v56  ;;  %v3414_v30 = vpop.xlane.xlu1 %3413 }
 0x422   : > { %v3563_v33 = vadd.f32 %v5751_v24, %v3414_v30 }
 0x423   : > { %3691 = vst.msk [vmem:[%s5401_s10 + $0x380] sm:$0xff] %vm3578_vm1, %v3562_v60 }
 0x424   : > { %3692 = vst.msk [vmem:[%s5401_s10 + $0x388] sm:$0xff] %vm3578_vm1, %v3563_v33  ;;  %v3424_v25 = vpop.xlane.xlu0 %3423 }
 0x425   : > { %v3568_v2 = vadd.f32 %v5751_v24, %v3424_v25  ;;  %v3426_v52 = vpop.xlane.xlu1 %3425 }
 0x426   : > { %v3569_v32 = vadd.f32 %v5751_v24, %v3426_v52 }
 0x427   : > { %3697 = vst.msk [vmem:[%s5401_s10 + $0x3b0] sm:$0xff] %vm3578_vm1, %v3568_v2 }
 0x428   : > { %3698 = vst.msk [vmem:[%s5401_s10 + $0x3b8] sm:$0xff] %vm3578_vm1, %v3569_v32  ;;  %v3420_v5 = vpop.xlane.xlu0 %3419 }
 0x429   : > { %v3566_v40 = vadd.f32 %v5751_v24, %v3420_v5  ;;  %v3422_v43 = vpop.xlane.xlu1 %3421 }
 0x42a   : > { %v3567_v14 = vadd.f32 %v5751_v24, %v3422_v43 }
 0x42b   : > { %3695 = vst.msk [vmem:[%s5401_s10 + $0x3a0] sm:$0xff] %vm3578_vm1, %v3566_v40 }
 0x42c   : > { %3696 = vst.msk [vmem:[%s5401_s10 + $0x3a8] sm:$0xff] %vm3578_vm1, %v3567_v14  ;;  %v3432_v59 = vpop.xlane.xlu0 %3431 }
 0x42d   : > { %v3572_v0 = vadd.f32 %v5751_v24, %v3432_v59  ;;  %v3434_v27 = vpop.xlane.xlu1 %3433 }
 0x42e   : > { %v3573_v42 = vadd.f32 %v5751_v24, %v3434_v27 }
 0x42f   : > { %3701 = vst.msk [vmem:[%s5401_s10 + $0x3d0] sm:$0xff] %vm3578_vm1, %v3572_v0 }
 0x430   : > { %3702 = vst.msk [vmem:[%s5401_s10 + $0x3d8] sm:$0xff] %vm3578_vm1, %v3573_v42  ;;  %v3428_v35 = vpop.xlane.xlu0 %3427 }
 0x431   : > { %v3570_v36 = vadd.f32 %v5751_v24, %v3428_v35  ;;  %v3430_v37 = vpop.xlane.xlu1 %3429 }
 0x432   : > { %v3571_v39 = vadd.f32 %v5751_v24, %v3430_v37 }
 0x433   : > { %3699 = vst.msk [vmem:[%s5401_s10 + $0x3c0] sm:$0xff] %vm3578_vm1, %v3570_v36 }
 0x434   : > { %3700 = vst.msk [vmem:[%s5401_s10 + $0x3c8] sm:$0xff] %vm3578_vm1, %v3571_v39  ;;  %v3436_v41 = vpop.xlane.xlu0 %3435 }
 0x435   : > { %v3574_v44 = vadd.f32 %v5751_v24, %v3436_v41 }
 0x436   : > { %v3438_v45 = vpop.xlane.xlu1 %3437 }
 0x437   : > { %3703 = vst.msk [vmem:[%s5401_s10 + $0x3e0] sm:$0xff] %vm3578_vm1, %v3574_v44  ;;  %v3575_v46 = vadd.f32 %v5751_v24, %v3438_v45 }
 0x438   : > { %v3440_v47 = vpop.xlane.xlu0 %3439 }
 0x439   : > { %3704 = vst.msk [vmem:[%s5401_s10 + $0x3e8] sm:$0xff] %vm3578_vm1, %v3575_v46  ;;  %v3576_v48 = vadd.f32 %v5751_v24, %v3440_v47 }
 0x43a   : > { %v3442_v38 = vpop.xlane.xlu1 %3441 }
 0x43b   : > { %3705 = vst.msk [vmem:[%s5401_s10 + $0x3f0] sm:$0xff] %vm3578_vm1, %v3576_v48  ;;  %v3577_v49 = vadd.f32 %v5751_v24, %v3442_v38 }
 0x43d   : > { %3706 = vst.msk [vmem:[%s5401_s10 + $0x3f8] sm:$0xff] %vm3578_vm1, %v3577_v49 }
 0x43e PF: > { %s21_s11 = sadd.s32 1, %s4545_s11  }
 0x43f   : > { %p18_p4 = scmp.ge.s32.totalorder %s21_s11, 4  }
 0x441   :  { %20 = sbr.rel (!%p18_p4) target bundleno = 3 (0x3), region = 86 }

</bundles_post_ra>
